<compile_context>
chip_gen: v7x
topology: tpu7x:2x2x1
jax: 0.10.0
libtpu: 0.0.40
codegen_flags: <defaults>
</compile_context>

<pallas_src>
import functools

import jax
import jax.numpy as jnp
import numpy as np
from jax.experimental import pallas as pl
from jax.experimental.pallas import tpu as pltpu

BN_EPS = 1e-5      # nn.BatchNorm2d default
C_IN = 256
C_OUT = 256
KSIZE = 3


def _round_up(a, b):
    return (a + b - 1) // b * b


# -----------------------------------------------------------------------------
# Pallas kernel: fused 3x3 conv (+ folded BN) + bias + ReLU, one image per step
# -----------------------------------------------------------------------------
def _conv3x3_bn_relu_kernel(x_ref, w_ref, b_ref, o_ref, p_ref, q_ref,
                            *, H, W, w_pad, m_q, c_in, c_out):
    # x_ref: ((H+2)*w_pad, c_in)      bf16  flattened halo-padded image
    # w_ref: (3*c_in, 3*c_out)        bf16  [kh stacked on K] x [kw stacked on N]
    # b_ref: (1, c_out)               f32   conv bias + BN folded
    # o_ref: (H*W, c_out)             f32
    # p_ref: (m_q, 3*c_in)            bf16  scratch: kh-stacked patch
    # q_ref: (m_q, 3*c_out)           f32   scratch: per-kw partial sums

    # 1) kh-stacked patch.  Row offsets kh*w_pad are multiples of 16, so these
    #    are pure aligned vreg copies even in the packed bf16 layout.
    for kh in range(KSIZE):
        p_ref[:, pl.ds(kh * c_in, c_in)] = x_ref[pl.ds(kh * w_pad, m_q), :]

    # 2) ONE stacked matmul: K (=3*c_in) accumulates inside the MXU, the three
    #    kw taps sit side by side along the lane-dense N (=3*c_out) dimension.
    q_ref[...] = jnp.dot(p_ref[...], w_ref[...],
                         preferred_element_type=jnp.float32)

    # 3) Epilogue: combine the kw partials with +0/+1/+2 row shifts on the f32
    #    result (no packed-dtype relayout), add folded bias, ReLU, and store
    #    only the W valid columns of each padded row (aligned 256-wide stores).
    for h in range(H):
        m = h * w_pad
        acc = b_ref[...]                                  # (1, c_out) broadcast
        for kw in range(KSIZE):
            acc = acc + q_ref[pl.ds(m + kw, W), pl.ds(kw * c_out, c_out)]
        o_ref[pl.ds(h * W, W), :] = jnp.maximum(acc, 0.0)


def conv3x3_bn_relu(x_nchw, params):
    """x_nchw: (N, 256, H, W) f32 -> (N, 256, H, W) f32."""
    N, C, H, W = x_nchw.shape
    assert C == C_IN
    w = params["w"]                                        # (3*Cin, 3*Cout) bf16
    b = params["b"]                                        # (1, Cout) f32
    c_out = w.shape[1] // KSIZE

    # Padded width is a multiple of 16 (bf16 sublane packing) so every in-kernel
    # slice/copy is tile-aligned; invalid columns are dropped in the epilogue.
    w_pad = _round_up(W + 2, 16)
    m_x = (H + 2) * w_pad                                  # flattened input rows
    m_q = _round_up((H - 1) * w_pad + W + 2, 16)           # rows the matmul needs
    assert m_q <= H * w_pad

    # bf16 BEFORE the transpose (halves transpose bytes); halo-pad + flatten.
    x = jnp.transpose(x_nchw.astype(jnp.bfloat16), (0, 2, 3, 1))       # NHWC
    x = jnp.pad(x, ((0, 0), (1, 1), (1, w_pad - W - 1), (0, 0)))
    x = x.reshape(N, m_x, C)

    kernel = functools.partial(_conv3x3_bn_relu_kernel,
                               H=H, W=W, w_pad=w_pad, m_q=m_q,
                               c_in=C, c_out=c_out)
    out = pl.pallas_call(
        kernel,
        out_shape=jax.ShapeDtypeStruct((N, H * W, c_out), jnp.float32),
        grid=(N,),
        in_specs=[
            pl.BlockSpec((None, m_x, C), lambda n: (n, 0, 0)),
            pl.BlockSpec((KSIZE * C, KSIZE * c_out), lambda n: (0, 0)),
            pl.BlockSpec((1, c_out), lambda n: (0, 0)),
        ],
        out_specs=pl.BlockSpec((None, H * W, c_out), lambda n: (n, 0, 0)),
        scratch_shapes=[
            pltpu.VMEM((m_q, KSIZE * C), jnp.bfloat16),     # patch
            pltpu.VMEM((m_q, KSIZE * c_out), jnp.float32),  # matmul result
        ],
        compiler_params=pltpu.CompilerParams(
            dimension_semantics=("parallel",)),
    )(x, w, b)

    out = out.reshape(N, H, W, c_out)                      # metadata-only
    return jnp.transpose(out, (0, 3, 1, 2))                # module's NCHW output


# -----------------------------------------------------------------------------
# Parameter prep: fold conv bias + eval-mode BN into (stacked bf16 W, f32 bias)
# -----------------------------------------------------------------------------
def make_params(key):
    k1, k2, k3, k4, k5, k6 = jax.random.split(key, 6)
    w_oihw = 0.05 * jax.random.normal(k1, (C_OUT, C_IN, KSIZE, KSIZE), jnp.float32)
    b_conv = 0.01 * jax.random.normal(k2, (C_OUT,), jnp.float32)
    gamma = 1.0 + 0.1 * jax.random.normal(k3, (C_OUT,), jnp.float32)
    beta = 0.05 * jax.random.normal(k4, (C_OUT,), jnp.float32)
    r_mean = 0.02 * jax.random.normal(k5, (C_OUT,), jnp.float32)
    r_var = 1.0 + 0.1 * jnp.abs(jax.random.normal(k6, (C_OUT,), jnp.float32))

    scale = gamma / jnp.sqrt(r_var + BN_EPS)               # per-Cout
    bias = (b_conv - r_mean) * scale + beta

    # OIHW -> (kh, ci, kw, co), fold BN scale, stack: K = kh*Cin, N = kw*Cout.
    w_t = jnp.transpose(w_oihw, (2, 1, 3, 0))              # (kh, ci, kw, co)
    w_stack = (w_t * scale[None, None, None, :]).reshape(
        KSIZE * C_IN, KSIZE * C_OUT)
    return {"w": w_stack.astype(jnp.bfloat16),
            "b": bias.reshape(1, C_OUT).astype(jnp.float32)}


# -----------------------------------------------------------------------------
# Pure-JAX reference (same bf16 operands, f32 accumulation)
# -----------------------------------------------------------------------------
def reference(x_nchw, params):
    x = jnp.transpose(x_nchw.astype(jnp.bfloat16), (0, 2, 3, 1))
    w_hwio = jnp.transpose(
        params["w"].reshape(KSIZE, C_IN, KSIZE, C_OUT), (0, 2, 1, 3))
    y = jax.lax.conv_general_dilated(
        x, w_hwio, window_strides=(1, 1), padding=((1, 1), (1, 1)),
        dimension_numbers=("NHWC", "HWIO", "NHWC"),
        preferred_element_type=jnp.float32)
    y = jnp.maximum(y + params["b"].reshape(1, 1, 1, -1), 0.0)
    return jnp.transpose(y, (0, 3, 1, 2))


if __name__ == "__main__":
    key = jax.random.PRNGKey(0)
    pkey, xkey = jax.random.split(key)
    N, Hs, Ws = 2, 16, 16                      # channels fixed at 256 by the module
    params = make_params(pkey)
    x = jax.random.normal(xkey, (N, C_IN, Hs, Ws), jnp.float32)

    fwd = jax.jit(conv3x3_bn_relu)
    out = jax.block_until_ready(fwd(x, params))
    assert out.shape == (N, C_OUT, Hs, Ws), out.shape
    assert out.dtype == jnp.float32

    ref = jax.block_until_ready(jax.jit(reference)(x, params))
    np.testing.assert_allclose(np.asarray(out), np.asarray(ref),
                               rtol=2e-2, atol=2e-2)
    print("KERNEL_OK")
</pallas_src>

<mosaic_0001>
module attributes {stable_mosaic.version = 11 : i64} {
  func.func @_conv3x3_bn_relu_kernel(%arg0: i32, %arg1: memref<1x576x256xbf16, #tpu.memory_space<vmem>>, %arg2: memref<768x768xbf16, #tpu.memory_space<vmem>>, %arg3: memref<1x256xf32, #tpu.memory_space<vmem>>, %arg4: memref<1x256x256xf32, #tpu.memory_space<vmem>>, %arg5: memref<512x768xbf16, #tpu.memory_space<vmem>>, %arg6: memref<512x768xf32, #tpu.memory_space<vmem>>) attributes {dimension_semantics = [#tpu.dimension_semantics<parallel>], iteration_bounds = array<i64: 2>, scalar_prefetch = 0 : i64, scratch_operands = 2 : i64, tpu.core_type = #tpu.core_type<tc>, window_params = [{transform_indices = @transform_0, window_bounds = array<i64: 1, 576, 256>}, {pipeline_mode = #tpu.pipeline_mode<synchronous>, transform_indices = @transform_1, window_bounds = array<i64: 768, 768>}, {pipeline_mode = #tpu.pipeline_mode<synchronous>, transform_indices = @transform_2, window_bounds = array<i64: 1, 256>}, {transform_indices = @transform_3, window_bounds = array<i64: 1, 256, 256>}]} {
    %c0 = arith.constant 0 : index
    %c0_0 = arith.constant 0 : index
    %c0_1 = arith.constant 0 : index
    %0 = vector.load %arg1[%c0, %c0_0, %c0_1] : memref<1x576x256xbf16, #tpu.memory_space<vmem>>, vector<1x512x256xbf16>
    %1 = vector.shape_cast %0 : vector<1x512x256xbf16> to vector<512x256xbf16>
    %c0_2 = arith.constant 0 : index
    %c0_3 = arith.constant 0 : index
    %2 = vector.load %arg5[%c0_2, %c0_3] : memref<512x768xbf16, #tpu.memory_space<vmem>>, vector<512x256xbf16>
    tpu.vector_store %arg5[%c0_2, %c0_3], %1 {strides = array<i32>} : memref<512x768xbf16, #tpu.memory_space<vmem>>, vector<512x256xbf16>,
    %c0_4 = arith.constant 0 : index
    %c32 = arith.constant 32 : index
    %c0_5 = arith.constant 0 : index
    %3 = vector.load %arg1[%c0_4, %c32, %c0_5] : memref<1x576x256xbf16, #tpu.memory_space<vmem>>, vector<1x512x256xbf16>
    %4 = vector.shape_cast %3 : vector<1x512x256xbf16> to vector<512x256xbf16>
    %c0_6 = arith.constant 0 : index
    %c256 = arith.constant 256 : index
    %5 = vector.load %arg5[%c0_6, %c256] : memref<512x768xbf16, #tpu.memory_space<vmem>>, vector<512x256xbf16>
    tpu.vector_store %arg5[%c0_6, %c256], %4 {strides = array<i32>} : memref<512x768xbf16, #tpu.memory_space<vmem>>, vector<512x256xbf16>,
    %c0_7 = arith.constant 0 : index
    %c64 = arith.constant 64 : index
    %c0_8 = arith.constant 0 : index
    %6 = vector.load %arg1[%c0_7, %c64, %c0_8] : memref<1x576x256xbf16, #tpu.memory_space<vmem>>, vector<1x512x256xbf16>
    %7 = vector.shape_cast %6 : vector<1x512x256xbf16> to vector<512x256xbf16>
    %c0_9 = arith.constant 0 : index
    %c512 = arith.constant 512 : index
    %8 = vector.load %arg5[%c0_9, %c512] : memref<512x768xbf16, #tpu.memory_space<vmem>>, vector<512x256xbf16>
    tpu.vector_store %arg5[%c0_9, %c512], %7 {strides = array<i32>} : memref<512x768xbf16, #tpu.memory_space<vmem>>, vector<512x256xbf16>,
    %c0_10 = arith.constant 0 : index
    %c0_11 = arith.constant 0 : index
    %9 = vector.load %arg5[%c0_10, %c0_11] : memref<512x768xbf16, #tpu.memory_space<vmem>>, vector<512x768xbf16>
    %c0_12 = arith.constant 0 : index
    %c0_13 = arith.constant 0 : index
    %10 = vector.load %arg2[%c0_12, %c0_13] : memref<768x768xbf16, #tpu.memory_space<vmem>>, vector<768x768xbf16>
    %cst = arith.constant dense<0.000000e+00> : vector<512x768xf32>
    %11 = tpu.matmul %9, %10, %cst {dimension_numbers = #tpu.dot_dimension_numbers<[1], [0], [0], [1], [0, 0, 1, 1], [], []>} : vector<512x768xbf16>, vector<768x768xbf16>, vector<512x768xf32> -> vector<512x768xf32>
    %c0_14 = arith.constant 0 : index
    %c0_15 = arith.constant 0 : index
    %12 = vector.load %arg6[%c0_14, %c0_15] : memref<512x768xf32, #tpu.memory_space<vmem>>, vector<512x768xf32>
    tpu.vector_store %arg6[%c0_14, %c0_15], %11 {strides = array<i32>} : memref<512x768xf32, #tpu.memory_space<vmem>>, vector<512x768xf32>,
    %c0_16 = arith.constant 0 : index
    %c0_17 = arith.constant 0 : index
    %13 = vector.load %arg3[%c0_16, %c0_17] : memref<1x256xf32, #tpu.memory_space<vmem>>, vector<1x256xf32>
    %c0_18 = arith.constant 0 : index
    %c0_19 = arith.constant 0 : index
    %14 = vector.load %arg6[%c0_18, %c0_19] : memref<512x768xf32, #tpu.memory_space<vmem>>, vector<16x256xf32>
    %15 = vector.broadcast %13 : vector<1x256xf32> to vector<16x256xf32>
    %16 = arith.addf %15, %14 : vector<16x256xf32>
    %c1 = arith.constant 1 : index
    %c256_20 = arith.constant 256 : index
    %17 = vector.load %arg6[%c1, %c256_20] : memref<512x768xf32, #tpu.memory_space<vmem>>, vector<16x256xf32>
    %18 = arith.addf %16, %17 : vector<16x256xf32>
    %c2 = arith.constant 2 : index
    %c512_21 = arith.constant 512 : index
    %19 = vector.load %arg6[%c2, %c512_21] : memref<512x768xf32, #tpu.memory_space<vmem>>, vector<16x256xf32>
    %20 = arith.addf %18, %19 : vector<16x256xf32>
    %cst_22 = arith.constant 0.000000e+00 : f32
    %21 = vector.broadcast %cst_22 : f32 to vector<16x256xf32>
    %22 = arith.maximumf %20, %21 : vector<16x256xf32>
    %c0_23 = arith.constant 0 : index
    %c0_24 = arith.constant 0 : index
    %c0_25 = arith.constant 0 : index
    %23 = vector.load %arg4[%c0_23, %c0_24, %c0_25] : memref<1x256x256xf32, #tpu.memory_space<vmem>>, vector<1x16x256xf32>
    %24 = vector.shape_cast %23 : vector<1x16x256xf32> to vector<16x256xf32>
    %25 = vector.shape_cast %22 : vector<16x256xf32> to vector<1x16x256xf32>
    tpu.vector_store %arg4[%c0_23, %c0_24, %c0_25], %25 {strides = array<i32>} : memref<1x256x256xf32, #tpu.memory_space<vmem>>, vector<1x16x256xf32>,
    %c0_26 = arith.constant 0 : index
    %c0_27 = arith.constant 0 : index
    %26 = vector.load %arg3[%c0_26, %c0_27] : memref<1x256xf32, #tpu.memory_space<vmem>>, vector<1x256xf32>
    %c32_28 = arith.constant 32 : index
    %c0_29 = arith.constant 0 : index
    %27 = vector.load %arg6[%c32_28, %c0_29] : memref<512x768xf32, #tpu.memory_space<vmem>>, vector<16x256xf32>
    %28 = vector.broadcast %26 : vector<1x256xf32> to vector<16x256xf32>
    %29 = arith.addf %28, %27 : vector<16x256xf32>
    %c33 = arith.constant 33 : index
    %c256_30 = arith.constant 256 : index
    %30 = vector.load %arg6[%c33, %c256_30] : memref<512x768xf32, #tpu.memory_space<vmem>>, vector<16x256xf32>
    %31 = arith.addf %29, %30 : vector<16x256xf32>
    %c34 = arith.constant 34 : index
    %c512_31 = arith.constant 512 : index
    %32 = vector.load %arg6[%c34, %c512_31] : memref<512x768xf32, #tpu.memory_space<vmem>>, vector<16x256xf32>
    %33 = arith.addf %31, %32 : vector<16x256xf32>
    %cst_32 = arith.constant 0.000000e+00 : f32
    %34 = vector.broadcast %cst_32 : f32 to vector<16x256xf32>
    %35 = arith.maximumf %33, %34 : vector<16x256xf32>
    %c0_33 = arith.constant 0 : index
    %c16 = arith.constant 16 : index
    %c0_34 = arith.constant 0 : index
    %36 = vector.load %arg4[%c0_33, %c16, %c0_34] : memref<1x256x256xf32, #tpu.memory_space<vmem>>, vector<1x16x256xf32>
    %37 = vector.shape_cast %36 : vector<1x16x256xf32> to vector<16x256xf32>
    %38 = vector.shape_cast %35 : vector<16x256xf32> to vector<1x16x256xf32>
    tpu.vector_store %arg4[%c0_33, %c16, %c0_34], %38 {strides = array<i32>} : memref<1x256x256xf32, #tpu.memory_space<vmem>>, vector<1x16x256xf32>,
    %c0_35 = arith.constant 0 : index
    %c0_36 = arith.constant 0 : index
    %39 = vector.load %arg3[%c0_35, %c0_36] : memref<1x256xf32, #tpu.memory_space<vmem>>, vector<1x256xf32>
    %c64_37 = arith.constant 64 : index
    %c0_38 = arith.constant 0 : index
    %40 = vector.load %arg6[%c64_37, %c0_38] : memref<512x768xf32, #tpu.memory_space<vmem>>, vector<16x256xf32>
    %41 = vector.broadcast %39 : vector<1x256xf32> to vector<16x256xf32>
    %42 = arith.addf %41, %40 : vector<16x256xf32>
    %c65 = arith.constant 65 : index
    %c256_39 = arith.constant 256 : index
    %43 = vector.load %arg6[%c65, %c256_39] : memref<512x768xf32, #tpu.memory_space<vmem>>, vector<16x256xf32>
    %44 = arith.addf %42, %43 : vector<16x256xf32>
    %c66 = arith.constant 66 : index
    %c512_40 = arith.constant 512 : index
    %45 = vector.load %arg6[%c66, %c512_40] : memref<512x768xf32, #tpu.memory_space<vmem>>, vector<16x256xf32>
    %46 = arith.addf %44, %45 : vector<16x256xf32>
    %cst_41 = arith.constant 0.000000e+00 : f32
    %47 = vector.broadcast %cst_41 : f32 to vector<16x256xf32>
    %48 = arith.maximumf %46, %47 : vector<16x256xf32>
    %c0_42 = arith.constant 0 : index
    %c32_43 = arith.constant 32 : index
    %c0_44 = arith.constant 0 : index
    %49 = vector.load %arg4[%c0_42, %c32_43, %c0_44] : memref<1x256x256xf32, #tpu.memory_space<vmem>>, vector<1x16x256xf32>
    %50 = vector.shape_cast %49 : vector<1x16x256xf32> to vector<16x256xf32>
    %51 = vector.shape_cast %48 : vector<16x256xf32> to vector<1x16x256xf32>
    tpu.vector_store %arg4[%c0_42, %c32_43, %c0_44], %51 {strides = array<i32>} : memref<1x256x256xf32, #tpu.memory_space<vmem>>, vector<1x16x256xf32>,
    %c0_45 = arith.constant 0 : index
    %c0_46 = arith.constant 0 : index
    %52 = vector.load %arg3[%c0_45, %c0_46] : memref<1x256xf32, #tpu.memory_space<vmem>>, vector<1x256xf32>
    %c96 = arith.constant 96 : index
    %c0_47 = arith.constant 0 : index
    %53 = vector.load %arg6[%c96, %c0_47] : memref<512x768xf32, #tpu.memory_space<vmem>>, vector<16x256xf32>
    %54 = vector.broadcast %52 : vector<1x256xf32> to vector<16x256xf32>
    %55 = arith.addf %54, %53 : vector<16x256xf32>
    %c97 = arith.constant 97 : index
    %c256_48 = arith.constant 256 : index
    %56 = vector.load %arg6[%c97, %c256_48] : memref<512x768xf32, #tpu.memory_space<vmem>>, vector<16x256xf32>
    %57 = arith.addf %55, %56 : vector<16x256xf32>
    %c98 = arith.constant 98 : index
    %c512_49 = arith.constant 512 : index
    %58 = vector.load %arg6[%c98, %c512_49] : memref<512x768xf32, #tpu.memory_space<vmem>>, vector<16x256xf32>
    %59 = arith.addf %57, %58 : vector<16x256xf32>
    %cst_50 = arith.constant 0.000000e+00 : f32
    %60 = vector.broadcast %cst_50 : f32 to vector<16x256xf32>
    %61 = arith.maximumf %59, %60 : vector<16x256xf32>
    %c0_51 = arith.constant 0 : index
    %c48 = arith.constant 48 : index
    %c0_52 = arith.constant 0 : index
    %62 = vector.load %arg4[%c0_51, %c48, %c0_52] : memref<1x256x256xf32, #tpu.memory_space<vmem>>, vector<1x16x256xf32>
    %63 = vector.shape_cast %62 : vector<1x16x256xf32> to vector<16x256xf32>
    %64 = vector.shape_cast %61 : vector<16x256xf32> to vector<1x16x256xf32>
    tpu.vector_store %arg4[%c0_51, %c48, %c0_52], %64 {strides = array<i32>} : memref<1x256x256xf32, #tpu.memory_space<vmem>>, vector<1x16x256xf32>,
    %c0_53 = arith.constant 0 : index
    %c0_54 = arith.constant 0 : index
    %65 = vector.load %arg3[%c0_53, %c0_54] : memref<1x256xf32, #tpu.memory_space<vmem>>, vector<1x256xf32>
    %c128 = arith.constant 128 : index
    %c0_55 = arith.constant 0 : index
    %66 = vector.load %arg6[%c128, %c0_55] : memref<512x768xf32, #tpu.memory_space<vmem>>, vector<16x256xf32>
    %67 = vector.broadcast %65 : vector<1x256xf32> to vector<16x256xf32>
    %68 = arith.addf %67, %66 : vector<16x256xf32>
    %c129 = arith.constant 129 : index
    %c256_56 = arith.constant 256 : index
    %69 = vector.load %arg6[%c129, %c256_56] : memref<512x768xf32, #tpu.memory_space<vmem>>, vector<16x256xf32>
    %70 = arith.addf %68, %69 : vector<16x256xf32>
    %c130 = arith.constant 130 : index
    %c512_57 = arith.constant 512 : index
    %71 = vector.load %arg6[%c130, %c512_57] : memref<512x768xf32, #tpu.memory_space<vmem>>, vector<16x256xf32>
    %72 = arith.addf %70, %71 : vector<16x256xf32>
    %cst_58 = arith.constant 0.000000e+00 : f32
    %73 = vector.broadcast %cst_58 : f32 to vector<16x256xf32>
    %74 = arith.maximumf %72, %73 : vector<16x256xf32>
    %c0_59 = arith.constant 0 : index
    %c64_60 = arith.constant 64 : index
    %c0_61 = arith.constant 0 : index
    %75 = vector.load %arg4[%c0_59, %c64_60, %c0_61] : memref<1x256x256xf32, #tpu.memory_space<vmem>>, vector<1x16x256xf32>
    %76 = vector.shape_cast %75 : vector<1x16x256xf32> to vector<16x256xf32>
    %77 = vector.shape_cast %74 : vector<16x256xf32> to vector<1x16x256xf32>
    tpu.vector_store %arg4[%c0_59, %c64_60, %c0_61], %77 {strides = array<i32>} : memref<1x256x256xf32, #tpu.memory_space<vmem>>, vector<1x16x256xf32>,
    %c0_62 = arith.constant 0 : index
    %c0_63 = arith.constant 0 : index
    %78 = vector.load %arg3[%c0_62, %c0_63] : memref<1x256xf32, #tpu.memory_space<vmem>>, vector<1x256xf32>
    %c160 = arith.constant 160 : index
    %c0_64 = arith.constant 0 : index
    %79 = vector.load %arg6[%c160, %c0_64] : memref<512x768xf32, #tpu.memory_space<vmem>>, vector<16x256xf32>
    %80 = vector.broadcast %78 : vector<1x256xf32> to vector<16x256xf32>
    %81 = arith.addf %80, %79 : vector<16x256xf32>
    %c161 = arith.constant 161 : index
    %c256_65 = arith.constant 256 : index
    %82 = vector.load %arg6[%c161, %c256_65] : memref<512x768xf32, #tpu.memory_space<vmem>>, vector<16x256xf32>
    %83 = arith.addf %81, %82 : vector<16x256xf32>
    %c162 = arith.constant 162 : index
    %c512_66 = arith.constant 512 : index
    %84 = vector.load %arg6[%c162, %c512_66] : memref<512x768xf32, #tpu.memory_space<vmem>>, vector<16x256xf32>
    %85 = arith.addf %83, %84 : vector<16x256xf32>
    %cst_67 = arith.constant 0.000000e+00 : f32
    %86 = vector.broadcast %cst_67 : f32 to vector<16x256xf32>
    %87 = arith.maximumf %85, %86 : vector<16x256xf32>
    %c0_68 = arith.constant 0 : index
    %c80 = arith.constant 80 : index
    %c0_69 = arith.constant 0 : index
    %88 = vector.load %arg4[%c0_68, %c80, %c0_69] : memref<1x256x256xf32, #tpu.memory_space<vmem>>, vector<1x16x256xf32>
    %89 = vector.shape_cast %88 : vector<1x16x256xf32> to vector<16x256xf32>
    %90 = vector.shape_cast %87 : vector<16x256xf32> to vector<1x16x256xf32>
    tpu.vector_store %arg4[%c0_68, %c80, %c0_69], %90 {strides = array<i32>} : memref<1x256x256xf32, #tpu.memory_space<vmem>>, vector<1x16x256xf32>,
    %c0_70 = arith.constant 0 : index
    %c0_71 = arith.constant 0 : index
    %91 = vector.load %arg3[%c0_70, %c0_71] : memref<1x256xf32, #tpu.memory_space<vmem>>, vector<1x256xf32>
    %c192 = arith.constant 192 : index
    %c0_72 = arith.constant 0 : index
    %92 = vector.load %arg6[%c192, %c0_72] : memref<512x768xf32, #tpu.memory_space<vmem>>, vector<16x256xf32>
    %93 = vector.broadcast %91 : vector<1x256xf32> to vector<16x256xf32>
    %94 = arith.addf %93, %92 : vector<16x256xf32>
    %c193 = arith.constant 193 : index
    %c256_73 = arith.constant 256 : index
    %95 = vector.load %arg6[%c193, %c256_73] : memref<512x768xf32, #tpu.memory_space<vmem>>, vector<16x256xf32>
    %96 = arith.addf %94, %95 : vector<16x256xf32>
    %c194 = arith.constant 194 : index
    %c512_74 = arith.constant 512 : index
    %97 = vector.load %arg6[%c194, %c512_74] : memref<512x768xf32, #tpu.memory_space<vmem>>, vector<16x256xf32>
    %98 = arith.addf %96, %97 : vector<16x256xf32>
    %cst_75 = arith.constant 0.000000e+00 : f32
    %99 = vector.broadcast %cst_75 : f32 to vector<16x256xf32>
    %100 = arith.maximumf %98, %99 : vector<16x256xf32>
    %c0_76 = arith.constant 0 : index
    %c96_77 = arith.constant 96 : index
    %c0_78 = arith.constant 0 : index
    %101 = vector.load %arg4[%c0_76, %c96_77, %c0_78] : memref<1x256x256xf32, #tpu.memory_space<vmem>>, vector<1x16x256xf32>
    %102 = vector.shape_cast %101 : vector<1x16x256xf32> to vector<16x256xf32>
    %103 = vector.shape_cast %100 : vector<16x256xf32> to vector<1x16x256xf32>
    tpu.vector_store %arg4[%c0_76, %c96_77, %c0_78], %103 {strides = array<i32>} : memref<1x256x256xf32, #tpu.memory_space<vmem>>, vector<1x16x256xf32>,
    %c0_79 = arith.constant 0 : index
    %c0_80 = arith.constant 0 : index
    %104 = vector.load %arg3[%c0_79, %c0_80] : memref<1x256xf32, #tpu.memory_space<vmem>>, vector<1x256xf32>
    %c224 = arith.constant 224 : index
    %c0_81 = arith.constant 0 : index
    %105 = vector.load %arg6[%c224, %c0_81] : memref<512x768xf32, #tpu.memory_space<vmem>>, vector<16x256xf32>
    %106 = vector.broadcast %104 : vector<1x256xf32> to vector<16x256xf32>
    %107 = arith.addf %106, %105 : vector<16x256xf32>
    %c225 = arith.constant 225 : index
    %c256_82 = arith.constant 256 : index
    %108 = vector.load %arg6[%c225, %c256_82] : memref<512x768xf32, #tpu.memory_space<vmem>>, vector<16x256xf32>
    %109 = arith.addf %107, %108 : vector<16x256xf32>
    %c226 = arith.constant 226 : index
    %c512_83 = arith.constant 512 : index
    %110 = vector.load %arg6[%c226, %c512_83] : memref<512x768xf32, #tpu.memory_space<vmem>>, vector<16x256xf32>
    %111 = arith.addf %109, %110 : vector<16x256xf32>
    %cst_84 = arith.constant 0.000000e+00 : f32
    %112 = vector.broadcast %cst_84 : f32 to vector<16x256xf32>
    %113 = arith.maximumf %111, %112 : vector<16x256xf32>
    %c0_85 = arith.constant 0 : index
    %c112 = arith.constant 112 : index
    %c0_86 = arith.constant 0 : index
    %114 = vector.load %arg4[%c0_85, %c112, %c0_86] : memref<1x256x256xf32, #tpu.memory_space<vmem>>, vector<1x16x256xf32>
    %115 = vector.shape_cast %114 : vector<1x16x256xf32> to vector<16x256xf32>
    %116 = vector.shape_cast %113 : vector<16x256xf32> to vector<1x16x256xf32>
    tpu.vector_store %arg4[%c0_85, %c112, %c0_86], %116 {strides = array<i32>} : memref<1x256x256xf32, #tpu.memory_space<vmem>>, vector<1x16x256xf32>,
    %c0_87 = arith.constant 0 : index
    %c0_88 = arith.constant 0 : index
    %117 = vector.load %arg3[%c0_87, %c0_88] : memref<1x256xf32, #tpu.memory_space<vmem>>, vector<1x256xf32>
    %c256_89 = arith.constant 256 : index
    %c0_90 = arith.constant 0 : index
    %118 = vector.load %arg6[%c256_89, %c0_90] : memref<512x768xf32, #tpu.memory_space<vmem>>, vector<16x256xf32>
    %119 = vector.broadcast %117 : vector<1x256xf32> to vector<16x256xf32>
    %120 = arith.addf %119, %118 : vector<16x256xf32>
    %c257 = arith.constant 257 : index
    %c256_91 = arith.constant 256 : index
    %121 = vector.load %arg6[%c257, %c256_91] : memref<512x768xf32, #tpu.memory_space<vmem>>, vector<16x256xf32>
    %122 = arith.addf %120, %121 : vector<16x256xf32>
    %c258 = arith.constant 258 : index
    %c512_92 = arith.constant 512 : index
    %123 = vector.load %arg6[%c258, %c512_92] : memref<512x768xf32, #tpu.memory_space<vmem>>, vector<16x256xf32>
    %124 = arith.addf %122, %123 : vector<16x256xf32>
    %cst_93 = arith.constant 0.000000e+00 : f32
    %125 = vector.broadcast %cst_93 : f32 to vector<16x256xf32>
    %126 = arith.maximumf %124, %125 : vector<16x256xf32>
    %c0_94 = arith.constant 0 : index
    %c128_95 = arith.constant 128 : index
    %c0_96 = arith.constant 0 : index
    %127 = vector.load %arg4[%c0_94, %c128_95, %c0_96] : memref<1x256x256xf32, #tpu.memory_space<vmem>>, vector<1x16x256xf32>
    %128 = vector.shape_cast %127 : vector<1x16x256xf32> to vector<16x256xf32>
    %129 = vector.shape_cast %126 : vector<16x256xf32> to vector<1x16x256xf32>
    tpu.vector_store %arg4[%c0_94, %c128_95, %c0_96], %129 {strides = array<i32>} : memref<1x256x256xf32, #tpu.memory_space<vmem>>, vector<1x16x256xf32>,
    %c0_97 = arith.constant 0 : index
    %c0_98 = arith.constant 0 : index
    %130 = vector.load %arg3[%c0_97, %c0_98] : memref<1x256xf32, #tpu.memory_space<vmem>>, vector<1x256xf32>
    %c288 = arith.constant 288 : index
    %c0_99 = arith.constant 0 : index
    %131 = vector.load %arg6[%c288, %c0_99] : memref<512x768xf32, #tpu.memory_space<vmem>>, vector<16x256xf32>
    %132 = vector.broadcast %130 : vector<1x256xf32> to vector<16x256xf32>
    %133 = arith.addf %132, %131 : vector<16x256xf32>
    %c289 = arith.constant 289 : index
    %c256_100 = arith.constant 256 : index
    %134 = vector.load %arg6[%c289, %c256_100] : memref<512x768xf32, #tpu.memory_space<vmem>>, vector<16x256xf32>
    %135 = arith.addf %133, %134 : vector<16x256xf32>
    %c290 = arith.constant 290 : index
    %c512_101 = arith.constant 512 : index
    %136 = vector.load %arg6[%c290, %c512_101] : memref<512x768xf32, #tpu.memory_space<vmem>>, vector<16x256xf32>
    %137 = arith.addf %135, %136 : vector<16x256xf32>
    %cst_102 = arith.constant 0.000000e+00 : f32
    %138 = vector.broadcast %cst_102 : f32 to vector<16x256xf32>
    %139 = arith.maximumf %137, %138 : vector<16x256xf32>
    %c0_103 = arith.constant 0 : index
    %c144 = arith.constant 144 : index
    %c0_104 = arith.constant 0 : index
    %140 = vector.load %arg4[%c0_103, %c144, %c0_104] : memref<1x256x256xf32, #tpu.memory_space<vmem>>, vector<1x16x256xf32>
    %141 = vector.shape_cast %140 : vector<1x16x256xf32> to vector<16x256xf32>
    %142 = vector.shape_cast %139 : vector<16x256xf32> to vector<1x16x256xf32>
    tpu.vector_store %arg4[%c0_103, %c144, %c0_104], %142 {strides = array<i32>} : memref<1x256x256xf32, #tpu.memory_space<vmem>>, vector<1x16x256xf32>,
    %c0_105 = arith.constant 0 : index
    %c0_106 = arith.constant 0 : index
    %143 = vector.load %arg3[%c0_105, %c0_106] : memref<1x256xf32, #tpu.memory_space<vmem>>, vector<1x256xf32>
    %c320 = arith.constant 320 : index
    %c0_107 = arith.constant 0 : index
    %144 = vector.load %arg6[%c320, %c0_107] : memref<512x768xf32, #tpu.memory_space<vmem>>, vector<16x256xf32>
    %145 = vector.broadcast %143 : vector<1x256xf32> to vector<16x256xf32>
    %146 = arith.addf %145, %144 : vector<16x256xf32>
    %c321 = arith.constant 321 : index
    %c256_108 = arith.constant 256 : index
    %147 = vector.load %arg6[%c321, %c256_108] : memref<512x768xf32, #tpu.memory_space<vmem>>, vector<16x256xf32>
    %148 = arith.addf %146, %147 : vector<16x256xf32>
    %c322 = arith.constant 322 : index
    %c512_109 = arith.constant 512 : index
    %149 = vector.load %arg6[%c322, %c512_109] : memref<512x768xf32, #tpu.memory_space<vmem>>, vector<16x256xf32>
    %150 = arith.addf %148, %149 : vector<16x256xf32>
    %cst_110 = arith.constant 0.000000e+00 : f32
    %151 = vector.broadcast %cst_110 : f32 to vector<16x256xf32>
    %152 = arith.maximumf %150, %151 : vector<16x256xf32>
    %c0_111 = arith.constant 0 : index
    %c160_112 = arith.constant 160 : index
    %c0_113 = arith.constant 0 : index
    %153 = vector.load %arg4[%c0_111, %c160_112, %c0_113] : memref<1x256x256xf32, #tpu.memory_space<vmem>>, vector<1x16x256xf32>
    %154 = vector.shape_cast %153 : vector<1x16x256xf32> to vector<16x256xf32>
    %155 = vector.shape_cast %152 : vector<16x256xf32> to vector<1x16x256xf32>
    tpu.vector_store %arg4[%c0_111, %c160_112, %c0_113], %155 {strides = array<i32>} : memref<1x256x256xf32, #tpu.memory_space<vmem>>, vector<1x16x256xf32>,
    %c0_114 = arith.constant 0 : index
    %c0_115 = arith.constant 0 : index
    %156 = vector.load %arg3[%c0_114, %c0_115] : memref<1x256xf32, #tpu.memory_space<vmem>>, vector<1x256xf32>
    %c352 = arith.constant 352 : index
    %c0_116 = arith.constant 0 : index
    %157 = vector.load %arg6[%c352, %c0_116] : memref<512x768xf32, #tpu.memory_space<vmem>>, vector<16x256xf32>
    %158 = vector.broadcast %156 : vector<1x256xf32> to vector<16x256xf32>
    %159 = arith.addf %158, %157 : vector<16x256xf32>
    %c353 = arith.constant 353 : index
    %c256_117 = arith.constant 256 : index
    %160 = vector.load %arg6[%c353, %c256_117] : memref<512x768xf32, #tpu.memory_space<vmem>>, vector<16x256xf32>
    %161 = arith.addf %159, %160 : vector<16x256xf32>
    %c354 = arith.constant 354 : index
    %c512_118 = arith.constant 512 : index
    %162 = vector.load %arg6[%c354, %c512_118] : memref<512x768xf32, #tpu.memory_space<vmem>>, vector<16x256xf32>
    %163 = arith.addf %161, %162 : vector<16x256xf32>
    %cst_119 = arith.constant 0.000000e+00 : f32
    %164 = vector.broadcast %cst_119 : f32 to vector<16x256xf32>
    %165 = arith.maximumf %163, %164 : vector<16x256xf32>
    %c0_120 = arith.constant 0 : index
    %c176 = arith.constant 176 : index
    %c0_121 = arith.constant 0 : index
    %166 = vector.load %arg4[%c0_120, %c176, %c0_121] : memref<1x256x256xf32, #tpu.memory_space<vmem>>, vector<1x16x256xf32>
    %167 = vector.shape_cast %166 : vector<1x16x256xf32> to vector<16x256xf32>
    %168 = vector.shape_cast %165 : vector<16x256xf32> to vector<1x16x256xf32>
    tpu.vector_store %arg4[%c0_120, %c176, %c0_121], %168 {strides = array<i32>} : memref<1x256x256xf32, #tpu.memory_space<vmem>>, vector<1x16x256xf32>,
    %c0_122 = arith.constant 0 : index
    %c0_123 = arith.constant 0 : index
    %169 = vector.load %arg3[%c0_122, %c0_123] : memref<1x256xf32, #tpu.memory_space<vmem>>, vector<1x256xf32>
    %c384 = arith.constant 384 : index
    %c0_124 = arith.constant 0 : index
    %170 = vector.load %arg6[%c384, %c0_124] : memref<512x768xf32, #tpu.memory_space<vmem>>, vector<16x256xf32>
    %171 = vector.broadcast %169 : vector<1x256xf32> to vector<16x256xf32>
    %172 = arith.addf %171, %170 : vector<16x256xf32>
    %c385 = arith.constant 385 : index
    %c256_125 = arith.constant 256 : index
    %173 = vector.load %arg6[%c385, %c256_125] : memref<512x768xf32, #tpu.memory_space<vmem>>, vector<16x256xf32>
    %174 = arith.addf %172, %173 : vector<16x256xf32>
    %c386 = arith.constant 386 : index
    %c512_126 = arith.constant 512 : index
    %175 = vector.load %arg6[%c386, %c512_126] : memref<512x768xf32, #tpu.memory_space<vmem>>, vector<16x256xf32>
    %176 = arith.addf %174, %175 : vector<16x256xf32>
    %cst_127 = arith.constant 0.000000e+00 : f32
    %177 = vector.broadcast %cst_127 : f32 to vector<16x256xf32>
    %178 = arith.maximumf %176, %177 : vector<16x256xf32>
    %c0_128 = arith.constant 0 : index
    %c192_129 = arith.constant 192 : index
    %c0_130 = arith.constant 0 : index
    %179 = vector.load %arg4[%c0_128, %c192_129, %c0_130] : memref<1x256x256xf32, #tpu.memory_space<vmem>>, vector<1x16x256xf32>
    %180 = vector.shape_cast %179 : vector<1x16x256xf32> to vector<16x256xf32>
    %181 = vector.shape_cast %178 : vector<16x256xf32> to vector<1x16x256xf32>
    tpu.vector_store %arg4[%c0_128, %c192_129, %c0_130], %181 {strides = array<i32>} : memref<1x256x256xf32, #tpu.memory_space<vmem>>, vector<1x16x256xf32>,
    %c0_131 = arith.constant 0 : index
    %c0_132 = arith.constant 0 : index
    %182 = vector.load %arg3[%c0_131, %c0_132] : memref<1x256xf32, #tpu.memory_space<vmem>>, vector<1x256xf32>
    %c416 = arith.constant 416 : index
    %c0_133 = arith.constant 0 : index
    %183 = vector.load %arg6[%c416, %c0_133] : memref<512x768xf32, #tpu.memory_space<vmem>>, vector<16x256xf32>
    %184 = vector.broadcast %182 : vector<1x256xf32> to vector<16x256xf32>
    %185 = arith.addf %184, %183 : vector<16x256xf32>
    %c417 = arith.constant 417 : index
    %c256_134 = arith.constant 256 : index
    %186 = vector.load %arg6[%c417, %c256_134] : memref<512x768xf32, #tpu.memory_space<vmem>>, vector<16x256xf32>
    %187 = arith.addf %185, %186 : vector<16x256xf32>
    %c418 = arith.constant 418 : index
    %c512_135 = arith.constant 512 : index
    %188 = vector.load %arg6[%c418, %c512_135] : memref<512x768xf32, #tpu.memory_space<vmem>>, vector<16x256xf32>
    %189 = arith.addf %187, %188 : vector<16x256xf32>
    %cst_136 = arith.constant 0.000000e+00 : f32
    %190 = vector.broadcast %cst_136 : f32 to vector<16x256xf32>
    %191 = arith.maximumf %189, %190 : vector<16x256xf32>
    %c0_137 = arith.constant 0 : index
    %c208 = arith.constant 208 : index
    %c0_138 = arith.constant 0 : index
    %192 = vector.load %arg4[%c0_137, %c208, %c0_138] : memref<1x256x256xf32, #tpu.memory_space<vmem>>, vector<1x16x256xf32>
    %193 = vector.shape_cast %192 : vector<1x16x256xf32> to vector<16x256xf32>
    %194 = vector.shape_cast %191 : vector<16x256xf32> to vector<1x16x256xf32>
    tpu.vector_store %arg4[%c0_137, %c208, %c0_138], %194 {strides = array<i32>} : memref<1x256x256xf32, #tpu.memory_space<vmem>>, vector<1x16x256xf32>,
    %c0_139 = arith.constant 0 : index
    %c0_140 = arith.constant 0 : index
    %195 = vector.load %arg3[%c0_139, %c0_140] : memref<1x256xf32, #tpu.memory_space<vmem>>, vector<1x256xf32>
    %c448 = arith.constant 448 : index
    %c0_141 = arith.constant 0 : index
    %196 = vector.load %arg6[%c448, %c0_141] : memref<512x768xf32, #tpu.memory_space<vmem>>, vector<16x256xf32>
    %197 = vector.broadcast %195 : vector<1x256xf32> to vector<16x256xf32>
    %198 = arith.addf %197, %196 : vector<16x256xf32>
    %c449 = arith.constant 449 : index
    %c256_142 = arith.constant 256 : index
    %199 = vector.load %arg6[%c449, %c256_142] : memref<512x768xf32, #tpu.memory_space<vmem>>, vector<16x256xf32>
    %200 = arith.addf %198, %199 : vector<16x256xf32>
    %c450 = arith.constant 450 : index
    %c512_143 = arith.constant 512 : index
    %201 = vector.load %arg6[%c450, %c512_143] : memref<512x768xf32, #tpu.memory_space<vmem>>, vector<16x256xf32>
    %202 = arith.addf %200, %201 : vector<16x256xf32>
    %cst_144 = arith.constant 0.000000e+00 : f32
    %203 = vector.broadcast %cst_144 : f32 to vector<16x256xf32>
    %204 = arith.maximumf %202, %203 : vector<16x256xf32>
    %c0_145 = arith.constant 0 : index
    %c224_146 = arith.constant 224 : index
    %c0_147 = arith.constant 0 : index
    %205 = vector.load %arg4[%c0_145, %c224_146, %c0_147] : memref<1x256x256xf32, #tpu.memory_space<vmem>>, vector<1x16x256xf32>
    %206 = vector.shape_cast %205 : vector<1x16x256xf32> to vector<16x256xf32>
    %207 = vector.shape_cast %204 : vector<16x256xf32> to vector<1x16x256xf32>
    tpu.vector_store %arg4[%c0_145, %c224_146, %c0_147], %207 {strides = array<i32>} : memref<1x256x256xf32, #tpu.memory_space<vmem>>, vector<1x16x256xf32>,
    %c0_148 = arith.constant 0 : index
    %c0_149 = arith.constant 0 : index
    %208 = vector.load %arg3[%c0_148, %c0_149] : memref<1x256xf32, #tpu.memory_space<vmem>>, vector<1x256xf32>
    %c480 = arith.constant 480 : index
    %c0_150 = arith.constant 0 : index
    %209 = vector.load %arg6[%c480, %c0_150] : memref<512x768xf32, #tpu.memory_space<vmem>>, vector<16x256xf32>
    %210 = vector.broadcast %208 : vector<1x256xf32> to vector<16x256xf32>
    %211 = arith.addf %210, %209 : vector<16x256xf32>
    %c481 = arith.constant 481 : index
    %c256_151 = arith.constant 256 : index
    %212 = vector.load %arg6[%c481, %c256_151] : memref<512x768xf32, #tpu.memory_space<vmem>>, vector<16x256xf32>
    %213 = arith.addf %211, %212 : vector<16x256xf32>
    %c482 = arith.constant 482 : index
    %c512_152 = arith.constant 512 : index
    %214 = vector.load %arg6[%c482, %c512_152] : memref<512x768xf32, #tpu.memory_space<vmem>>, vector<16x256xf32>
    %215 = arith.addf %213, %214 : vector<16x256xf32>
    %cst_153 = arith.constant 0.000000e+00 : f32
    %216 = vector.broadcast %cst_153 : f32 to vector<16x256xf32>
    %217 = arith.maximumf %215, %216 : vector<16x256xf32>
    %c0_154 = arith.constant 0 : index
    %c240 = arith.constant 240 : index
    %c0_155 = arith.constant 0 : index
    %218 = vector.load %arg4[%c0_154, %c240, %c0_155] : memref<1x256x256xf32, #tpu.memory_space<vmem>>, vector<1x16x256xf32>
    %219 = vector.shape_cast %218 : vector<1x16x256xf32> to vector<16x256xf32>
    %220 = vector.shape_cast %217 : vector<16x256xf32> to vector<1x16x256xf32>
    tpu.vector_store %arg4[%c0_154, %c240, %c0_155], %220 {strides = array<i32>} : memref<1x256x256xf32, #tpu.memory_space<vmem>>, vector<1x16x256xf32>,
    return
  }
  func.func @transform_0(%arg0: i32) -> (i32, i32, i32) {
    %c0_i32 = arith.constant 0 : i32
    %c0_i32_0 = arith.constant 0 : i32
    %c0_i32_1 = arith.constant 0 : i32
    return %arg0, %c0_i32, %c0_i32_0 : i32, i32, i32
  }
  func.func @transform_1(%arg0: i32) -> (i32, i32) {
    %c0_i32 = arith.constant 0 : i32
    %c0_i32_0 = arith.constant 0 : i32
    %c0_i32_1 = arith.constant 0 : i32
    return %c0_i32, %c0_i32_0 : i32, i32
  }
  func.func @transform_2(%arg0: i32) -> (i32, i32) {
    %c0_i32 = arith.constant 0 : i32
    %c0_i32_0 = arith.constant 0 : i32
    %c0_i32_1 = arith.constant 0 : i32
    return %c0_i32, %c0_i32_0 : i32, i32
  }
  func.func @transform_3(%arg0: i32) -> (i32, i32, i32) {
    %c0_i32 = arith.constant 0 : i32
    %c0_i32_0 = arith.constant 0 : i32
    %c0_i32_1 = arith.constant 0 : i32
    return %arg0, %c0_i32, %c0_i32_0 : i32, i32, i32
  }
}

</mosaic_0001>

<bundles_post_ra>
// kernel: conv3x3_bn_relu.1
= control target key start
LH: loop header
LB: loop body
LE: loop exit
PB: predicated region body
PF: predicated region fallthrough
CT: control target
= control target key end

     0   :  { %8 = vsyncpa [#allocation5], 0  ;;  %s13229_s0 = inlined_call_operand.vmem [shape: bf16[2,576,256], index: 0, kind: input, shape index: {}]   ;;  %s13230_s1 = inlined_call_operand.vmem [shape: bf16[768,768], index: 1, kind: input, shape index: {}]   ;;  %s13231_s2 = inlined_call_operand.vmem [shape: f32[1,256], index: 2, kind: input, shape index: {}]   ;;  %s13232_s3 = inlined_call_operand.hbm [shape: f32[2,256,256], index: 3, kind: output, shape index: {}]  }
   0x1   :  { %10 = vsyncpa [#allocation5 + $0x1], 0  ;;  %s10608_s12 = smov 0   ;;  %s10610_s13 = smov 0  }
   0x2   :  { %s10612_s14 = smov 0   ;;  %s10614_s15 = smov 0  }
   0x3 LB: > { %s10629_s16 = sadd.s32 4294967295, %s10583_s15   ;;  %s8480_s17 = sadd.s32 4294967294, %s10583_s15   ;;  %s10583_s15 = sphi %s10614_s15, %s13238_s15   ;;  %s10579_s14 = sphi %s10612_s14, %s13237_s14   ;;  %s10575_s13 = sphi %s10610_s13, %s13236_s13   ;;  %s10571_s12 = sphi %s10608_s12, %s13235_s12  }
   0x4   : > { %s10633_s18 = sadd.s32 1, %s10583_s15   ;;  %s91_s19 = sadd.s32 1, %s10579_s14 }
   0x5   : > { %s88_s20 = ssub.s32 %s10583_s15, %s10633_s18  ;;  %p101_p0 = scmp.ne.s32.totalorder %s10579_s14, %s10575_s13 }
   0x6   : > { %p89_p1 = scmp.eq.s32.totalorder %s88_s20, 0  ;;  %p102_p2 = scmp.eq.s32.totalorder %s10629_s16, 1 }
   0x7   : > { %p107_p3 = scmp.ne.s32.totalorder %s10575_s13, %s10571_s12  ;;  %p108_p4 = scmp.eq.s32.totalorder %s8480_s17, 1 }
   0x8   : > { %s10644_s21 = scalar_select %p89_p1, %s10579_s14, %s91_s19  }
   0x9   : > { %p10646_p5 = por %p102_p2, %p101_p0  ;;  %p10650_p6 = por %p108_p4, %p107_p3 }
   0xa   : > { %p8483_p7 = scmp.ge.s32.totalorder %s10583_s15, 1  ;;  %p140_p8 = scmp.lt.s32.totalorder %s10583_s15, 3 }
   0xc   : > { %p141_p9 = pnand %p8483_p7, %p140_p8 }
   0xd   : > { %v9814_v0 = vld [vmem:[%s13230_s1 + $0x4] ss:$24 sps:$4 sm:$0xff] (!%p141_p9)   ;;  %v9818_v2 = vld [vmem:[%s13230_s1] ss:$24 sps:$4 sm:$0xff] (!%p141_p9)   ;;  %v9820_v4 = vld [vmem:[%s13230_s1 + $0x34] ss:$24 sps:$4 sm:$0xff] (!%p141_p9)  }
   0xe   : > { %144 = sbr.rel (%p141_p9) target bundleno = 1468 (0x5bc), region = 32  ;;  %v10662_v1 = vld [vmem:[%s13230_s1 + $0x304] ss:$24 sps:$4 sm:$0xff] (!%p141_p9)   ;;  %3433 = vmatprep.subr.bf16.mxu1 (!%p141_p9), %v9814_v0  ;;  %v10670_v3 = vld [vmem:[%s13230_s1 + $0x300] ss:$24 sps:$4 sm:$0xff] (!%p141_p9)   ;;  %p164_p10 = scmp.lt.s32.totalorder (!%p141_p9), %s10629_s16, 1 }
   0xf   : > { %3786 = vmatprep.subr.bf16.mxu0 (!%p141_p9), %v10662_v1  ;;  %3434 = vmatpush1.bf16.msra.mxu1 (!%p141_p9), %v9818_v2  ;;  %v10680_v5 = vld [vmem:[%s13230_s1 + $0x334] ss:$24 sps:$4 sm:$0xff] (!%p141_p9)   ;;  %v9824_v6 = vld [vmem:[%s13230_s1 + $0x30] ss:$24 sps:$4 sm:$0xff] (!%p141_p9)   ;;  %v9826_v8 = vld [vmem:[%s13230_s1 + $0x64] ss:$24 sps:$4 sm:$0xff] (!%p141_p9)  }
  0x10   : > { %3787 = vmatpush1.bf16.msra.mxu0 (!%p141_p9), %v10670_v3  ;;  %3435 = vmatprep.subr.bf16.mxu1 (!%p141_p9), %v9820_v4  ;;  %v10688_v7 = vld [vmem:[%s13230_s1 + $0x330] ss:$24 sps:$4 sm:$0xff] (!%p141_p9)   ;;  %v10697_v9 = vld [vmem:[%s13230_s1 + $0x364] ss:$24 sps:$4 sm:$0xff] (!%p141_p9)   ;;  %v9830_v10 = vld [vmem:[%s13230_s1 + $0x60] ss:$24 sps:$4 sm:$0xff] (!%p141_p9)  }
  0x11   : > { %3788 = vmatprep.subr.bf16.mxu0 (!%p141_p9), %v10680_v5  ;;  %v10705_v11 = vld [vmem:[%s13230_s1 + $0x360] ss:$24 sps:$4 sm:$0xff] (!%p141_p9)   ;;  %v9832_v12 = vld [vmem:[%s13230_s1 + $0x94] ss:$24 sps:$4 sm:$0xff] (!%p141_p9)   ;;  %v9836_v14 = vld [vmem:[%s13230_s1 + $0x90] ss:$24 sps:$4 sm:$0xff] (!%p141_p9)  }
  0x12   : > { %v10715_v13 = vld [vmem:[%s13230_s1 + $0x394] ss:$24 sps:$4 sm:$0xff] (!%p141_p9)   ;;  %v10724_v15 = vld [vmem:[%s13230_s1 + $0x390] ss:$24 sps:$4 sm:$0xff] (!%p141_p9)   ;;  %v9838_v16 = vld [vmem:[%s13230_s1 + $0xc4] ss:$24 sps:$4 sm:$0xff] (!%p141_p9)  }
  0x13   : > { %3436 = vmatpush1.bf16.msra.mxu1 (!%p141_p9), %v9824_v6  ;;  %v10733_v17 = vld [vmem:[%s13230_s1 + $0x3c4] ss:$24 sps:$4 sm:$0xff] (!%p141_p9)   ;;  %v9842_v18 = vld [vmem:[%s13230_s1 + $0xc0] ss:$24 sps:$4 sm:$0xff] (!%p141_p9)   ;;  %v9844_v20 = vld [vmem:[%s13230_s1 + $0xf4] ss:$24 sps:$4 sm:$0xff] (!%p141_p9)  }
  0x14   : > { %3789 = vmatpush1.bf16.msra.mxu0 (!%p141_p9), %v10688_v7  ;;  %3437 = vmatprep.subr.bf16.mxu1 (!%p141_p9), %v9826_v8  ;;  %v10741_v19 = vld [vmem:[%s13230_s1 + $0x3c0] ss:$24 sps:$4 sm:$0xff] (!%p141_p9)   ;;  %v10751_v21 = vld [vmem:[%s13230_s1 + $0x3f4] ss:$24 sps:$4 sm:$0xff] (!%p141_p9)   ;;  %v9848_v22 = vld [vmem:[%s13230_s1 + $0xf0] ss:$24 sps:$4 sm:$0xff] (!%p141_p9)  }
  0x15   : > { %3790 = vmatprep.subr.bf16.mxu0 %v10697_v9  ;;  %v10760_v23 = vld [vmem:[%s13230_s1 + $0x3f0] ss:$24 sps:$4 sm:$0xff]   ;;  %v9850_v24 = vld [vmem:[%s13230_s1 + $0x124] ss:$24 sps:$4 sm:$0xff]   ;;  %v9854_v26 = vld [vmem:[%s13230_s1 + $0x120] ss:$24 sps:$4 sm:$0xff]  }
  0x16   : > { %v10769_v25 = vld [vmem:[%s13230_s1 + $0x424] ss:$24 sps:$4 sm:$0xff]   ;;  %v10777_v27 = vld [vmem:[%s13230_s1 + $0x420] ss:$24 sps:$4 sm:$0xff]   ;;  %v9856_v28 = vld [vmem:[%s13230_s1 + $0x154] ss:$24 sps:$4 sm:$0xff]  }
  0x17   : > { %3438 = vmatpush1.bf16.msra.mxu1 %v9830_v10  ;;  %v10787_v29 = vld [vmem:[%s13230_s1 + $0x454] ss:$24 sps:$4 sm:$0xff]   ;;  %v9860_v30 = vld [vmem:[%s13230_s1 + $0x150] ss:$24 sps:$4 sm:$0xff]   ;;  %v9862_v32 = vld [vmem:[%s13230_s1 + $0x184] ss:$24 sps:$4 sm:$0xff]  }
  0x18   : > { %3791 = vmatpush1.bf16.msra.mxu0 %v10705_v11  ;;  %3439 = vmatprep.subr.bf16.mxu1 %v9832_v12  ;;  %v10796_v31 = vld [vmem:[%s13230_s1 + $0x450] ss:$24 sps:$4 sm:$0xff]   ;;  %v10806_v33 = vld [vmem:[%s13230_s1 + $0x484] ss:$24 sps:$4 sm:$0xff]   ;;  %v9866_v34 = vld [vmem:[%s13230_s1 + $0x180] ss:$24 sps:$4 sm:$0xff]  }
  0x19   : > { %3792 = vmatprep.subr.bf16.mxu0 %v10715_v13  ;;  %v10814_v35 = vld [vmem:[%s13230_s1 + $0x480] ss:$24 sps:$4 sm:$0xff]   ;;  %v9868_v36 = vld [vmem:[%s13230_s1 + $0x1b4] ss:$24 sps:$4 sm:$0xff]   ;;  %s165_s26 = scalar_select %p164_p10, %s10629_s16, 1  ;;  %vm7026_vm0 = vcmask 1046528  }
  0x1a   : > { %v10825_v37 = vld [vmem:[%s13230_s1 + $0x4b4] ss:$24 sps:$4 sm:$0xff]   ;;  %v9872_v38 = vld [vmem:[%s13230_s1 + $0x1b0] ss:$24 sps:$4 sm:$0xff]   ;;  %v9874_v40 = vld [vmem:[%s13230_s1 + $0x1e4] ss:$24 sps:$4 sm:$0xff]  }
  0x1b   : > { %3440 = vmatpush1.bf16.msra.mxu1 %v9836_v14  ;;  %v10834_v39 = vld [vmem:[%s13230_s1 + $0x4b0] ss:$24 sps:$4 sm:$0xff]   ;;  %s9772_s8 = smul.u32 576, %s165_s26  ;;  %v10843_v41 = vld [vmem:[%s13230_s1 + $0x4e4] ss:$24 sps:$4 sm:$0xff]   ;;  %s161_s20 = sand.u32 1, %s10575_s13  }
  0x1c   : > { %3793 = vmatpush1.bf16.msra.mxu0 %v10724_v15  ;;  %3441 = vmatprep.subr.bf16.mxu1 %v9838_v16  ;;  %v9878_v42 = vld [vmem:[%s13230_s1 + $0x1e0] ss:$24 sps:$4 sm:$0xff]   ;;  %v9880_v44 = vld [vmem:[%s13230_s1 + $0x214] ss:$24 sps:$4 sm:$0xff]   ;;  %v9884_v46 = vld [vmem:[%s13230_s1 + $0x210] ss:$24 sps:$4 sm:$0xff]  }
  0x1d   : > { %3794 = vmatprep.subr.bf16.mxu0 %v10733_v17  ;;  %v10851_v43 = vld [vmem:[%s13230_s1 + $0x4e0] ss:$24 sps:$4 sm:$0xff]   ;;  %s10860_s28 = scalar_lea.vmem %s13229_s0, %s9772_s8  ;;  %v10866_v45 = vld [vmem:[%s13230_s1 + $0x514] ss:$24 sps:$4 sm:$0xff]   ;;  %v10874_v47 = vld [vmem:[%s13230_s1 + $0x510] ss:$24 sps:$4 sm:$0xff]  }
  0x1e   : > { %v9910_v48 = vld [vmem:[%s10860_s28 + $0x4] ss:$8 sps:$4 sm:$0xff]   ;;  %v9890_v52 = vld [vmem:[%s13230_s1 + $0x240] ss:$24 sps:$4 sm:$0xff]   ;;  %v9896_v56 = vld [vmem:[%s13230_s1 + $0x270] ss:$24 sps:$4 sm:$0xff]  }
  0x1f   : > { %3442 = vmatpush1.bf16.msra.mxu1 %v9842_v18  ;;  %v9886_v49 = vld [vmem:[%s13230_s1 + $0x244] ss:$24 sps:$4 sm:$0xff]   ;;  %3465 = vmatprep.mubr.bf16.mxu1 %v9910_v48  ;;  %v10898_v53 = vld [vmem:[%s13230_s1 + $0x540] ss:$24 sps:$4 sm:$0xff]   ;;  %v9892_v54 = vld [vmem:[%s13230_s1 + $0x274] ss:$24 sps:$4 sm:$0xff]  }
  0x20   : > { %3795 = vmatpush1.bf16.msra.mxu0 %v10741_v19  ;;  %3443 = vmatprep.subr.bf16.mxu1 %v9844_v20  ;;  %v10882_v50 = vld [vmem:[%s10860_s28 + $0x24] ss:$8 sps:$4 sm:$0xff]   ;;  %v10915_v57 = vld [vmem:[%s13230_s1 + $0x570] ss:$24 sps:$4 sm:$0xff]   ;;  %v9902_v60 = vld [vmem:[%s13230_s1 + $0x2a0] ss:$24 sps:$4 sm:$0xff]  }
  0x21   : > { %3796 = vmatprep.subr.bf16.mxu0 %v10751_v21  ;;  %v10888_v51 = vld [vmem:[%s13230_s1 + $0x544] ss:$24 sps:$4 sm:$0xff]   ;;  %3818 = vmatprep.mubr.bf16.mxu0 %v10882_v50  ;;  %v10907_v55 = vld [vmem:[%s13230_s1 + $0x574] ss:$24 sps:$4 sm:$0xff]   ;;  %v10933_v61 = vld [vmem:[%s13230_s1 + $0x5a0] ss:$24 sps:$4 sm:$0xff]  }
  0x22   : > { %v9898_v58 = vld [vmem:[%s13230_s1 + $0x2a4] ss:$24 sps:$4 sm:$0xff]   ;;  %v9904_v62 = vld [vmem:[%s13230_s1 + $0x2d4] ss:$24 sps:$4 sm:$0xff]   ;;  %v9908_v0 = vld [vmem:[%s13230_s1 + $0x2d0] ss:$24 sps:$4 sm:$0xff]  }
  0x23   : > { %3444 = vmatpush1.bf16.msra.mxu1 %v9848_v22  ;;  %v10925_v59 = vld [vmem:[%s13230_s1 + $0x5a4] ss:$24 sps:$4 sm:$0xff]   ;;  %v10943_v63 = vld [vmem:[%s13230_s1 + $0x5d4] ss:$24 sps:$4 sm:$0xff]   ;;  %v10952_v2 = vld [vmem:[%s13230_s1 + $0x5d0] ss:$24 sps:$4 sm:$0xff]  }
  0x24   : > { %3797 = vmatpush1.bf16.msra.mxu0 %v10760_v23  ;;  %3445 = vmatprep.subr.bf16.mxu1 %v9850_v24  ;;  %v9918_v4 = vld [vmem:[%s13230_s1 + $0x604] ss:$24 sps:$4 sm:$0xff]   ;;  %v9914_v6 = vld [vmem:[%s10860_s28] ss:$8 sps:$4 sm:$0xff]   ;;  %v9927_v16 = vld [vmem:[%s13230_s1 + $0x634] ss:$24 sps:$4 sm:$0xff]  }
  0x25   : > { %3798 = vmatprep.subr.bf16.mxu0 %v10769_v25  ;;  %v9915_v8 = vld [vmem:[%s10860_s28 + $0x20] ss:$8 sps:$4 sm:$0xff]   ;;  %v9919_v12 = vld [vmem:[%s10860_s28 + $0x14] ss:$8 sps:$4 sm:$0xff]   ;;  %v9923_v20 = vld [vmem:[%s10860_s28 + $0x10] ss:$8 sps:$4 sm:$0xff]  }
  0x26   : > { %v9916_v10 = vld [vmem:[%s13230_s1 + $0x600] ss:$24 sps:$4 sm:$0xff]   ;;  %v9921_v14 = vld [vmem:[%s10860_s28 + $0x34] ss:$8 sps:$4 sm:$0xff]   ;;  %v9925_v18 = vld [vmem:[%s13230_s1 + $0x630] ss:$24 sps:$4 sm:$0xff]  }
  0x27   : > { %3446 = vmatpush1.bf16.msra.mxu1 %v9854_v26  ;;  %v9924_v22 = vld [vmem:[%s10860_s28 + $0x30] ss:$8 sps:$4 sm:$0xff]   ;;  %v10981_v24 = vld [vmem:[%s10860_s28 + $0x44] ss:$8 sps:$4 sm:$0xff]   ;;  %v11002_v26 = vld [vmem:[%s10860_s28 + $0x40] ss:$8 sps:$4 sm:$0xff]  }
  0x28   : > { %3799 = vmatpush1.bf16.msra.mxu0 %v10777_v27  ;;  %3447 = vmatprep.subr.bf16.mxu1 %v9856_v28  ;;  %v11005_v28 = vld [vmem:[%s10860_s28 + $0x54] ss:$8 sps:$4 sm:$0xff]   ;;  %vm7057_vm1 = vcmask 1045504   ;;  %s8484_s24 = sshll.u32 %s161_s20, 9  ;;  %s8971_s19 = sshll.u32 %s10629_s16, 13 }
  0x29   : > { %3800 = vmatprep.subr.bf16.mxu0 %v10787_v29  ;;  %v9999_v48 = vld [vmem:[%s13230_s1 + $0x874] ss:$24 sps:$4 sm:$0xff]   ;;  %s12655_s25 = scalar_lea.vmem [#allocation4], %s8484_s24  ;;  %s13180_s29 = scalar_lea.hbm %s13232_s3, %s8971_s19 }
  0x2a   : > { %s8418_s24 = sshll.u32 %s12655_s25, 4  ;;  %s13188_s16 = scalar_lea.sflag [#allocation5], %s161_s20  ;;  %s13182_s24 = int_to_ptr.vmem [resolvable:$true] %s8418_s24 }
  0x2b   : > { %3448 = vmatpush1.bf16.msra.mxu1 %v9860_v30  ;;  %v9943_v30 = vld [vmem:[%s13230_s1 + $0x6c0] ss:$24 sps:$4 sm:$0xff]   ;;  %s10521_s30 = scalar_lea.vmem %s13182_s24, 8192 }
  0x2c   : > { %3801 = vmatpush1.bf16.msra.mxu0 %v10796_v31  ;;  %3449 = vmatprep.subr.bf16.mxu1 %v9862_v32  ;;  %v11029_v32 = vld [vmem:[%s10860_s28 + $0x64] ss:$8 sps:$4 sm:$0xff]   ;;  %p10522_p11 = scmp.ne.s32.totalorder %s13182_s24, %s10521_s30 }
  0x2d   : > { %3802 = vmatprep.subr.bf16.mxu0 %v10806_v33 }
  0x2e   : > { %p10523_p12 = pnand %p10522_p11, %p10646_p5 }
  0x2f   : > { %3450 = vmatpush1.bf16.msra.mxu1 %v9866_v34  ;;  %v9955_v34 = vld [vmem:[%s13230_s1 + $0x720] ss:$24 sps:$4 sm:$0xff]  }
  0x30   : > { %3803 = vmatpush1.bf16.msra.mxu0 %v10814_v35  ;;  %3451 = vmatprep.subr.bf16.mxu1 %v9868_v36  ;;  %v11050_v36 = vld [vmem:[%s10860_s28 + $0x74] ss:$8 sps:$4 sm:$0xff]   ;;  %p10524_p13 = pneg %p10523_p12 }
  0x31   : > { %3804 = vmatprep.subr.bf16.mxu0 %v10825_v37 }
  0x33   : > { %3452 = vmatpush1.bf16.msra.mxu1 %v9872_v38  ;;  %v9967_v38 = vld [vmem:[%s13230_s1 + $0x780] ss:$24 sps:$4 sm:$0xff]  }
  0x34   : > { %3805 = vmatpush1.bf16.msra.mxu0 %v10834_v39  ;;  %3453 = vmatprep.subr.bf16.mxu1 %v9874_v40  ;;  %v9975_v40 = vld [vmem:[%s13230_s1 + $0x7b4] ss:$24 sps:$4 sm:$0xff]  }
  0x35   : > { %3806 = vmatprep.subr.bf16.mxu0 %v10843_v41 }
  0x37   : > { %3454 = vmatpush1.bf16.msra.mxu1 %v9878_v42  ;;  %v9979_v42 = vld [vmem:[%s13230_s1 + $0x7e0] ss:$24 sps:$4 sm:$0xff]  }
  0x38   : > { %3807 = vmatpush1.bf16.msra.mxu0 %v10851_v43  ;;  %3455 = vmatprep.subr.bf16.mxu1 %v9880_v44  ;;  %v9987_v44 = vld [vmem:[%s13230_s1 + $0x814] ss:$24 sps:$4 sm:$0xff]  }
  0x39   : > { %3808 = vmatprep.subr.bf16.mxu0 %v10866_v45 }
  0x3b   : > { %3456 = vmatpush1.bf16.msra.mxu1 %v9884_v46  ;;  %v9991_v46 = vld [vmem:[%s13230_s1 + $0x840] ss:$24 sps:$4 sm:$0xff]  }
  0x3c   : > { %3809 = vmatpush1.bf16.msra.mxu0 %v10874_v47  ;;  %3457 = vmatprep.subr.bf16.mxu1 %v9886_v49  ;;  %v11131_v49 = vld [vmem:[%s10860_s28 + $0xa4] ss:$8 sps:$4 sm:$0xff]  }
  0x3d   : > { %3810 = vmatprep.subr.bf16.mxu0 %v10888_v51 }
  0x3f   : > { %3458 = vmatpush1.bf16.msra.mxu1 %v9890_v52  ;;  %v10009_v52 = vld [vmem:[%s13230_s1 + $0x8d0] ss:$24 sps:$4 sm:$0xff]  }
  0x40   : > { %3811 = vmatpush1.bf16.msra.mxu0 %v10898_v53  ;;  %3459 = vmatprep.subr.bf16.mxu1 %v9892_v54  ;;  %v11153_v54 = vld [vmem:[%s10860_s28 + $0xa0] ss:$8 sps:$4 sm:$0xff]  }
  0x41   : > { %3812 = vmatprep.subr.bf16.mxu0 %v10907_v55 }
  0x43   : > { %3460 = vmatpush1.bf16.msra.mxu1 %v9896_v56  ;;  %v11166_v56 = vld [vmem:[%s10860_s28 + $0xb0] ss:$8 sps:$4 sm:$0xff]  }
  0x44   : > { %3813 = vmatpush1.bf16.msra.mxu0 %v10915_v57  ;;  %3461 = vmatprep.subr.bf16.mxu1 %v9898_v58  ;;  %v11176_v58 = vld [vmem:[%s10860_s28 + $0xc0] ss:$8 sps:$4 sm:$0xff]  }
  0x45   : > { %3814 = vmatprep.subr.bf16.mxu0 %v10925_v59 }
  0x47   : > { %3462 = vmatpush1.bf16.msra.mxu1 %v9902_v60  ;;  %v11186_v60 = vld [vmem:[%s10860_s28 + $0xd0] ss:$8 sps:$4 sm:$0xff]  }
  0x48   : > { %3815 = vmatpush1.bf16.msra.mxu0 %v10933_v61  ;;  %3463 = vmatprep.subr.bf16.mxu1 %v9904_v62  ;;  %v11196_v62 = vld [vmem:[%s10860_s28 + $0xe0] ss:$8 sps:$4 sm:$0xff]  }
  0x49   : > { %3816 = vmatprep.subr.bf16.mxu0 %v10943_v63 }
  0x4b   : > { %3464 = vmatpush1.bf16.msra.mxu1 %v9908_v0  ;;  %v11206_v0 = vld [vmem:[%s10860_s28 + $0xf0] ss:$8 sps:$4 sm:$0xff]  }
  0x4c   : > { %3817 = vmatpush1.bf16.msra.mxu0 %v10952_v2  ;;  %8972 = vmatprep.subr.bf16.mxu1 %v10662_v1  ;;  %v9933_v1 = vld [vmem:[%s13230_s1 + $0x664] ss:$24 sps:$4 sm:$0xff]  }
  0x4d   : > { %4139 = vmatprep.subr.bf16.mxu0 %v9918_v4  ;;  %v11216_v4 = vld [vmem:[%s10860_s28 + $0x100] ss:$8 sps:$4 sm:$0xff]  }
  0x4e   : > { %3466 = vmatmul.mubr.bf16.vlgmr.msra.gmra.mrb[0].mxu1 %v9914_v6  ;;  %v11219_v6 = vld [vmem:[%s10860_s28 + $0x114] ss:$8 sps:$4 sm:$0xff]  }
  0x4f   : > { %3819 = vmatmul.mubr.bf16.vlgmr.msra.gmra.mrb[0].mxu0 %v9915_v8  ;;  %8988 = vmatpush1.bf16.msra.mxu1 %v10670_v3  ;;  %v9931_v3 = vld [vmem:[%s13230_s1 + $0x660] ss:$24 sps:$4 sm:$0xff]  }
  0x50   : > { %4140 = vmatpush1.bf16.msra.mxu0 %v9916_v10  ;;  %3475 = vmatprep.mubr.bf16.mxu1 %v9919_v12  ;;  %v10012_v10 = vld [vmem:[%s13230_s1 + $0x10] ss:$24 sps:$4 sm:$0xff]   ;;  %v10020_v12 = vld [vmem:[%s13230_s1 + $0x44] ss:$24 sps:$4 sm:$0xff]  }
  0x51   : > { %3828 = vmatprep.mubr.bf16.mxu0 %v9921_v14  ;;  %4141 = vmatprep.subr.bf16.mxu0 %v9927_v16  ;;  %v10018_v16 = vld [vmem:[%s13230_s1 + $0x40] ss:$24 sps:$4 sm:$0xff]  }
  0x52   : > { %8973 = vmatprep.subr.bf16.mxu1 %v10680_v5  ;;  %v9939_v5 = vld [vmem:[%s13230_s1 + $0x694] ss:$24 sps:$4 sm:$0xff]  }
  0x53   : > { %8989 = vmatpush1.bf16.msra.mxu1 %v10688_v7  ;;  %v9937_v7 = vld [vmem:[%s13230_s1 + $0x690] ss:$24 sps:$4 sm:$0xff]  }
  0x54   : > { %4142 = vmatpush1.bf16.msra.mxu0 %v9925_v18  ;;  %8974 = vmatprep.subr.bf16.mxu1 %v10697_v9  ;;  %v9945_v9 = vld [vmem:[%s13230_s1 + $0x6c4] ss:$24 sps:$4 sm:$0xff]   ;;  %v10029_v18 = vld [vmem:[%s13230_s1 + $0x74] ss:$24 sps:$4 sm:$0xff]  }
  0x55   : > { %4143 = vmatprep.subr.bf16.mxu0 %v9933_v1  ;;  %v11252_v1 = vld [vmem:[%s10860_s28 + $0x124] ss:$8 sps:$4 sm:$0xff]  }
  0x56   : > { %3476 = vmatmul.mubr.bf16.gmra.mrb[4].mxu1 %v9923_v20  ;;  %v10027_v20 = vld [vmem:[%s13230_s1 + $0x70] ss:$24 sps:$4 sm:$0xff]  }
  0x57   : > { %3829 = vmatmul.mubr.bf16.gmra.mrb[4].mxu0 %v9924_v22  ;;  %3485 = vmatprep.mubr.bf16.mxu1 %v10882_v50  ;;  %v10003_v50 = vld [vmem:[%s13230_s1 + $0x8a0] ss:$24 sps:$4 sm:$0xff]  }
  0x58   : > { %3838 = vmatprep.mubr.bf16.mxu0 %v10981_v24  ;;  %4144 = vmatpush1.bf16.msra.mxu0 %v9931_v3  ;;  %v10047_v3 = vld [vmem:[%s13230_s1 + $0xd4] ss:$24 sps:$4 sm:$0xff]  }
  0x59   : > { %8990 = vmatpush1.bf16.msra.mxu1 %v10705_v11  ;;  %4145 = vmatprep.subr.bf16.mxu0 %v9939_v5  ;;  %v9951_v11 = vld [vmem:[%s13230_s1 + $0x6f4] ss:$24 sps:$4 sm:$0xff]   ;;  %v11271_v5 = vld [vmem:[%s10860_s28 + $0x120] ss:$8 sps:$4 sm:$0xff]  }
  0x5a   : > { %8975 = vmatprep.subr.bf16.mxu1 %v10715_v13  ;;  %v9949_v13 = vld [vmem:[%s13230_s1 + $0x6f0] ss:$24 sps:$4 sm:$0xff]  }
  0x5c   : > { %4146 = vmatpush1.bf16.msra.mxu0 %v9937_v7  ;;  %v11274_v7 = vld [vmem:[%s10860_s28 + $0x134] ss:$8 sps:$4 sm:$0xff]  }
  0x5d   : > { %8991 = vmatpush1.bf16.msra.mxu1 %v10724_v15  ;;  %4147 = vmatprep.subr.bf16.mxu0 %v9945_v9  ;;  %v9957_v15 = vld [vmem:[%s13230_s1 + $0x724] ss:$24 sps:$4 sm:$0xff]   ;;  %v10045_v9 = vld [vmem:[%s13230_s1 + $0xd0] ss:$24 sps:$4 sm:$0xff]  }
  0x5e   : > { %8976 = vmatprep.subr.bf16.mxu1 %v10733_v17  ;;  %3486 = vmatmul.mubr.bf16.gmra.mrb[8].mxu1 %v9915_v8  ;;  %v11026_v17 = vld [vmem:[%s10860_s28 + $0x50] ss:$8 sps:$4 sm:$0xff]  }
  0x5f   : > { %3839 = vmatmul.mubr.bf16.gmra.mrb[8].mxu0 %v11002_v26  ;;  %3495 = vmatprep.mubr.bf16.mxu1 %v9921_v14  ;;  %v11226_v8 = vld [vmem:[%s10860_s28 + $0x110] ss:$8 sps:$4 sm:$0xff]   ;;  %v10080_v14 = vld [vmem:[%s13230_s1 + $0xc] ss:$24 sps:$4 sm:$0xff]  }
  0x60   : > { %3848 = vmatprep.mubr.bf16.mxu0 %v11005_v28  ;;  %4148 = vmatpush1.bf16.msra.mxu0 %v9943_v30  ;;  %v10065_v30 = vld [vmem:[%s13230_s1 + $0x134] ss:$24 sps:$4 sm:$0xff]  }
  0x61   : > { %8992 = vmatpush1.bf16.msra.mxu1 %v10741_v19  ;;  %4149 = vmatprep.subr.bf16.mxu0 %v9951_v11  ;;  %v9963_v19 = vld [vmem:[%s13230_s1 + $0x754] ss:$24 sps:$4 sm:$0xff]   ;;  %v11293_v11 = vld [vmem:[%s10860_s28 + $0x130] ss:$8 sps:$4 sm:$0xff]  }
  0x62   : > { %8977 = vmatprep.subr.bf16.mxu1 %v10751_v21  ;;  %v11043_v21 = vld [vmem:[%s10860_s28 + $0x60] ss:$8 sps:$4 sm:$0xff]  }
  0x64   : > { %4150 = vmatpush1.bf16.msra.mxu0 %v9949_v13  ;;  %v11296_v13 = vld [vmem:[%s10860_s28 + $0x144] ss:$8 sps:$4 sm:$0xff]  }
  0x65   : > { %8993 = vmatpush1.bf16.msra.mxu1 %v10760_v23  ;;  %4151 = vmatprep.subr.bf16.mxu0 %v9957_v15  ;;  %v9961_v23 = vld [vmem:[%s13230_s1 + $0x750] ss:$24 sps:$4 sm:$0xff]  }
  0x66   : > { %8978 = vmatprep.subr.bf16.mxu1 %v10769_v25  ;;  %3496 = vmatmul.mubr.bf16.gmra.mrb[12].mxu1 %v9924_v22  ;;  %v9969_v25 = vld [vmem:[%s13230_s1 + $0x784] ss:$24 sps:$4 sm:$0xff]   ;;  %v10063_v15 = vld [vmem:[%s13230_s1 + $0x130] ss:$24 sps:$4 sm:$0xff]  }
  0x67   : > { %3849 = vmatmul.mubr.bf16.gmra.mrb[12].mxu0 %v11026_v17  ;;  %3505 = vmatprep.mubr.bf16.mxu1 %v10981_v24  ;;  %v10038_v22 = vld [vmem:[%s13230_s1 + $0xa4] ss:$24 sps:$4 sm:$0xff]  }
  0x68   : > { %3858 = vmatprep.mubr.bf16.mxu0 %v11029_v32  ;;  %4152 = vmatpush1.bf16.msra.mxu0 %v9955_v34  ;;  %v10083_v34 = vld [vmem:[%s13230_s1 + $0x194] ss:$24 sps:$4 sm:$0xff]  }
  0x69   : > { %8994 = vmatpush1.bf16.msra.mxu1 %v10777_v27  ;;  %4153 = vmatprep.subr.bf16.mxu0 %v9963_v19  ;;  %v9973_v27 = vld [vmem:[%s13230_s1 + $0x7b0] ss:$24 sps:$4 sm:$0xff]  }
  0x6a   : > { %8979 = vmatprep.subr.bf16.mxu1 %v10787_v29  ;;  %v9981_v29 = vld [vmem:[%s13230_s1 + $0x7e4] ss:$24 sps:$4 sm:$0xff]   ;;  %v11315_v19 = vld [vmem:[%s10860_s28 + $0x140] ss:$8 sps:$4 sm:$0xff]  }
  0x6c   : > { %4154 = vmatpush1.bf16.msra.mxu0 %v9961_v23  ;;  %v10081_v23 = vld [vmem:[%s13230_s1 + $0x190] ss:$24 sps:$4 sm:$0xff]  }
  0x6d   : > { %8995 = vmatpush1.bf16.msra.mxu1 %v10796_v31  ;;  %4155 = vmatprep.subr.bf16.mxu0 %v9969_v25  ;;  %v11075_v31 = vld [vmem:[%s10860_s28 + $0x70] ss:$8 sps:$4 sm:$0xff]  }
  0x6e   : > { %8980 = vmatprep.subr.bf16.mxu1 %v10806_v33  ;;  %3506 = vmatmul.mubr.bf16.gmra.mrb[16].mxu1 %v11002_v26  ;;  %v11079_v33 = vld [vmem:[%s10860_s28 + $0x84] ss:$8 sps:$4 sm:$0xff]   ;;  %v10090_v25 = vld [vmem:[%s13230_s1 + $0x1c0] ss:$24 sps:$4 sm:$0xff]  }
  0x6f   : > { %3859 = vmatmul.mubr.bf16.gmra.mrb[16].mxu0 %v11043_v21  ;;  %3515 = vmatprep.mubr.bf16.mxu1 %v11005_v28 }
  0x70   : > { %3868 = vmatprep.mubr.bf16.mxu0 %v11050_v36  ;;  %4156 = vmatpush1.bf16.msra.mxu0 %v9967_v38  ;;  %v10101_v38 = vld [vmem:[%s13230_s1 + $0x1f4] ss:$24 sps:$4 sm:$0xff]  }
  0x71   : > { %8996 = vmatpush1.bf16.msra.mxu1 %v10814_v35  ;;  %4157 = vmatprep.subr.bf16.mxu0 %v9975_v40  ;;  %v9985_v35 = vld [vmem:[%s13230_s1 + $0x810] ss:$24 sps:$4 sm:$0xff]  }
  0x72   : > { %8981 = vmatprep.subr.bf16.mxu1 %v10825_v37  ;;  %v9993_v37 = vld [vmem:[%s13230_s1 + $0x844] ss:$24 sps:$4 sm:$0xff]   ;;  %v11337_v40 = vld [vmem:[%s10860_s28 + $0x150] ss:$8 sps:$4 sm:$0xff]  }
  0x74   : > { %4158 = vmatpush1.bf16.msra.mxu0 %v9973_v27  ;;  %v11340_v27 = vld [vmem:[%s10860_s28 + $0x164] ss:$8 sps:$4 sm:$0xff]  }
  0x75   : > { %8997 = vmatpush1.bf16.msra.mxu1 %v10834_v39  ;;  %4159 = vmatprep.subr.bf16.mxu0 %v9981_v29  ;;  %v11101_v39 = vld [vmem:[%s10860_s28 + $0x80] ss:$8 sps:$4 sm:$0xff]  }
  0x76   : > { %8982 = vmatprep.subr.bf16.mxu1 %v10843_v41  ;;  %3516 = vmatmul.mubr.bf16.gmra.mrb[20].mxu1 %v11026_v17  ;;  %v11105_v41 = vld [vmem:[%s10860_s28 + $0x94] ss:$8 sps:$4 sm:$0xff]   ;;  %v10099_v29 = vld [vmem:[%s13230_s1 + $0x1f0] ss:$24 sps:$4 sm:$0xff]  }
  0x77   : > { %3869 = vmatmul.mubr.bf16.gmra.mrb[20].mxu0 %v11075_v31  ;;  %3525 = vmatprep.mubr.bf16.mxu1 %v11029_v32 }
  0x78   : > { %3878 = vmatprep.mubr.bf16.mxu0 %v11079_v33  ;;  %4160 = vmatpush1.bf16.msra.mxu0 %v9979_v42  ;;  %v10108_v42 = vld [vmem:[%s13230_s1 + $0x220] ss:$24 sps:$4 sm:$0xff]  }
  0x79   : > { %8998 = vmatpush1.bf16.msra.mxu1 %v10851_v43  ;;  %4161 = vmatprep.subr.bf16.mxu0 %v9987_v44  ;;  %v9997_v43 = vld [vmem:[%s13230_s1 + $0x870] ss:$24 sps:$4 sm:$0xff]   ;;  %v10110_v44 = vld [vmem:[%s13230_s1 + $0x224] ss:$24 sps:$4 sm:$0xff]  }
  0x7a   : > { %8983 = vmatprep.subr.bf16.mxu1 %v10866_v45  ;;  %v10005_v45 = vld [vmem:[%s13230_s1 + $0x8a4] ss:$24 sps:$4 sm:$0xff]  }
  0x7c   : > { %4162 = vmatpush1.bf16.msra.mxu0 %v9985_v35  ;;  %v11366_v35 = vld [vmem:[%s10860_s28 + $0x170] ss:$8 sps:$4 sm:$0xff]  }
  0x7d   : > { %8999 = vmatpush1.bf16.msra.mxu1 %v10874_v47  ;;  %4163 = vmatprep.subr.bf16.mxu0 %v9993_v37  ;;  %v11127_v47 = vld [vmem:[%s10860_s28 + $0x90] ss:$8 sps:$4 sm:$0xff]   ;;  %v11369_v37 = vld [vmem:[%s10860_s28 + $0x184] ss:$8 sps:$4 sm:$0xff]  }
  0x7e   : > { %8984 = vmatprep.subr.bf16.mxu1 %v10888_v51  ;;  %3526 = vmatmul.mubr.bf16.gmra.mrb[24].mxu1 %v11043_v21  ;;  %v10011_v51 = vld [vmem:[%s13230_s1 + $0x8d4] ss:$24 sps:$4 sm:$0xff]  }
  0x7f   : > { %3879 = vmatmul.mubr.bf16.gmra.mrb[24].mxu0 %v11101_v39  ;;  %3535 = vmatprep.mubr.bf16.mxu1 %v11050_v36 }
  0x80   : > { %3888 = vmatprep.mubr.bf16.mxu0 %v11105_v41  ;;  %4164 = vmatpush1.bf16.msra.mxu0 %v9991_v46  ;;  %v10117_v46 = vld [vmem:[%s13230_s1 + $0x250] ss:$24 sps:$4 sm:$0xff]  }
  0x81   : > { %9000 = vmatpush1.bf16.msra.mxu1 %v10898_v53  ;;  %4165 = vmatprep.subr.bf16.mxu0 %v9999_v48  ;;  %v10014_v53 = vld [vmem:[%s13230_s1 + $0x14] ss:$24 sps:$4 sm:$0xff]  }
  0x82   : > { %8985 = vmatprep.subr.bf16.mxu1 %v10907_v55  ;;  %v11157_v55 = vld [vmem:[%s10860_s28 + $0xb4] ss:$8 sps:$4 sm:$0xff]  }
  0x83   : > { %v10119_v48 = vld [vmem:[%s13230_s1 + $0x254] ss:$24 sps:$4 sm:$0xff]  }
  0x84   : > { %4166 = vmatpush1.bf16.msra.mxu0 %v9997_v43  ;;  %v11392_v43 = vld [vmem:[%s10860_s28 + $0x190] ss:$8 sps:$4 sm:$0xff]  }
  0x85   : > { %9001 = vmatpush1.bf16.msra.mxu1 %v10915_v57  ;;  %4167 = vmatprep.subr.bf16.mxu0 %v10005_v45  ;;  %v11169_v57 = vld [vmem:[%s10860_s28 + $0xc4] ss:$8 sps:$4 sm:$0xff]  }
  0x86   : > { %8986 = vmatprep.subr.bf16.mxu1 %v10925_v59  ;;  %3536 = vmatmul.mubr.bf16.gmra.mrb[28].mxu1 %v11075_v31  ;;  %v11179_v59 = vld [vmem:[%s10860_s28 + $0xd4] ss:$8 sps:$4 sm:$0xff]   ;;  %v11395_v45 = vld [vmem:[%s10860_s28 + $0x1a4] ss:$8 sps:$4 sm:$0xff]  }
  0x87   : > { %3889 = vmatmul.mubr.bf16.gmra.mrb[28].mxu0 %v11127_v47  ;;  %3545 = vmatprep.mubr.bf16.mxu1 %v11079_v33 }
  0x88   : > { %3898 = vmatprep.mubr.bf16.mxu0 %v11131_v49  ;;  %4168 = vmatpush1.bf16.msra.mxu0 %v10003_v50  ;;  %v10126_v50 = vld [vmem:[%s13230_s1 + $0x280] ss:$24 sps:$4 sm:$0xff]  }
  0x89   : > { %9002 = vmatpush1.bf16.msra.mxu1 %v10933_v61  ;;  %4169 = vmatprep.subr.bf16.mxu0 %v10011_v51  ;;  %v11189_v61 = vld [vmem:[%s10860_s28 + $0xe4] ss:$8 sps:$4 sm:$0xff]  }
  0x8a   : > { %8987 = vmatprep.subr.bf16.mxu1 %v10943_v63  ;;  %v11199_v63 = vld [vmem:[%s10860_s28 + $0xf4] ss:$8 sps:$4 sm:$0xff]  }
  0x8b   : > { %v10128_v51 = vld [vmem:[%s13230_s1 + $0x284] ss:$24 sps:$4 sm:$0xff]  }
  0x8c   : > { %4170 = vmatpush1.bf16.msra.mxu0 %v10009_v52 }
  0x8d   : > { %9003 = vmatpush1.bf16.msra.mxu1 %v10952_v2  ;;  %5551 = vmatprep.subr.bf16.mxu0 %v10014_v53  ;;  %v11209_v2 = vld [vmem:[%s10860_s28 + $0x104] ss:$8 sps:$4 sm:$0xff]  }
  0x8e   : > { %3546 = vmatmul.mubr.bf16.gmra.mrb[32].mxu1 %v11101_v39  ;;  %4492 = vmatprep.subr.bf16.mxu1 %v10080_v14  ;;  %v11456_v14 = vld [vmem:[%s10860_s28 + $0x1d0] ss:$8 sps:$4 sm:$0xff]  }
  0x8f   : > { %3899 = vmatmul.mubr.bf16.gmra.mrb[32].mxu0 %v11153_v54  ;;  %3555 = vmatprep.mubr.bf16.mxu1 %v11105_v41 }
  0x90   : > { %3908 = vmatprep.mubr.bf16.mxu0 %v11157_v55 }
  0x96   : > { %3556 = vmatmul.mubr.bf16.gmra.mrb[36].mxu1 %v11127_v47 }
  0x97   : > { %3909 = vmatmul.mubr.bf16.gmra.mrb[36].mxu0 %v11166_v56  ;;  %3565 = vmatprep.mubr.bf16.mxu1 %v11131_v49 }
  0x98   : > { %3918 = vmatprep.mubr.bf16.mxu0 %v11169_v57 }
  0x9e   : > { %3566 = vmatmul.mubr.bf16.gmra.mrb[40].mxu1 %v11153_v54 }
  0x9f   : > { %3919 = vmatmul.mubr.bf16.gmra.mrb[40].mxu0 %v11176_v58  ;;  %3575 = vmatprep.mubr.bf16.mxu1 %v11157_v55 }
  0xa0   : > { %3928 = vmatprep.mubr.bf16.mxu0 %v11179_v59 }
  0xa6   : > { %3576 = vmatmul.mubr.bf16.gmra.mrb[44].mxu1 %v11166_v56 }
  0xa7   : > { %3929 = vmatmul.mubr.bf16.gmra.mrb[44].mxu0 %v11186_v60  ;;  %3585 = vmatprep.mubr.bf16.mxu1 %v11169_v57 }
  0xa8   : > { %3938 = vmatprep.mubr.bf16.mxu0 %v11189_v61 }
  0xae   : > { %3586 = vmatmul.mubr.bf16.gmra.mrb[48].mxu1 %v11176_v58 }
  0xaf   : > { %3939 = vmatmul.mubr.bf16.gmra.mrb[48].mxu0 %v11196_v62  ;;  %3595 = vmatprep.mubr.bf16.mxu1 %v11179_v59 }
  0xb0   : > { %3948 = vmatprep.mubr.bf16.mxu0 %v11199_v63 }
  0xb6   : > { %3596 = vmatmul.mubr.bf16.gmra.mrb[52].mxu1 %v11186_v60 }
  0xb7   : > { %3949 = vmatmul.mubr.bf16.gmra.mrb[52].mxu0 %v11206_v0  ;;  %3605 = vmatprep.mubr.bf16.mxu1 %v11189_v61 }
  0xb8   : > { %3958 = vmatprep.mubr.bf16.mxu0 %v11209_v2 }
  0xbe   : > { %3606 = vmatmul.mubr.bf16.gmra.mrb[56].mxu1 %v11196_v62 }
  0xbf   : > { %3959 = vmatmul.mubr.bf16.gmra.mrb[56].mxu0 %v11216_v4  ;;  %3615 = vmatprep.mubr.bf16.mxu1 %v11199_v63 }
  0xc0   : > { %3968 = vmatprep.mubr.bf16.mxu0 %v11219_v6 }
  0xc6   : > { %3616 = vmatmul.mubr.bf16.gmra.mrb[60].mxu1 %v11206_v0 }
  0xc7   : > { %3969 = vmatmul.mubr.bf16.gmra.mrb[60].mxu0 %v11226_v8  ;;  %3625 = vmatprep.mubr.bf16.mxu1 %v11209_v2 }
  0xc8   : > { %4171 = vmatprep.mubr.bf16.mxu0 %v10981_v24  ;;  %v10036_v24 = vld [vmem:[%s13230_s1 + $0xa0] ss:$24 sps:$4 sm:$0xff]  }
  0xce   : > { %3626 = vmatmul.mubr.bf16.gmra.mrb[64].mxu1 %v11216_v4 }
  0xcf   : > { %4172 = vmatmul.mubr.bf16.vlgmr.msra.gmra.mrb[0].mxu0 %v11002_v26  ;;  %3635 = vmatprep.mubr.bf16.mxu1 %v11219_v6  ;;  %v10056_v26 = vld [vmem:[%s13230_s1 + $0x104] ss:$24 sps:$4 sm:$0xff]  }
  0xd0   : > { %5552 = vmatpush1.bf16.msra.mxu0 %v10012_v10  ;;  %4181 = vmatprep.mubr.bf16.mxu0 %v11005_v28  ;;  %v10054_v28 = vld [vmem:[%s13230_s1 + $0x100] ss:$24 sps:$4 sm:$0xff]  }
  0xd1   : > { %5553 = vmatprep.subr.bf16.mxu0 %v10020_v12 }
  0xd4   : > { %5554 = vmatpush1.bf16.msra.mxu0 %v10018_v16 }
  0xd5   : > { %5555 = vmatprep.subr.bf16.mxu0 %v10029_v18 }
  0xd6   : > { %3636 = vmatmul.mubr.bf16.gmra.mrb[68].mxu1 %v11226_v8 }
  0xd7   : > { %4182 = vmatmul.mubr.bf16.gmra.mrb[4].mxu0 %v11026_v17  ;;  %3645 = vmatprep.mubr.bf16.mxu1 %v11252_v1  ;;  %v10074_v17 = vld [vmem:[%s13230_s1 + $0x164] ss:$24 sps:$4 sm:$0xff]  }
  0xd8   : > { %4191 = vmatprep.mubr.bf16.mxu0 %v11029_v32  ;;  %5556 = vmatpush1.bf16.msra.mxu0 %v10027_v20  ;;  %v10072_v32 = vld [vmem:[%s13230_s1 + $0x160] ss:$24 sps:$4 sm:$0xff]  }
  0xd9   : > { %5557 = vmatprep.subr.bf16.mxu0 %v10038_v22  ;;  %v11470_v22 = vld [vmem:[%s10860_s28 + $0x1e0] ss:$8 sps:$4 sm:$0xff]  }
  0xdc   : > { %5558 = vmatpush1.bf16.msra.mxu0 %v10036_v24 }
  0xdd   : > { %5559 = vmatprep.subr.bf16.mxu0 %v10047_v3  ;;  %v11473_v3 = vld [vmem:[%s10860_s28 + $0x1f4] ss:$8 sps:$4 sm:$0xff]  }
  0xde   : > { %3646 = vmatmul.mubr.bf16.gmra.mrb[72].mxu1 %v11271_v5 }
  0xdf   : > { %4192 = vmatmul.mubr.bf16.gmra.mrb[8].mxu0 %v11043_v21  ;;  %3655 = vmatprep.mubr.bf16.mxu1 %v11274_v7  ;;  %v11318_v21 = vld [vmem:[%s10860_s28 + $0x154] ss:$8 sps:$4 sm:$0xff]  }
  0xe0   : > { %4201 = vmatprep.mubr.bf16.mxu0 %v11050_v36  ;;  %5560 = vmatpush1.bf16.msra.mxu0 %v10045_v9  ;;  %v10092_v36 = vld [vmem:[%s13230_s1 + $0x1c4] ss:$24 sps:$4 sm:$0xff]  }
  0xe1   : > { %5561 = vmatprep.subr.bf16.mxu0 %v10056_v26  ;;  %v10155_v26 = vld [vmem:[%s13230_s1 + $0x2e4] ss:$24 sps:$4 sm:$0xff]  }
  0xe4   : > { %5562 = vmatpush1.bf16.msra.mxu0 %v10054_v28 }
  0xe5   : > { %5563 = vmatprep.subr.bf16.mxu0 %v10065_v30 }
  0xe6   : > { %3656 = vmatmul.mubr.bf16.gmra.mrb[76].mxu1 %v11293_v11 }
  0xe7   : > { %4202 = vmatmul.mubr.bf16.gmra.mrb[12].mxu0 %v11075_v31  ;;  %3665 = vmatprep.mubr.bf16.mxu1 %v11296_v13  ;;  %v11350_v31 = vld [vmem:[%s10860_s28 + $0x160] ss:$8 sps:$4 sm:$0xff]  }
  0xe8   : > { %4211 = vmatprep.mubr.bf16.mxu0 %v11079_v33  ;;  %5564 = vmatpush1.bf16.msra.mxu0 %v10063_v15  ;;  %v11353_v33 = vld [vmem:[%s10860_s28 + $0x174] ss:$8 sps:$4 sm:$0xff]   ;;  %v11490_v15 = vld [vmem:[%s10860_s28 + $0x1f0] ss:$8 sps:$4 sm:$0xff]  }
  0xe9   : > { %5565 = vmatprep.subr.bf16.mxu0 %v10074_v17 }
  0xec   : > { %5566 = vmatpush1.bf16.msra.mxu0 %v10072_v32 }
  0xed   : > { %5567 = vmatprep.subr.bf16.mxu0 %v10083_v34 }
  0xee   : > { %3666 = vmatmul.mubr.bf16.gmra.mrb[80].mxu1 %v11315_v19 }
  0xef   : > { %4212 = vmatmul.mubr.bf16.gmra.mrb[16].mxu0 %v11101_v39  ;;  %3675 = vmatprep.mubr.bf16.mxu1 %v11318_v21  ;;  %v11376_v39 = vld [vmem:[%s10860_s28 + $0x180] ss:$8 sps:$4 sm:$0xff]  }
  0xf0   : > { %4221 = vmatprep.mubr.bf16.mxu0 %v11105_v41  ;;  %5568 = vmatpush1.bf16.msra.mxu0 %v10081_v23  ;;  %v11379_v41 = vld [vmem:[%s10860_s28 + $0x194] ss:$8 sps:$4 sm:$0xff]  }
  0xf1   : > { %5569 = vmatprep.subr.bf16.mxu0 %v10092_v36 }
  0xf4   : > { %5570 = vmatpush1.bf16.msra.mxu0 %v10090_v25  ;;  %v10078_v25 = vld [vmem:[%s13230_s1 + $0x8] ss:$24 sps:$4 sm:$0xff]  }
  0xf5   : > { %5571 = vmatprep.subr.bf16.mxu0 %v10101_v38 }
  0xf6   : > { %3676 = vmatmul.mubr.bf16.gmra.mrb[84].mxu1 %v11337_v40 }
  0xf7   : > { %4222 = vmatmul.mubr.bf16.gmra.mrb[20].mxu0 %v11127_v47  ;;  %3685 = vmatprep.mubr.bf16.mxu1 %v11340_v27  ;;  %v11402_v47 = vld [vmem:[%s10860_s28 + $0x1a0] ss:$8 sps:$4 sm:$0xff]  }
  0xf8   : > { %4231 = vmatprep.mubr.bf16.mxu0 %v11131_v49  ;;  %5572 = vmatpush1.bf16.msra.mxu0 %v10099_v29  ;;  %v11405_v49 = vld [vmem:[%s10860_s28 + $0x1b4] ss:$8 sps:$4 sm:$0xff]  }
  0xf9   : > { %5573 = vmatprep.subr.bf16.mxu0 %v10110_v44  ;;  %v10086_v29 = vld [vmem:[%s13230_s1 + $0x3c] ss:$24 sps:$4 sm:$0xff]  }
  0xfc   : > { %5574 = vmatpush1.bf16.msra.mxu0 %v10108_v42  ;;  %v10089_v42 = vld [vmem:[%s13230_s1 + $0x6c] ss:$24 sps:$4 sm:$0xff]  }
  0xfd   : > { %5575 = vmatprep.subr.bf16.mxu0 %v10119_v48 }
  0xfe   : > { %3686 = vmatmul.mubr.bf16.gmra.mrb[88].mxu1 %v11350_v31 }
  0xff   : > { %4232 = vmatmul.mubr.bf16.gmra.mrb[24].mxu0 %v11153_v54  ;;  %3695 = vmatprep.mubr.bf16.mxu1 %v11353_v33  ;;  %v11422_v54 = vld [vmem:[%s10860_s28 + $0x1b0] ss:$8 sps:$4 sm:$0xff]  }
 0x100   : > { %4241 = vmatprep.mubr.bf16.mxu0 %v11157_v55  ;;  %5576 = vmatpush1.bf16.msra.mxu0 %v10117_v46 }
 0x101   : > { %5577 = vmatprep.subr.bf16.mxu0 %v10128_v51  ;;  %v10095_v51 = vld [vmem:[%s13230_s1 + $0x9c] ss:$24 sps:$4 sm:$0xff]  }
 0x104   : > { %5578 = vmatpush1.bf16.msra.mxu0 %v10126_v50  ;;  %v10087_v50 = vld [vmem:[%s13230_s1 + $0x68] ss:$24 sps:$4 sm:$0xff]  }
 0x106   : > { %3696 = vmatmul.mubr.bf16.gmra.mrb[92].mxu1 %v11366_v35 }
 0x107   : > { %4242 = vmatmul.mubr.bf16.gmra.mrb[28].mxu0 %v11166_v56  ;;  %3705 = vmatprep.mubr.bf16.mxu1 %v11369_v37  ;;  %v11427_v56 = vld [vmem:[%s10860_s28 + $0x1c4] ss:$8 sps:$4 sm:$0xff]  }
 0x108   : > { %4251 = vmatprep.mubr.bf16.mxu0 %v11169_v57 }
 0x10e   : > { %3706 = vmatmul.mubr.bf16.gmra.mrb[96].mxu1 %v11376_v39 }
 0x10f   : > { %4252 = vmatmul.mubr.bf16.gmra.mrb[32].mxu0 %v11176_v58  ;;  %3715 = vmatprep.mubr.bf16.mxu1 %v11379_v41 }
 0x110   : > { %4261 = vmatprep.mubr.bf16.mxu0 %v11179_v59 }
 0x116   : > { %3716 = vmatmul.mubr.bf16.gmra.mrb[100].mxu1 %v11392_v43 }
 0x117   : > { %4262 = vmatmul.mubr.bf16.gmra.mrb[36].mxu0 %v11186_v60  ;;  %3725 = vmatprep.mubr.bf16.mxu1 %v11395_v45  ;;  %v11436_v60 = vld [vmem:[%s10860_s28 + $0x1c0] ss:$8 sps:$4 sm:$0xff]  }
 0x118   : > { %4271 = vmatprep.mubr.bf16.mxu0 %v11189_v61 }
 0x11e   : > { %3726 = vmatmul.mubr.bf16.gmra.mrb[104].mxu1 %v11402_v47 }
 0x11f   : > { %4272 = vmatmul.mubr.bf16.gmra.mrb[40].mxu0 %v11196_v62  ;;  %3735 = vmatprep.mubr.bf16.mxu1 %v11405_v49  ;;  %v11439_v62 = vld [vmem:[%s10860_s28 + $0x1d4] ss:$8 sps:$4 sm:$0xff]  }
 0x120   : > { %4281 = vmatprep.mubr.bf16.mxu0 %v11199_v63 }
 0x121   : > { %v11417_v52 = vpop.f32.mrb[0].mxu1 }
 0x122   : > { %v11419_v53 = vpop.f32.mrb[1].mxu1 }
 0x123   : > { %v11424_v55 = vpop.f32.mrb[2].mxu1 }
 0x124   : > { %v11429_v57 = vpop.f32.mrb[3].mxu1 }
 0x126   : > { %3736 = vmatmul.mubr.bf16.gmra.mrb[108].mxu1 %v11422_v54 }
 0x127   : > { %4282 = vmatmul.mubr.bf16.gmra.mrb[44].mxu0 %v11206_v0  ;;  %3745 = vmatprep.mubr.bf16.mxu1 %v11427_v56  ;;  %v10138_v0 = vld [vmem:[%s13230_s1 + $0x2b0] ss:$24 sps:$4 sm:$0xff]  }
 0x128   : > { %4291 = vmatprep.mubr.bf16.mxu0 %v11209_v2  ;;  %v10140_v2 = vld [vmem:[%s13230_s1 + $0x2b4] ss:$24 sps:$4 sm:$0xff]  }
 0x129   : > { %v3477_v58 = vpop.f32.mrb[4].mxu1  ;;  %5579 = vmatprep.subr.bf16.mxu0 %v10140_v2  ;;  %v10104_v2 = vld [vmem:[%s13230_s1 + $0xfc] ss:$24 sps:$4 sm:$0xff]  }
 0x12a   : > { %v3479_v59 = vpop.f32.mrb[5].mxu1  ;;  %5580 = vmatpush1.bf16.msra.mxu0 %v10138_v0  ;;  %v10093_v58 = vld [vmem:[%s13230_s1 + $0x98] ss:$24 sps:$4 sm:$0xff]  }
 0x12b   : > { %v3481_v61 = vpop.f32.mrb[6].mxu1  ;;  %5581 = vmatprep.subr.bf16.mxu0 %v10155_v26  ;;  %v10113_v26 = vld [vmem:[%s13230_s1 + $0x15c] ss:$24 sps:$4 sm:$0xff]  }
 0x12c   : > { %v3483_v63 = vpop.f32.mrb[7].mxu1  ;;  %v10098_v61 = vld [vmem:[%s13230_s1 + $0xcc] ss:$24 sps:$4 sm:$0xff]  }
 0x12e   : > { %3746 = vmatmul.mubr.bf16.gmra.mrb[112].mxu1 %v11436_v60 }
 0x12f   : > { %4292 = vmatmul.mubr.bf16.gmra.mrb[48].mxu0 %v11216_v4  ;;  %3755 = vmatprep.mubr.bf16.mxu1 %v11439_v62 }
 0x130   : > { %4301 = vmatprep.mubr.bf16.mxu0 %v11219_v6  ;;  %v11461_v6 = vld [vmem:[%s10860_s28 + $0x1e4] ss:$8 sps:$4 sm:$0xff]  }
 0x131   : > { %v11451_v10 = vpop.f32.mrb[8].mxu1 }
 0x132   : > { %v11453_v12 = vpop.f32.mrb[9].mxu1 }
 0x133   : > { %v11458_v4 = vpop.f32.mrb[10].mxu1 }
 0x134   : > { %v11463_v16 = vpop.f32.mrb[11].mxu1 }
 0x136   : > { %3756 = vmatmul.mubr.bf16.gmra.mrb[116].mxu1 %v11456_v14 }
 0x137   : > { %4302 = vmatmul.mubr.bf16.gmra.mrb[52].mxu0 %v11226_v8  ;;  %3765 = vmatprep.mubr.bf16.mxu1 %v11461_v6  ;;  %v10153_v8 = vld [vmem:[%s13230_s1 + $0x2e0] ss:$24 sps:$4 sm:$0xff]  }
 0x138   : > { %4311 = vmatprep.mubr.bf16.mxu0 %v11252_v1  ;;  %5582 = vmatpush1.bf16.msra.mxu0 %v10153_v8 }
 0x139   : > { %v3497_v18 = vpop.f32.mrb[12].mxu1 }
 0x13a   : > { %v3499_v20 = vpop.f32.mrb[13].mxu1  ;;  %v10102_v18 = vld [vmem:[%s13230_s1 + $0xf8] ss:$24 sps:$4 sm:$0xff]  }
 0x13b   : > { %v3501_v24 = vpop.f32.mrb[14].mxu1 }
 0x13c   : > { %v3503_v9 = vpop.f32.mrb[15].mxu1  ;;  %v10107_v24 = vld [vmem:[%s13230_s1 + $0x12c] ss:$24 sps:$4 sm:$0xff]  }
 0x13e   : > { %3766 = vmatmul.mubr.bf16.gmra.mrb[120].mxu1 %v11470_v22 }
 0x13f   : > { %4312 = vmatmul.mubr.bf16.gmra.mrb[56].mxu0 %v11271_v5  ;;  %3775 = vmatprep.mubr.bf16.mxu1 %v11473_v3 }
 0x140   : > { %4321 = vmatprep.mubr.bf16.mxu0 %v11274_v7 }
 0x141   : > { %v11485_v28 = vpop.f32.mrb[16].mxu1 }
 0x142   : > { %v11487_v30 = vpop.f32.mrb[17].mxu1 }
 0x143   : > { %v11492_v17 = vpop.f32.mrb[18].mxu1 }
 0x144   : > { %v11494_v32 = vpop.f32.mrb[19].mxu1 }
 0x146   : > { %3776 = vmatmul.mubr.bf16.gmra.mrb[124].mxu1 %v11490_v15 }
 0x147   : > { %4322 = vmatmul.mubr.bf16.gmra.mrb[60].mxu0 %v11293_v11  ;;  %3978 = vmatprep.mubr.bf16.mxu1 %v11252_v1  ;;  %v10084_v1 = vld [vmem:[%s13230_s1 + $0x38] ss:$24 sps:$4 sm:$0xff]  }
 0x148   : > { %4331 = vmatprep.mubr.bf16.mxu0 %v11296_v13 }
 0x149   : > { %v3517_v34 = vpop.f32.mrb[20].mxu1 }
 0x14a   : > { %v3519_v23 = vpop.f32.mrb[21].mxu1  ;;  %v10111_v34 = vld [vmem:[%s13230_s1 + $0x158] ss:$24 sps:$4 sm:$0xff]  }
 0x14b   : > { %v3521_v36 = vpop.f32.mrb[22].mxu1 }
 0x14c   : > { %v3523_v38 = vpop.f32.mrb[23].mxu1  ;;  %v10116_v36 = vld [vmem:[%s13230_s1 + $0x18c] ss:$24 sps:$4 sm:$0xff]  }
 0x14e   : > { %3979 = vmatmul.mubr.bf16.vlgmr.msra.gmra.mrb[64].mxu1 %v11271_v5  ;;  %v10167_v5 = vld [vmem:[%s13230_s1 + $0x314] ss:$24 sps:$4 sm:$0xff]  }
 0x14f   : > { %4332 = vmatmul.mubr.bf16.gmra.mrb[64].mxu0 %v11315_v19  ;;  %4493 = vmatpush1.bf16.msra.mxu1 %v10078_v25 }
 0x150   : > { %3988 = vmatprep.mubr.bf16.mxu1 %v11274_v7  ;;  %4341 = vmatprep.mubr.bf16.mxu0 %v11318_v21 }
 0x151   : > { %4494 = vmatprep.subr.bf16.mxu1 %v10086_v29  ;;  %v11519_v44 = vpop.f32.mrb[24].mxu1  ;;  %5904 = vmatprep.subr.bf16.mxu0 %v10167_v5  ;;  %v10122_v29 = vld [vmem:[%s13230_s1 + $0x1bc] ss:$24 sps:$4 sm:$0xff]   ;;  %v10125_v5 = vld [vmem:[%s13230_s1 + $0x1ec] ss:$24 sps:$4 sm:$0xff]  }
 0x152   : > { %v11521_v46 = vpop.f32.mrb[25].mxu1 }
 0x153   : > { %v11523_v7 = vpop.f32.mrb[26].mxu1  ;;  %4495 = vmatpush1.bf16.msra.mxu1 %v10084_v1  ;;  %v10120_v1 = vld [vmem:[%s13230_s1 + $0x1b8] ss:$24 sps:$4 sm:$0xff]  }
 0x154   : > { %v11525_v48 = vpop.f32.mrb[27].mxu1  ;;  %4496 = vmatprep.subr.bf16.mxu1 %v10089_v42 }
 0x156   : > { %3989 = vmatmul.mubr.bf16.gmra.mrb[68].mxu1 %v11293_v11 }
 0x157   : > { %4342 = vmatmul.mubr.bf16.gmra.mrb[68].mxu0 %v11337_v40  ;;  %3998 = vmatprep.mubr.bf16.mxu1 %v11296_v13  ;;  %v10096_v13 = vld [vmem:[%s13230_s1 + $0xc8] ss:$24 sps:$4 sm:$0xff]  }
 0x158   : > { %4351 = vmatprep.mubr.bf16.mxu0 %v11340_v27  ;;  %4497 = vmatpush1.bf16.msra.mxu1 %v10087_v50 }
 0x159   : > { %v3537_v59 = vpop.f32.mrb[28].mxu1  ;;  %4498 = vmatprep.subr.bf16.mxu1 %v10095_v51 }
 0x15a   : > { %v3539_v63 = vpop.f32.mrb[29].mxu1  ;;  %v10129_v59 = vld [vmem:[%s13230_s1 + $0x218] ss:$24 sps:$4 sm:$0xff]  }
 0x15b   : > { %v3541_v0 = vpop.f32.mrb[30].mxu1  ;;  %v10137_v63 = vld [vmem:[%s13230_s1 + $0x24c] ss:$24 sps:$4 sm:$0xff]  }
 0x15c   : > { %v3543_v11 = vpop.f32.mrb[31].mxu1  ;;  %4499 = vmatpush1.bf16.msra.mxu1 %v10093_v58  ;;  %v10131_v58 = vld [vmem:[%s13230_s1 + $0x21c] ss:$24 sps:$4 sm:$0xff]  }
 0x15d   : > { %4500 = vmatprep.subr.bf16.mxu1 %v10098_v61 }
 0x15e   : > { %3999 = vmatmul.mubr.bf16.gmra.mrb[72].mxu1 %v11315_v19 }
 0x15f   : > { %4352 = vmatmul.mubr.bf16.gmra.mrb[72].mxu0 %v11350_v31  ;;  %4008 = vmatprep.mubr.bf16.mxu1 %v11318_v21  ;;  %v10105_v21 = vld [vmem:[%s13230_s1 + $0x128] ss:$24 sps:$4 sm:$0xff]  }
 0x160   : > { %4361 = vmatprep.mubr.bf16.mxu0 %v11353_v33  ;;  %4501 = vmatpush1.bf16.msra.mxu1 %v10096_v13  ;;  %v10146_v13 = vld [vmem:[%s13230_s1 + $0x27c] ss:$24 sps:$4 sm:$0xff]  }
 0x161   : > { %v11556_v20 = vpop.f32.mrb[32].mxu1  ;;  %4502 = vmatprep.subr.bf16.mxu1 %v10104_v2  ;;  %v10144_v2 = vld [vmem:[%s13230_s1 + $0x278] ss:$24 sps:$4 sm:$0xff]  }
 0x162   : > { %v11561_v9 = vpop.f32.mrb[33].mxu1 }
 0x163   : > { %v11563_v19 = vpop.f32.mrb[34].mxu1 }
 0x164   : > { %v11565_v8 = vpop.f32.mrb[35].mxu1  ;;  %4503 = vmatpush1.bf16.msra.mxu1 %v10102_v18 }
 0x165   : > { %4504 = vmatprep.subr.bf16.mxu1 %v10107_v24  ;;  %v10152_v24 = vld [vmem:[%s13230_s1 + $0x2ac] ss:$24 sps:$4 sm:$0xff]  }
 0x166   : > { %4009 = vmatmul.mubr.bf16.gmra.mrb[76].mxu1 %v11337_v40 }
 0x167   : > { %4362 = vmatmul.mubr.bf16.gmra.mrb[76].mxu0 %v11366_v35  ;;  %4018 = vmatprep.mubr.bf16.mxu1 %v11340_v27  ;;  %v10114_v27 = vld [vmem:[%s13230_s1 + $0x188] ss:$24 sps:$4 sm:$0xff]  }
 0x168   : > { %4371 = vmatprep.mubr.bf16.mxu0 %v11369_v37  ;;  %4505 = vmatpush1.bf16.msra.mxu1 %v10105_v21 }
 0x169   : > { %v3557_v23 = vpop.f32.mrb[36].mxu1  ;;  %4506 = vmatprep.subr.bf16.mxu1 %v10113_v26 }
 0x16a   : > { %v3559_v25 = vpop.f32.mrb[37].mxu1  ;;  %v10159_v23 = vld [vmem:[%s13230_s1 + $0x2d8] ss:$24 sps:$4 sm:$0xff]  }
 0x16b   : > { %v3561_v38 = vpop.f32.mrb[38].mxu1  ;;  %v10164_v25 = vld [vmem:[%s13230_s1 + $0x30c] ss:$24 sps:$4 sm:$0xff]  }
 0x16c   : > { %v3563_v40 = vpop.f32.mrb[39].mxu1  ;;  %4507 = vmatpush1.bf16.msra.mxu1 %v10111_v34  ;;  %v10161_v34 = vld [vmem:[%s13230_s1 + $0x2dc] ss:$24 sps:$4 sm:$0xff]  }
 0x16d   : > { %4508 = vmatprep.subr.bf16.mxu1 %v10116_v36 }
 0x16e   : > { %4019 = vmatmul.mubr.bf16.gmra.mrb[80].mxu1 %v11350_v31 }
 0x16f   : > { %4372 = vmatmul.mubr.bf16.gmra.mrb[80].mxu0 %v11376_v39  ;;  %4028 = vmatprep.mubr.bf16.mxu1 %v11353_v33  ;;  %v10123_v33 = vld [vmem:[%s13230_s1 + $0x1e8] ss:$24 sps:$4 sm:$0xff]  }
 0x170   : > { %4381 = vmatprep.mubr.bf16.mxu0 %v11379_v41  ;;  %4509 = vmatpush1.bf16.msra.mxu1 %v10114_v27 }
 0x171   : > { %v11596_v42 = vpop.f32.mrb[40].mxu1  ;;  %4510 = vmatprep.subr.bf16.mxu1 %v10122_v29 }
 0x172   : > { %v11601_v50 = vpop.f32.mrb[41].mxu1 }
 0x173   : > { %v11603_v31 = vpop.f32.mrb[42].mxu1 }
 0x174   : > { %v11605_v51 = vpop.f32.mrb[43].mxu1  ;;  %4511 = vmatpush1.bf16.msra.mxu1 %v10120_v1 }
 0x175   : > { %4512 = vmatprep.subr.bf16.mxu1 %v10125_v5 }
 0x176   : > { %4029 = vmatmul.mubr.bf16.gmra.mrb[84].mxu1 %v11366_v35 }
 0x177   : > { %4382 = vmatmul.mubr.bf16.gmra.mrb[84].mxu0 %v11392_v43  ;;  %4038 = vmatprep.mubr.bf16.mxu1 %v11369_v37  ;;  %v10135_v37 = vld [vmem:[%s13230_s1 + $0x248] ss:$24 sps:$4 sm:$0xff]  }
 0x178   : > { %4391 = vmatprep.mubr.bf16.mxu0 %v11395_v45  ;;  %4513 = vmatpush1.bf16.msra.mxu1 %v10123_v33 }
 0x179   : > { %v3577_v61 = vpop.f32.mrb[44].mxu1  ;;  %4514 = vmatprep.subr.bf16.mxu1 %v10131_v58 }
 0x17a   : > { %v3579_v0 = vpop.f32.mrb[45].mxu1 }
 0x17b   : > { %v3581_v11 = vpop.f32.mrb[46].mxu1 }
 0x17c   : > { %v3583_v35 = vpop.f32.mrb[47].mxu1  ;;  %4515 = vmatpush1.bf16.msra.mxu1 %v10129_v59 }
 0x17d   : > { %4516 = vmatprep.subr.bf16.mxu1 %v10137_v63  ;;  %v10132_v63 = vld [vmem:[%s10860_s28 + $0x204] ss:$8 sps:$4 sm:$0xff]  }
 0x17e   : > { %4039 = vmatmul.mubr.bf16.gmra.mrb[88].mxu1 %v11376_v39 }
 0x17f   : > { %4392 = vmatmul.mubr.bf16.gmra.mrb[88].mxu0 %v11402_v47  ;;  %4048 = vmatprep.mubr.bf16.mxu1 %v11379_v41  ;;  %v10150_v41 = vld [vmem:[%s13230_s1 + $0x2a8] ss:$24 sps:$4 sm:$0xff]  }
 0x180   : > { %4401 = vmatprep.mubr.bf16.mxu0 %v11405_v49  ;;  %4517 = vmatpush1.bf16.msra.mxu1 %v10135_v37 }
 0x181   : > { %v11636_v18 = vpop.f32.mrb[48].mxu1  ;;  %4518 = vmatprep.subr.bf16.mxu1 %v10146_v13 }
 0x182   : > { %v11641_v21 = vpop.f32.mrb[49].mxu1 }
 0x183   : > { %v11643_v39 = vpop.f32.mrb[50].mxu1 }
 0x184   : > { %v11645_v26 = vpop.f32.mrb[51].mxu1  ;;  %4519 = vmatpush1.bf16.msra.mxu1 %v10144_v2  ;;  %v10143_v2 = vld [vmem:[%s10860_s28 + $0x210] ss:$8 sps:$4 sm:$0xff]  }
 0x185   : > { %4520 = vmatprep.subr.bf16.mxu1 %v10152_v24 }
 0x186   : > { %4049 = vmatmul.mubr.bf16.gmra.mrb[92].mxu1 %v11392_v43 }
 0x187   : > { %4402 = vmatmul.mubr.bf16.gmra.mrb[92].mxu0 %v11422_v54  ;;  %4058 = vmatprep.mubr.bf16.mxu1 %v11395_v45 }
 0x188   : > { %4411 = vmatprep.mubr.bf16.mxu0 %v11427_v56  ;;  %4521 = vmatpush1.bf16.msra.mxu1 %v10150_v41  ;;  %v10147_v41 = vld [vmem:[%s10860_s28 + $0x224] ss:$8 sps:$4 sm:$0xff]  }
 0x189   : > { %v3597_v36 = vpop.f32.mrb[52].mxu1  ;;  %4522 = vmatprep.subr.bf16.mxu1 %v10161_v34 }
 0x18a   : > { %v3599_v38 = vpop.f32.mrb[53].mxu1 }
 0x18b   : > { %v3601_v40 = vpop.f32.mrb[54].mxu1 }
 0x18c   : > { %v3603_v43 = vpop.f32.mrb[55].mxu1  ;;  %4523 = vmatpush1.bf16.msra.mxu1 %v10159_v23  ;;  %v10158_v40 = vld [vmem:[%s10860_s28 + $0x230] ss:$8 sps:$4 sm:$0xff]  }
 0x18d   : > { %4845 = vmatprep.subr.bf16.mxu1 %v10164_v25  ;;  %v10156_v25 = vld [vmem:[%s10860_s28 + $0x234] ss:$8 sps:$4 sm:$0xff]  }
 0x18e   : > { %4059 = vmatmul.mubr.bf16.gmra.mrb[96].mxu1 %v11402_v47 }
 0x18f   : > { %4412 = vmatmul.mubr.bf16.gmra.mrb[96].mxu0 %v11436_v60  ;;  %4068 = vmatprep.mubr.bf16.mxu1 %v11405_v49 }
 0x190   : > { %4421 = vmatprep.mubr.bf16.mxu0 %v11439_v62 }
 0x191   : > { %v11667_v45 = vpop.f32.mrb[56].mxu1 }
 0x192   : > { %v11669_v27 = vpop.f32.mrb[57].mxu1 }
 0x193   : > { %v11671_v29 = vpop.f32.mrb[58].mxu1 }
 0x194   : > { %v11673_v1 = vpop.f32.mrb[59].mxu1 }
 0x196   : > { %4069 = vmatmul.mubr.bf16.gmra.mrb[100].mxu1 %v11422_v54 }
 0x197   : > { %4422 = vmatmul.mubr.bf16.gmra.mrb[100].mxu0 %v11456_v14  ;;  %4078 = vmatprep.mubr.bf16.mxu1 %v11427_v56 }
 0x198   : > { %4431 = vmatprep.mubr.bf16.mxu0 %v11461_v6 }
 0x199   : > { %v3617_v47 = vpop.f32.mrb[60].mxu1 }
 0x19a   : > { %v3619_v49 = vpop.f32.mrb[61].mxu1 }
 0x19b   : > { %v3621_v5 = vpop.f32.mrb[62].mxu1 }
 0x19c   : > { %v3623_v33 = vpop.f32.mrb[63].mxu1 }
 0x19e   : > { %4079 = vmatmul.mubr.bf16.gmra.mrb[104].mxu1 %v11436_v60 }
 0x19f   : > { %4432 = vmatmul.mubr.bf16.gmra.mrb[104].mxu0 %v11470_v22  ;;  %4088 = vmatprep.mubr.bf16.mxu1 %v11439_v62  ;;  %v10134_v62 = vld [vmem:[%s10860_s28 + $0x200] ss:$8 sps:$4 sm:$0xff]  }
 0x1a0   : > { %4441 = vmatprep.mubr.bf16.mxu0 %v11473_v3 }
 0x1a2   : > { %v4173_v54 = vpop.f32.mrb[0].mxu0 }
 0x1a3   : > { %v9004_v58 = vadd.f32 %v4173_v54, %v11417_v52  ;;  %v4175_v59 = vpop.f32.mrb[1].mxu0  ;;  %v10354_v54 = vld [vmem:[%s10860_s28 + $0x4] ss:$8 sps:$4 sm:$0xff]  }
 0x1a4   : > { %v9005_v56 = vadd.f32 %v4175_v59, %v11419_v53  ;;  %v4177_v61 = vpop.f32.mrb[2].mxu0 }
 0x1a5   : > { %6610 = vst [vmem:[#allocation3] sm:$0xff] %v9004_v58  ;;  %v9006_v0 = vadd.f32 %v4177_v61, %v11424_v55  ;;  %v4179_v60 = vpop.f32.mrb[3].mxu0  ;;  %v10141_v55 = vld [vmem:[%s10860_s28 + $0x214] ss:$8 sps:$4 sm:$0xff]  }
 0x1a6   : > { %6611 = vst [vmem:[#allocation3 + $0x8] sm:$0xff] %v9005_v56  ;;  %v9007_v11 = vadd.f32 %v4179_v60, %v11429_v57  ;;  %4089 = vmatmul.mubr.bf16.gmra.mrb[108].mxu1 %v11456_v14  ;;  %v10170_v56 = vld [vmem:[%s13230_s1 + $0x33c] ss:$24 sps:$4 sm:$0xff]   ;;  %v10171_v60 = vld [vmem:[%s13230_s1 + $0x340] ss:$24 sps:$4 sm:$0xff]  }
 0x1a7   : > { %6616 = vst [vmem:[#allocation3 + $0x30] sm:$0xff] %v9006_v0  ;;  %4442 = vmatmul.mubr.bf16.gmra.mrb[108].mxu0 %v11490_v15  ;;  %4098 = vmatprep.mubr.bf16.mxu1 %v11461_v6  ;;  %v10173_v61 = vld [vmem:[%s13230_s1 + $0x344] ss:$24 sps:$4 sm:$0xff]   ;;  %v10168_v0 = vld [vmem:[%s13230_s1 + $0x338] ss:$24 sps:$4 sm:$0xff]  }
 0x1a8   : > { %6617 = vst [vmem:[#allocation3 + $0x38] sm:$0xff] %v9007_v11  ;;  %4451 = vmatprep.mubr.bf16.mxu0 %v10132_v63  ;;  %v10356_v11 = vld [vmem:[%s10860_s28 + $0x14] ss:$8 sps:$4 sm:$0xff]  }
 0x1aa   : > { %v4183_v52 = vpop.f32.mrb[4].mxu0 }
 0x1ab   : > { %v4185_v53 = vpop.f32.mrb[5].mxu0  ;;  %v10176_v52 = vld [vmem:[%s13230_s1 + $0x36c] ss:$24 sps:$4 sm:$0xff]  }
 0x1ac   : > { %v4187_v35 = vpop.f32.mrb[6].mxu0  ;;  %v10179_v53 = vld [vmem:[%s13230_s1 + $0x374] ss:$24 sps:$4 sm:$0xff]  }
 0x1ad   : > { %v4189_v37 = vpop.f32.mrb[7].mxu0 }
 0x1ae   : > { %4099 = vmatmul.mubr.bf16.gmra.mrb[112].mxu1 %v11470_v22 }
 0x1af   : > { %4452 = vmatmul.mubr.bf16.gmra.mrb[112].mxu0 %v10134_v62  ;;  %4108 = vmatprep.mubr.bf16.mxu1 %v11473_v3  ;;  %v10149_v3 = vld [vmem:[%s10860_s28 + $0x220] ss:$8 sps:$4 sm:$0xff]  }
 0x1b0   : > { %4461 = vmatprep.mubr.bf16.mxu0 %v10141_v55 }
 0x1b2   : > { %v4193_v57 = vpop.f32.mrb[8].mxu0 }
 0x1b3   : > { %v9012_v14 = vadd.f32 %v4193_v57, %v11451_v10  ;;  %v4195_v13 = vpop.f32.mrb[9].mxu0 }
 0x1b4   : > { %v9013_v6 = vadd.f32 %v4195_v13, %v11453_v12  ;;  %v4197_v24 = vpop.f32.mrb[10].mxu0 }
 0x1b5   : > { %6634 = vst [vmem:[#allocation3 + $0xc0] sm:$0xff] %v9012_v14  ;;  %v9014_v34 = vadd.f32 %v4197_v24, %v11458_v4  ;;  %v4199_v23 = vpop.f32.mrb[11].mxu0  ;;  %v10357_v24 = vld [vmem:[%s10860_s28 + $0x10] ss:$8 sps:$4 sm:$0xff]  }
 0x1b6   : > { %6635 = vst [vmem:[#allocation3 + $0xc8] sm:$0xff] %v9013_v6  ;;  %v9015_v22 = vadd.f32 %v4199_v23, %v11463_v16  ;;  %4109 = vmatmul.mubr.bf16.gmra.mrb[116].mxu1 %v11490_v15  ;;  %v10182_v6 = vld [vmem:[%s13230_s1 + $0x39c] ss:$24 sps:$4 sm:$0xff]  }
 0x1b7   : > { %6640 = vst [vmem:[#allocation3 + $0xf0] sm:$0xff] %v9014_v34  ;;  %4462 = vmatmul.mubr.bf16.gmra.mrb[116].mxu0 %v10143_v2  ;;  %4118 = vmatprep.mubr.bf16.mxu1 %v10132_v63  ;;  %v10355_v63 = vld [vmem:[%s10860_s28] ss:$8 sps:$4 sm:$0xff]  }
 0x1b8   : > { %6641 = vst [vmem:[#allocation3 + $0xf8] sm:$0xff] %v9015_v22  ;;  %4471 = vmatprep.mubr.bf16.mxu0 %v10147_v41  ;;  %v10358_v41 = vld [vmem:[%s10860_s28 + $0x24] ss:$8 sps:$4 sm:$0xff]   ;;  %v10183_v34 = vld [vmem:[%s13230_s1 + $0x3a0] ss:$24 sps:$4 sm:$0xff]  }
 0x1b9   : > { %v10188_v22 = vld [vmem:[%s13230_s1 + $0x3cc] ss:$24 sps:$4 sm:$0xff]  }
 0x1ba   : > { %v4203_v10 = vpop.f32.mrb[12].mxu0 }
 0x1bb   : > { %v4205_v12 = vpop.f32.mrb[13].mxu0  ;;  %v10191_v10 = vld [vmem:[%s13230_s1 + $0x3d4] ss:$24 sps:$4 sm:$0xff]  }
 0x1bc   : > { %v4207_v36 = vpop.f32.mrb[14].mxu0 }
 0x1bd   : > { %v4209_v38 = vpop.f32.mrb[15].mxu0 }
 0x1be   : > { %4119 = vmatmul.mubr.bf16.gmra.mrb[120].mxu1 %v10134_v62  ;;  %v10189_v38 = vld [vmem:[%s13230_s1 + $0x3d0] ss:$24 sps:$4 sm:$0xff]  }
 0x1bf   : > { %4472 = vmatmul.mubr.bf16.gmra.mrb[120].mxu0 %v10149_v3  ;;  %4128 = vmatprep.mubr.bf16.mxu1 %v10141_v55 }
 0x1c0   : > { %4481 = vmatprep.mubr.bf16.mxu0 %v10156_v25  ;;  %v10186_v25 = vld [vmem:[%s13230_s1 + $0x3c8] ss:$24 sps:$4 sm:$0xff]  }
 0x1c2   : > { %v4213_v4 = vpop.f32.mrb[16].mxu0 }
 0x1c3   : > { %v9020_v16 = vadd.f32 %v4213_v4, %v11485_v28  ;;  %v4215_v15 = vpop.f32.mrb[17].mxu0  ;;  %v10194_v4 = vld [vmem:[%s13230_s1 + $0x3fc] ss:$24 sps:$4 sm:$0xff]  }
 0x1c4   : > { %v9021_v43 = vadd.f32 %v4215_v15, %v11487_v30  ;;  %v4217_v47 = vpop.f32.mrb[18].mxu0  ;;  %v10359_v15 = vld [vmem:[%s10860_s28 + $0x20] ss:$8 sps:$4 sm:$0xff]  }
 0x1c5   : > { %6658 = vst [vmem:[#allocation3 + $0x180] sm:$0xff] %v9020_v16  ;;  %v9022_v49 = vadd.f32 %v4217_v47, %v11492_v17  ;;  %v4219_v5 = vpop.f32.mrb[19].mxu0  ;;  %v10162_v17 = vld [vmem:[%s13230_s1 + $0x308] ss:$24 sps:$4 sm:$0xff]   ;;  %v10197_v16 = vld [vmem:[%s13230_s1 + $0x404] ss:$24 sps:$4 sm:$0xff]  }
 0x1c6   : > { %6659 = vst [vmem:[#allocation3 + $0x188] sm:$0xff] %v9021_v43  ;;  %v9023_v33 = vadd.f32 %v4219_v5, %v11494_v32  ;;  %4129 = vmatmul.mubr.bf16.gmra.mrb[124].mxu1 %v10143_v2  ;;  %v10165_v32 = vld [vmem:[%s13230_s1 + $0x310] ss:$24 sps:$4 sm:$0xff]   ;;  %v10195_v47 = vld [vmem:[%s13230_s1 + $0x400] ss:$24 sps:$4 sm:$0xff]  }
 0x1c7   : > { %6664 = vst [vmem:[#allocation3 + $0x1b0] sm:$0xff] %v9022_v49  ;;  %4482 = vmatmul.mubr.bf16.gmra.mrb[124].mxu0 %v10158_v40  ;;  %4524 = vmatprep.mubr.bf16.mxu1 %v10354_v54  ;;  %v10174_v2 = vld [vmem:[%s13230_s1 + $0x368] ss:$24 sps:$4 sm:$0xff]   ;;  %v10360_v40 = vld [vmem:[%s10860_s28 + $0x34] ss:$8 sps:$4 sm:$0xff]  }
 0x1c8   : > { %6665 = vst [vmem:[#allocation3 + $0x1b8] sm:$0xff] %v9023_v33  ;;  %5583 = vmatprep.mubr.bf16.mxu0 %v10354_v54  ;;  %v10192_v43 = vld [vmem:[%s13230_s1 + $0x3f8] ss:$24 sps:$4 sm:$0xff]   ;;  %v10200_v5 = vld [vmem:[%s13230_s1 + $0x42c] ss:$24 sps:$4 sm:$0xff]  }
 0x1c9   : > { %v10203_v33 = vld [vmem:[%s13230_s1 + $0x434] ss:$24 sps:$4 sm:$0xff]  }
 0x1ca   : > { %v4223_v28 = vpop.f32.mrb[20].mxu0 }
 0x1cb   : > { %v4225_v58 = vpop.f32.mrb[21].mxu0 }
 0x1cc   : > { %v4227_v30 = vpop.f32.mrb[22].mxu0 }
 0x1cd   : > { %v4229_v59 = vpop.f32.mrb[23].mxu0 }
 0x1ce   : > { %4525 = vmatmul.mubr.bf16.vlgmr.msra.gmra.mrb[128].mxu1 %v10355_v63  ;;  %v10198_v59 = vld [vmem:[%s13230_s1 + $0x428] ss:$24 sps:$4 sm:$0xff]  }
 0x1cf   : > { %5584 = vmatmul.mubr.bf16.vlgmr.msra.gmra.mrb[128].mxu0 %v10355_v63  ;;  %4846 = vmatpush1.bf16.msra.mxu1 %v10162_v17  ;;  %v10362_v63 = vld [vmem:[%s10860_s28 + $0x44] ss:$8 sps:$4 sm:$0xff]  }
 0x1d0   : > { %5905 = vmatpush1.bf16.msra.mxu0 %v10165_v32  ;;  %4534 = vmatprep.mubr.bf16.mxu1 %v10356_v11 }
 0x1d1   : > { %5593 = vmatprep.mubr.bf16.mxu0 %v10356_v11  ;;  %4847 = vmatprep.subr.bf16.mxu1 %v10170_v56  ;;  %v10209_v56 = vld [vmem:[%s13230_s1 + $0x464] ss:$24 sps:$4 sm:$0xff]  }
 0x1d2   : > { %v4233_v62 = vpop.f32.mrb[24].mxu0  ;;  %5906 = vmatprep.subr.bf16.mxu0 %v10173_v61  ;;  %v10361_v61 = vld [vmem:[%s10860_s28 + $0x30] ss:$8 sps:$4 sm:$0xff]   ;;  %v10212_v11 = vld [vmem:[%s13230_s1 + $0x48c] ss:$24 sps:$4 sm:$0xff]  }
 0x1d3   : > { %v9028_v35 = vadd.f32 %v4233_v62, %v11519_v44  ;;  %v4235_v55 = vpop.f32.mrb[25].mxu0  ;;  %4848 = vmatpush1.bf16.msra.mxu1 %v10168_v0  ;;  %v10177_v44 = vld [vmem:[%s13230_s1 + $0x370] ss:$24 sps:$4 sm:$0xff]   ;;  %v10207_v0 = vld [vmem:[%s13230_s1 + $0x460] ss:$24 sps:$4 sm:$0xff]  }
 0x1d4   : > { %v9029_v37 = vadd.f32 %v4235_v55, %v11521_v46  ;;  %v4237_v57 = vpop.f32.mrb[26].mxu0  ;;  %5907 = vmatpush1.bf16.msra.mxu0 %v10171_v60  ;;  %4849 = vmatprep.subr.bf16.mxu1 %v10176_v52  ;;  %v10215_v52 = vld [vmem:[%s13230_s1 + $0x494] ss:$24 sps:$4 sm:$0xff]   ;;  %v10210_v55 = vld [vmem:[%s13230_s1 + $0x488] ss:$24 sps:$4 sm:$0xff]  }
 0x1d5   : > { %6682 = vst [vmem:[#allocation3 + $0x240] sm:$0xff] %v9028_v35  ;;  %v9030_v14 = vadd.f32 %v4237_v57, %v11523_v7  ;;  %v4239_v13 = vpop.f32.mrb[27].mxu0  ;;  %5908 = vmatprep.subr.bf16.mxu0 %v10179_v53  ;;  %v10185_v7 = vld [vmem:[%s13230_s1 + $0x3a4] ss:$24 sps:$4 sm:$0xff]  }
 0x1d6   : > { %6683 = vst [vmem:[#allocation3 + $0x248] sm:$0xff] %v9029_v37  ;;  %v9031_v46 = vadd.f32 %v4239_v13, %v11525_v48  ;;  %4535 = vmatmul.mubr.bf16.gmra.mrb[132].mxu1 %v10357_v24  ;;  %v10180_v48 = vld [vmem:[%s13230_s1 + $0x398] ss:$24 sps:$4 sm:$0xff]   ;;  %v10218_v57 = vld [vmem:[%s13230_s1 + $0x4bc] ss:$24 sps:$4 sm:$0xff]  }
 0x1d7   : > { %6688 = vst [vmem:[#allocation3 + $0x270] sm:$0xff] %v9030_v14  ;;  %5594 = vmatmul.mubr.bf16.gmra.mrb[132].mxu0 %v10357_v24  ;;  %4544 = vmatprep.mubr.bf16.mxu1 %v10358_v41  ;;  %v10213_v37 = vld [vmem:[%s13230_s1 + $0x490] ss:$24 sps:$4 sm:$0xff]   ;;  %v10221_v14 = vld [vmem:[%s13230_s1 + $0x4c4] ss:$24 sps:$4 sm:$0xff]  }
 0x1d8   : > { %6689 = vst [vmem:[#allocation3 + $0x278] sm:$0xff] %v9031_v46  ;;  %5603 = vmatprep.mubr.bf16.mxu0 %v10358_v41  ;;  %4850 = vmatpush1.bf16.msra.mxu1 %v10174_v2  ;;  %v10363_v13 = vld [vmem:[%s10860_s28 + $0x40] ss:$8 sps:$4 sm:$0xff]   ;;  %v10364_v2 = vld [vmem:[%s10860_s28 + $0x54] ss:$8 sps:$4 sm:$0xff]  }
 0x1d9   : > { %5909 = vmatpush1.bf16.msra.mxu0 %v10177_v44  ;;  %4851 = vmatprep.subr.bf16.mxu1 %v10182_v6  ;;  %v10216_v44 = vld [vmem:[%s13230_s1 + $0x4b8] ss:$24 sps:$4 sm:$0xff]   ;;  %v10227_v24 = vld [vmem:[%s13230_s1 + $0x4f4] ss:$24 sps:$4 sm:$0xff]  }
 0x1da   : > { %v4243_v23 = vpop.f32.mrb[28].mxu0  ;;  %5910 = vmatprep.subr.bf16.mxu0 %v10185_v7  ;;  %v10219_v46 = vld [vmem:[%s13230_s1 + $0x4c0] ss:$24 sps:$4 sm:$0xff]   ;;  %v10224_v7 = vld [vmem:[%s13230_s1 + $0x4ec] ss:$24 sps:$4 sm:$0xff]  }
 0x1db   : > { %v4245_v12 = vpop.f32.mrb[29].mxu0 }
 0x1dc   : > { %v4247_v3 = vpop.f32.mrb[30].mxu0  ;;  %4852 = vmatpush1.bf16.msra.mxu1 %v10180_v48  ;;  %v10222_v12 = vld [vmem:[%s13230_s1 + $0x4e8] ss:$24 sps:$4 sm:$0xff]  }
 0x1dd   : > { %v4249_v36 = vpop.f32.mrb[31].mxu0  ;;  %5911 = vmatpush1.bf16.msra.mxu0 %v10183_v34  ;;  %4853 = vmatprep.subr.bf16.mxu1 %v10188_v22 }
 0x1de   : > { %5912 = vmatprep.subr.bf16.mxu0 %v10191_v10  ;;  %4545 = vmatmul.mubr.bf16.gmra.mrb[136].mxu1 %v10359_v15 }
 0x1df   : > { %5604 = vmatmul.mubr.bf16.gmra.mrb[136].mxu0 %v10359_v15  ;;  %4554 = vmatprep.mubr.bf16.mxu1 %v10360_v40  ;;  %v10228_v15 = vld [vmem:[%s13230_s1 + $0x518] ss:$24 sps:$4 sm:$0xff]  }
 0x1e0   : > { %5613 = vmatprep.mubr.bf16.mxu0 %v10360_v40  ;;  %4854 = vmatpush1.bf16.msra.mxu1 %v10186_v25  ;;  %v10230_v40 = vld [vmem:[%s13230_s1 + $0x51c] ss:$24 sps:$4 sm:$0xff]  }
 0x1e1   : > { %5913 = vmatpush1.bf16.msra.mxu0 %v10189_v38  ;;  %4855 = vmatprep.subr.bf16.mxu1 %v10194_v4 }
 0x1e2   : > { %v4253_v49 = vpop.f32.mrb[32].mxu0  ;;  %5914 = vmatprep.subr.bf16.mxu0 %v10197_v16  ;;  %v10367_v16 = vld [vmem:[%s10860_s28 + $0x60] ss:$8 sps:$4 sm:$0xff]  }
 0x1e3   : > { %v9036_v54 = vadd.f32 %v4253_v49, %v11556_v20  ;;  %v4255_v28 = vpop.f32.mrb[33].mxu0  ;;  %v10201_v20 = vld [vmem:[%s13230_s1 + $0x430] ss:$24 sps:$4 sm:$0xff]  }
 0x1e4   : > { %v9037_v58 = vadd.f32 %v4255_v28, %v11561_v9  ;;  %v4257_v30 = vpop.f32.mrb[34].mxu0  ;;  %4856 = vmatpush1.bf16.msra.mxu1 %v10192_v43  ;;  %v10231_v43 = vld [vmem:[%s13230_s1 + $0x520] ss:$24 sps:$4 sm:$0xff]  }
 0x1e5   : > { %6706 = vst [vmem:[#allocation3 + $0x300] sm:$0xff] %v9036_v54  ;;  %v9038_v17 = vadd.f32 %v4257_v30, %v11563_v19  ;;  %v4259_v32 = vpop.f32.mrb[35].mxu0  ;;  %5915 = vmatpush1.bf16.msra.mxu0 %v10195_v47  ;;  %4857 = vmatprep.subr.bf16.mxu1 %v10200_v5  ;;  %v10206_v19 = vld [vmem:[%s13230_s1 + $0x45c] ss:$24 sps:$4 sm:$0xff]  }
 0x1e6   : > { %6707 = vst [vmem:[#allocation3 + $0x308] sm:$0xff] %v9037_v58  ;;  %v9039_v9 = vadd.f32 %v4259_v32, %v11565_v8  ;;  %5916 = vmatprep.subr.bf16.mxu0 %v10203_v33  ;;  %4555 = vmatmul.mubr.bf16.gmra.mrb[140].mxu1 %v10361_v61  ;;  %v10204_v8 = vld [vmem:[%s13230_s1 + $0x458] ss:$24 sps:$4 sm:$0xff]   ;;  %v10233_v47 = vld [vmem:[%s13230_s1 + $0x524] ss:$24 sps:$4 sm:$0xff]  }
 0x1e7   : > { %6712 = vst [vmem:[#allocation3 + $0x330] sm:$0xff] %v9038_v17  ;;  %5614 = vmatmul.mubr.bf16.gmra.mrb[140].mxu0 %v10361_v61  ;;  %4564 = vmatprep.mubr.bf16.mxu1 %v10362_v63  ;;  %v10369_v32 = vld [vmem:[%s10860_s28 + $0x70] ss:$8 sps:$4 sm:$0xff]  }
 0x1e8   : > { %6713 = vst [vmem:[#allocation3 + $0x338] sm:$0xff] %v9039_v9  ;;  %5623 = vmatprep.mubr.bf16.mxu0 %v10362_v63  ;;  %4858 = vmatpush1.bf16.msra.mxu1 %v10198_v59  ;;  %v10237_v61 = vld [vmem:[%s13230_s1 + $0x550] ss:$24 sps:$4 sm:$0xff]   ;;  %v10239_v63 = vld [vmem:[%s13230_s1 + $0x554] ss:$24 sps:$4 sm:$0xff]  }
 0x1e9   : > { %5917 = vmatpush1.bf16.msra.mxu0 %v10201_v20  ;;  %4859 = vmatprep.subr.bf16.mxu1 %v10206_v19  ;;  %v10371_v19 = vld [vmem:[%s10860_s28 + $0x80] ss:$8 sps:$4 sm:$0xff]  }
 0x1ea   : > { %v4263_v60 = vpop.f32.mrb[36].mxu0  ;;  %5918 = vmatprep.subr.bf16.mxu0 %v10209_v56  ;;  %v10236_v56 = vld [vmem:[%s13230_s1 + $0x54c] ss:$24 sps:$4 sm:$0xff]  }
 0x1eb   : > { %v4265_v53 = vpop.f32.mrb[37].mxu0 }
 0x1ec   : > { %v4267_v62 = vpop.f32.mrb[38].mxu0  ;;  %4860 = vmatpush1.bf16.msra.mxu1 %v10204_v8 }
 0x1ed   : > { %v4269_v35 = vpop.f32.mrb[39].mxu0  ;;  %5919 = vmatpush1.bf16.msra.mxu0 %v10207_v0  ;;  %4861 = vmatprep.subr.bf16.mxu1 %v10212_v11 }
 0x1ee   : > { %5920 = vmatprep.subr.bf16.mxu0 %v10215_v52  ;;  %4565 = vmatmul.mubr.bf16.gmra.mrb[144].mxu1 %v10363_v13 }
 0x1ef   : > { %5624 = vmatmul.mubr.bf16.gmra.mrb[144].mxu0 %v10363_v13  ;;  %4574 = vmatprep.mubr.bf16.mxu1 %v10364_v2  ;;  %v10240_v13 = vld [vmem:[%s13230_s1 + $0x578] ss:$24 sps:$4 sm:$0xff]  }
 0x1f0   : > { %5633 = vmatprep.mubr.bf16.mxu0 %v10364_v2  ;;  %4862 = vmatpush1.bf16.msra.mxu1 %v10210_v55  ;;  %v11899_v55 = vld [vmem:[%s10860_s28 + $0x90] ss:$8 sps:$4 sm:$0xff]   ;;  %v10242_v2 = vld [vmem:[%s13230_s1 + $0x57c] ss:$24 sps:$4 sm:$0xff]  }
 0x1f1   : > { %5921 = vmatpush1.bf16.msra.mxu0 %v10213_v37  ;;  %4863 = vmatprep.subr.bf16.mxu1 %v10218_v57 }
 0x1f2   : > { %v4273_v6 = vpop.f32.mrb[40].mxu0  ;;  %5922 = vmatprep.subr.bf16.mxu0 %v10221_v14  ;;  %v11914_v14 = vld [vmem:[%s10860_s28 + $0xb4] ss:$8 sps:$4 sm:$0xff]  }
 0x1f3   : > { %v9044_v41 = vadd.f32 %v4273_v6, %v11596_v42  ;;  %v4275_v48 = vpop.f32.mrb[41].mxu0  ;;  %v10225_v42 = vld [vmem:[%s13230_s1 + $0x4f0] ss:$24 sps:$4 sm:$0xff]  }
 0x1f4   : > { %v9045_v34 = vadd.f32 %v4275_v48, %v11601_v50  ;;  %v4277_v23 = vpop.f32.mrb[42].mxu0  ;;  %4864 = vmatpush1.bf16.msra.mxu1 %v10216_v44  ;;  %v10365_v50 = vld [vmem:[%s10860_s28 + $0x50] ss:$8 sps:$4 sm:$0xff]  }
 0x1f5   : > { %6730 = vst [vmem:[#allocation3 + $0x3c0] sm:$0xff] %v9044_v41  ;;  %v9046_v22 = vadd.f32 %v4277_v23, %v11603_v31  ;;  %v4279_v10 = vpop.f32.mrb[43].mxu0  ;;  %5923 = vmatpush1.bf16.msra.mxu0 %v10219_v46  ;;  %4865 = vmatprep.subr.bf16.mxu1 %v10224_v7  ;;  %v10366_v31 = vld [vmem:[%s10860_s28 + $0x64] ss:$8 sps:$4 sm:$0xff]   ;;  %v10243_v44 = vld [vmem:[%s13230_s1 + $0x580] ss:$24 sps:$4 sm:$0xff]  }
 0x1f6   : > { %6731 = vst [vmem:[#allocation3 + $0x3c8] sm:$0xff] %v9045_v34  ;;  %v9047_v3 = vadd.f32 %v4279_v10, %v11605_v51  ;;  %5924 = vmatprep.subr.bf16.mxu0 %v10227_v24  ;;  %4575 = vmatmul.mubr.bf16.gmra.mrb[148].mxu1 %v10365_v50  ;;  %v10368_v51 = vld [vmem:[%s10860_s28 + $0x74] ss:$8 sps:$4 sm:$0xff]  }
 0x1f7   : > { %6736 = vst [vmem:[#allocation3 + $0x3f0] sm:$0xff] %v9046_v22  ;;  %5634 = vmatmul.mubr.bf16.gmra.mrb[148].mxu0 %v10365_v50  ;;  %4584 = vmatprep.mubr.bf16.mxu1 %v10366_v31  ;;  %v10245_v46 = vld [vmem:[%s13230_s1 + $0x584] ss:$24 sps:$4 sm:$0xff]   ;;  %v11931_v50 = vld [vmem:[%s10860_s28 + $0xb0] ss:$8 sps:$4 sm:$0xff]  }
 0x1f8   : > { %6737 = vst [vmem:[#allocation3 + $0x3f8] sm:$0xff] %v9047_v3  ;;  %5643 = vmatprep.mubr.bf16.mxu0 %v10366_v31  ;;  %4866 = vmatpush1.bf16.msra.mxu1 %v10222_v12  ;;  %v11936_v31 = vld [vmem:[%s10860_s28 + $0xc4] ss:$8 sps:$4 sm:$0xff]  }
 0x1f9   : > { %5925 = vmatpush1.bf16.msra.mxu0 %v10225_v42  ;;  %4867 = vmatprep.subr.bf16.mxu1 %v10230_v40 }
 0x1fa   : > { %v4283_v36 = vpop.f32.mrb[44].mxu0  ;;  %5926 = vmatprep.subr.bf16.mxu0 %v10233_v47  ;;  %v10246_v47 = vld [vmem:[%s13230_s1 + $0x5a8] ss:$24 sps:$4 sm:$0xff]  }
 0x1fb   : > { %v4285_v25 = vpop.f32.mrb[45].mxu0 }
 0x1fc   : > { %v4287_v38 = vpop.f32.mrb[46].mxu0  ;;  %4868 = vmatpush1.bf16.msra.mxu1 %v10228_v15 }
 0x1fd   : > { %v4289_v4 = vpop.f32.mrb[47].mxu0  ;;  %5927 = vmatpush1.bf16.msra.mxu0 %v10231_v43  ;;  %4869 = vmatprep.subr.bf16.mxu1 %v10236_v56  ;;  %v11941_v43 = vld [vmem:[%s10860_s28 + $0xc0] ss:$8 sps:$4 sm:$0xff]   ;;  %v11968_v56 = vld [vmem:[%s10860_s28 + $0xe4] ss:$8 sps:$4 sm:$0xff]  }
 0x1fe   : > { %4585 = vmatmul.mubr.bf16.gmra.mrb[152].mxu1 %v10367_v16  ;;  %5928 = vmatprep.subr.bf16.mxu0 %v10239_v63 }
 0x1ff   : > { %5644 = vmatmul.mubr.bf16.gmra.mrb[152].mxu0 %v10367_v16  ;;  %4594 = vmatprep.mubr.bf16.mxu1 %v10368_v51 }
 0x200   : > { %5653 = vmatprep.mubr.bf16.mxu0 %v10368_v51 }
 0x201   : > { %5929 = vmatpush1.bf16.msra.mxu0 %v10237_v61 }
 0x202   : > { %v4293_v49 = vpop.f32.mrb[48].mxu0  ;;  %5930 = vmatprep.subr.bf16.mxu0 %v10245_v46 }
 0x203   : > { %v9052_v5 = vadd.f32 %v4293_v49, %v11636_v18  ;;  %v4295_v33 = vpop.f32.mrb[49].mxu0  ;;  %v10370_v18 = vld [vmem:[%s10860_s28 + $0x84] ss:$8 sps:$4 sm:$0xff]  }
 0x204   : > { %v9053_v54 = vadd.f32 %v4295_v33, %v11641_v21  ;;  %v4297_v28 = vpop.f32.mrb[50].mxu0  ;;  %v10248_v49 = vld [vmem:[%s13230_s1 + $0x5ac] ss:$24 sps:$4 sm:$0xff]   ;;  %v11955_v33 = vld [vmem:[%s10860_s28 + $0xd4] ss:$8 sps:$4 sm:$0xff]  }
 0x205   : > { %6754 = vst [vmem:[#allocation3 + $0x480] sm:$0xff] %v9052_v5  ;;  %v9054_v58 = vadd.f32 %v4297_v28, %v11643_v39  ;;  %v4299_v30 = vpop.f32.mrb[51].mxu0  ;;  %v10372_v39 = vld [vmem:[%s10860_s28 + $0x94] ss:$8 sps:$4 sm:$0xff]   ;;  %5931 = vmatpush1.bf16.msra.mxu0 %v10243_v44  ;;  %v10249_v5 = vld [vmem:[%s13230_s1 + $0x5b0] ss:$24 sps:$4 sm:$0xff]  }
 0x206   : > { %6755 = vst [vmem:[#allocation3 + $0x488] sm:$0xff] %v9053_v54  ;;  %v9055_v17 = vadd.f32 %v4299_v30, %v11645_v26  ;;  %4595 = vmatmul.mubr.bf16.gmra.mrb[156].mxu1 %v10369_v32  ;;  %v10234_v26 = vld [vmem:[%s13230_s1 + $0x548] ss:$24 sps:$4 sm:$0xff]   ;;  %v10251_v54 = vld [vmem:[%s13230_s1 + $0x5b4] ss:$24 sps:$4 sm:$0xff]  }
 0x207   : > { %6760 = vst [vmem:[#allocation3 + $0x4b0] sm:$0xff] %v9054_v58  ;;  %5654 = vmatmul.mubr.bf16.gmra.mrb[156].mxu0 %v10369_v32  ;;  %4604 = vmatprep.mubr.bf16.mxu1 %v10370_v18 }
 0x208   : > { %6761 = vst [vmem:[#allocation3 + $0x4b8] sm:$0xff] %v9055_v17  ;;  %5663 = vmatprep.mubr.bf16.mxu0 %v10370_v18  ;;  %4870 = vmatpush1.bf16.msra.mxu1 %v10234_v26  ;;  %v11963_v26 = vld [vmem:[%s10860_s28 + $0xd0] ss:$8 sps:$4 sm:$0xff]  }
 0x209   : > { %4871 = vmatprep.subr.bf16.mxu1 %v10242_v2  ;;  %5932 = vmatprep.subr.bf16.mxu0 %v10251_v54 }
 0x20a   : > { %v4303_v21 = vpop.f32.mrb[52].mxu0  ;;  %5933 = vmatpush1.bf16.msra.mxu0 %v10249_v5 }
 0x20b   : > { %v4305_v59 = vpop.f32.mrb[53].mxu0 }
 0x20c   : > { %v4307_v20 = vpop.f32.mrb[54].mxu0  ;;  %4872 = vmatpush1.bf16.msra.mxu1 %v10240_v13 }
 0x20d   : > { %v4309_v9 = vpop.f32.mrb[55].mxu0  ;;  %4873 = vmatprep.subr.bf16.mxu1 %v10248_v49  ;;  %v10263_v49 = vld [vmem:[%s13230_s1 + $0x614] ss:$24 sps:$4 sm:$0xff]  }
 0x20e   : > { %4605 = vmatmul.mubr.bf16.gmra.mrb[160].mxu1 %v10371_v19 }
 0x20f   : > { %5664 = vmatmul.mubr.bf16.gmra.mrb[160].mxu0 %v10371_v19  ;;  %4614 = vmatprep.mubr.bf16.mxu1 %v10372_v39 }
 0x210   : > { %5673 = vmatprep.mubr.bf16.mxu0 %v10372_v39  ;;  %4874 = vmatpush1.bf16.msra.mxu1 %v10246_v47  ;;  %v12013_v47 = vld [vmem:[%s10860_s28 + $0x114] ss:$8 sps:$4 sm:$0xff]  }
 0x212   : > { %v4313_v8 = vpop.f32.mrb[56].mxu0 }
 0x213   : > { %v9060_v0 = vadd.f32 %v4313_v8, %v11667_v45  ;;  %v4315_v60 = vpop.f32.mrb[57].mxu0  ;;  %v11904_v45 = vld [vmem:[%s10860_s28 + $0xa4] ss:$8 sps:$4 sm:$0xff]  }
 0x214   : > { %v9061_v11 = vadd.f32 %v4315_v60, %v11669_v27  ;;  %v4317_v52 = vpop.f32.mrb[58].mxu0 }
 0x215   : > { %6778 = vst [vmem:[#allocation3 + $0x540] sm:$0xff] %v9060_v0  ;;  %v9062_v53 = vadd.f32 %v4317_v52, %v11671_v29  ;;  %v4319_v62 = vpop.f32.mrb[59].mxu0 }
 0x216   : > { %6779 = vst [vmem:[#allocation3 + $0x548] sm:$0xff] %v9061_v11  ;;  %v9063_v35 = vadd.f32 %v4319_v62, %v11673_v1  ;;  %4615 = vmatmul.mubr.bf16.gmra.mrb[164].mxu1 %v11899_v55  ;;  %v11909_v1 = vld [vmem:[%s10860_s28 + $0xa0] ss:$8 sps:$4 sm:$0xff]  }
 0x217   : > { %6784 = vst [vmem:[#allocation3 + $0x570] sm:$0xff] %v9062_v53  ;;  %5674 = vmatmul.mubr.bf16.gmra.mrb[164].mxu0 %v11899_v55  ;;  %4624 = vmatprep.mubr.bf16.mxu1 %v11904_v45  ;;  %v11973_v62 = vld [vmem:[%s10860_s28 + $0xe0] ss:$8 sps:$4 sm:$0xff]  }
 0x218   : > { %6785 = vst [vmem:[#allocation3 + $0x578] sm:$0xff] %v9063_v35  ;;  %5683 = vmatprep.mubr.bf16.mxu0 %v11904_v45  ;;  %v10252_v35 = vld [vmem:[%s13230_s1 + $0x5d8] ss:$24 sps:$4 sm:$0xff]  }
 0x21a   : > { %v4323_v27 = vpop.f32.mrb[60].mxu0 }
 0x21b   : > { %v4325_v29 = vpop.f32.mrb[61].mxu0  ;;  %v10254_v27 = vld [vmem:[%s13230_s1 + $0x5dc] ss:$24 sps:$4 sm:$0xff]  }
 0x21c   : > { %v4327_v37 = vpop.f32.mrb[62].mxu0  ;;  %v10255_v29 = vld [vmem:[%s13230_s1 + $0x5e0] ss:$24 sps:$4 sm:$0xff]   ;;  %4875 = vmatprep.subr.bf16.mxu1 %v10254_v27  ;;  %v12036_v27 = vld [vmem:[%s10860_s28 + $0x134] ss:$8 sps:$4 sm:$0xff]  }
 0x21d   : > { %v4329_v57 = vpop.f32.mrb[63].mxu0  ;;  %v11987_v37 = vld [vmem:[%s10860_s28 + $0xf4] ss:$8 sps:$4 sm:$0xff]   ;;  %4876 = vmatpush1.bf16.msra.mxu1 %v10252_v35  ;;  %v12031_v35 = vld [vmem:[%s10860_s28 + $0x120] ss:$8 sps:$4 sm:$0xff]  }
 0x21e   : > { %4625 = vmatmul.mubr.bf16.gmra.mrb[168].mxu1 %v11909_v1  ;;  %v10257_v57 = vld [vmem:[%s13230_s1 + $0x5e4] ss:$24 sps:$4 sm:$0xff]  }
 0x21f   : > { %5684 = vmatmul.mubr.bf16.gmra.mrb[168].mxu0 %v11909_v1  ;;  %4634 = vmatprep.mubr.bf16.mxu1 %v11914_v14 }
 0x220   : > { %5693 = vmatprep.mubr.bf16.mxu0 %v11914_v14  ;;  %5934 = vmatprep.subr.bf16.mxu0 %v10257_v57 }
 0x221   : > { %v3980_v6 = vpop.f32.mrb[64].mxu1  ;;  %5935 = vmatpush1.bf16.msra.mxu0 %v10255_v29 }
 0x222   : > { %v4333_v7 = vpop.f32.mrb[64].mxu0  ;;  %v3982_v41 = vpop.f32.mrb[65].mxu1  ;;  %6257 = vmatprep.subr.bf16.mxu0 %v10263_v49  ;;  %v12056_v49 = vld [vmem:[%s10860_s28 + $0x154] ss:$8 sps:$4 sm:$0xff]  }
 0x223   : > { %v9068_v24 = vadd.f32 %v4333_v7, %v3980_v6  ;;  %v4335_v48 = vpop.f32.mrb[65].mxu0  ;;  %v3984_v23 = vpop.f32.mrb[66].mxu1 }
 0x224   : > { %v9069_v34 = vadd.f32 %v4335_v48, %v3982_v41  ;;  %v4337_v22 = vpop.f32.mrb[66].mxu0  ;;  %v3986_v12 = vpop.f32.mrb[67].mxu1 }
 0x225   : > { %6802 = vst [vmem:[#allocation3 + $0x600] sm:$0xff] %v9068_v24  ;;  %v9070_v10 = vadd.f32 %v4337_v22, %v3984_v23  ;;  %v4339_v42 = vpop.f32.mrb[67].mxu0 }
 0x226   : > { %6803 = vst [vmem:[#allocation3 + $0x608] sm:$0xff] %v9069_v34  ;;  %v9071_v3 = vadd.f32 %v4339_v42, %v3986_v12  ;;  %4635 = vmatmul.mubr.bf16.gmra.mrb[172].mxu1 %v11931_v50  ;;  %v12000_v12 = vld [vmem:[%s10860_s28 + $0x104] ss:$8 sps:$4 sm:$0xff]  }
 0x227   : > { %6808 = vst [vmem:[#allocation3 + $0x630] sm:$0xff] %v9070_v10  ;;  %5694 = vmatmul.mubr.bf16.gmra.mrb[172].mxu0 %v11931_v50  ;;  %4644 = vmatprep.mubr.bf16.mxu1 %v11936_v31  ;;  %v11995_v10 = vld [vmem:[%s10860_s28 + $0xf0] ss:$8 sps:$4 sm:$0xff]  }
 0x228   : > { %6809 = vst [vmem:[#allocation3 + $0x638] sm:$0xff] %v9071_v3  ;;  %5703 = vmatprep.mubr.bf16.mxu0 %v11936_v31 }
 0x229   : > { %v3990_v36 = vpop.f32.mrb[68].mxu1 }
 0x22a   : > { %v4343_v25 = vpop.f32.mrb[68].mxu0  ;;  %v3992_v38 = vpop.f32.mrb[69].mxu1 }
 0x22b   : > { %v4345_v4 = vpop.f32.mrb[69].mxu0  ;;  %v3994_v16 = vpop.f32.mrb[70].mxu1 }
 0x22c   : > { %v4347_v51 = vpop.f32.mrb[70].mxu0  ;;  %v3996_v15 = vpop.f32.mrb[71].mxu1 }
 0x22d   : > { %v4349_v40 = vpop.f32.mrb[71].mxu0  ;;  %v12005_v15 = vld [vmem:[%s10860_s28 + $0x100] ss:$8 sps:$4 sm:$0xff]  }
 0x22e   : > { %4645 = vmatmul.mubr.bf16.gmra.mrb[176].mxu1 %v11941_v43  ;;  %v10260_v40 = vld [vmem:[%s13230_s1 + $0x60c] ss:$24 sps:$4 sm:$0xff]  }
 0x22f   : > { %5704 = vmatmul.mubr.bf16.gmra.mrb[176].mxu0 %v11941_v43  ;;  %4654 = vmatprep.mubr.bf16.mxu1 %v11955_v33 }
 0x230   : > { %5713 = vmatprep.mubr.bf16.mxu0 %v11955_v33  ;;  %5198 = vmatprep.subr.bf16.mxu1 %v10260_v40  ;;  %v12051_v40 = vld [vmem:[%s10860_s28 + $0x140] ss:$8 sps:$4 sm:$0xff]  }
 0x231   : > { %v4000_v28 = vpop.f32.mrb[72].mxu1 }
 0x232   : > { %v4353_v58 = vpop.f32.mrb[72].mxu0  ;;  %v4002_v17 = vpop.f32.mrb[73].mxu1 }
 0x233   : > { %v9076_v30 = vadd.f32 %v4353_v58, %v4000_v28  ;;  %v4355_v32 = vpop.f32.mrb[73].mxu0  ;;  %v4004_v21 = vpop.f32.mrb[74].mxu1 }
 0x234   : > { %v9077_v18 = vadd.f32 %v4355_v32, %v4002_v17  ;;  %v4357_v59 = vpop.f32.mrb[74].mxu0  ;;  %v4006_v9 = vpop.f32.mrb[75].mxu1 }
 0x235   : > { %6826 = vst [vmem:[#allocation3 + $0x6c0] sm:$0xff] %v9076_v30  ;;  %v9078_v20 = vadd.f32 %v4357_v59, %v4004_v21  ;;  %v4359_v19 = vpop.f32.mrb[75].mxu0 }
 0x236   : > { %6827 = vst [vmem:[#allocation3 + $0x6c8] sm:$0xff] %v9077_v18  ;;  %v9079_v39 = vadd.f32 %v4359_v19, %v4006_v9  ;;  %4655 = vmatmul.mubr.bf16.gmra.mrb[180].mxu1 %v11963_v26  ;;  %v12021_v19 = vld [vmem:[%s10860_s28 + $0x110] ss:$8 sps:$4 sm:$0xff]  }
 0x237   : > { %6832 = vst [vmem:[#allocation3 + $0x6f0] sm:$0xff] %v9078_v20  ;;  %5714 = vmatmul.mubr.bf16.gmra.mrb[180].mxu0 %v11963_v26  ;;  %4664 = vmatprep.mubr.bf16.mxu1 %v11968_v56 }
 0x238   : > { %6833 = vst [vmem:[#allocation3 + $0x6f8] sm:$0xff] %v9079_v39  ;;  %5723 = vmatprep.mubr.bf16.mxu0 %v11968_v56  ;;  %v12026_v39 = vld [vmem:[%s10860_s28 + $0x124] ss:$8 sps:$4 sm:$0xff]  }
 0x239   : > { %v4010_v61 = vpop.f32.mrb[76].mxu1 }
 0x23a   : > { %v4363_v63 = vpop.f32.mrb[76].mxu0  ;;  %v4012_v8 = vpop.f32.mrb[77].mxu1 }
 0x23b   : > { %v4365_v0 = vpop.f32.mrb[77].mxu0  ;;  %v4014_v60 = vpop.f32.mrb[78].mxu1 }
 0x23c   : > { %v4367_v11 = vpop.f32.mrb[78].mxu0  ;;  %v4016_v52 = vpop.f32.mrb[79].mxu1 }
 0x23d   : > { %v4369_v53 = vpop.f32.mrb[79].mxu0 }
 0x23e   : > { %4665 = vmatmul.mubr.bf16.gmra.mrb[184].mxu1 %v11973_v62 }
 0x23f   : > { %5724 = vmatmul.mubr.bf16.gmra.mrb[184].mxu0 %v11973_v62  ;;  %4674 = vmatprep.mubr.bf16.mxu1 %v11987_v37 }
 0x240   : > { %5733 = vmatprep.mubr.bf16.mxu0 %v11987_v37 }
 0x241   : > { %v4020_v13 = vpop.f32.mrb[80].mxu1 }
 0x242   : > { %v4373_v2 = vpop.f32.mrb[80].mxu0  ;;  %v4022_v46 = vpop.f32.mrb[81].mxu1 }
 0x243   : > { %v9084_v44 = vadd.f32 %v4373_v2, %v4020_v13  ;;  %v4375_v6 = vpop.f32.mrb[81].mxu0  ;;  %v4024_v24 = vpop.f32.mrb[82].mxu1 }
 0x244   : > { %v9085_v7 = vadd.f32 %v4375_v6, %v4022_v46  ;;  %v4377_v41 = vpop.f32.mrb[82].mxu0  ;;  %v4026_v34 = vpop.f32.mrb[83].mxu1 }
 0x245   : > { %6850 = vst [vmem:[#allocation3 + $0x780] sm:$0xff] %v9084_v44  ;;  %v9086_v48 = vadd.f32 %v4377_v41, %v4024_v24  ;;  %v4379_v23 = vpop.f32.mrb[83].mxu0 }
 0x246   : > { %6851 = vst [vmem:[#allocation3 + $0x788] sm:$0xff] %v9085_v7  ;;  %v9087_v22 = vadd.f32 %v4379_v23, %v4026_v34  ;;  %4675 = vmatmul.mubr.bf16.gmra.mrb[188].mxu1 %v11995_v10  ;;  %v12041_v23 = vld [vmem:[%s10860_s28 + $0x130] ss:$8 sps:$4 sm:$0xff]  }
 0x247   : > { %6856 = vst [vmem:[#allocation3 + $0x7b0] sm:$0xff] %v9086_v48  ;;  %5734 = vmatmul.mubr.bf16.gmra.mrb[188].mxu0 %v11995_v10  ;;  %4684 = vmatprep.mubr.bf16.mxu1 %v12000_v12 }
 0x248   : > { %6857 = vst [vmem:[#allocation3 + $0x7b8] sm:$0xff] %v9087_v22  ;;  %5743 = vmatprep.mubr.bf16.mxu0 %v12000_v12  ;;  %v12046_v22 = vld [vmem:[%s10860_s28 + $0x144] ss:$8 sps:$4 sm:$0xff]  }
 0x249   : > { %v4030_v42 = vpop.f32.mrb[84].mxu1 }
 0x24a   : > { %v4383_v3 = vpop.f32.mrb[84].mxu0  ;;  %v4032_v36 = vpop.f32.mrb[85].mxu1 }
 0x24b   : > { %v4385_v25 = vpop.f32.mrb[85].mxu0  ;;  %v4034_v38 = vpop.f32.mrb[86].mxu1 }
 0x24c   : > { %v4387_v4 = vpop.f32.mrb[86].mxu0  ;;  %v4036_v16 = vpop.f32.mrb[87].mxu1 }
 0x24d   : > { %v4389_v51 = vpop.f32.mrb[87].mxu0 }
 0x24e   : > { %4685 = vmatmul.mubr.bf16.gmra.mrb[192].mxu1 %v12005_v15 }
 0x24f   : > { %5744 = vmatmul.mubr.bf16.gmra.mrb[192].mxu0 %v12005_v15  ;;  %4694 = vmatprep.mubr.bf16.mxu1 %v12013_v47 }
 0x250   : > { %5753 = vmatprep.mubr.bf16.mxu0 %v12013_v47 }
 0x251   : > { %v4040_v5 = vpop.f32.mrb[88].mxu1 }
 0x252   : > { %v4393_v54 = vpop.f32.mrb[88].mxu0  ;;  %v4042_v58 = vpop.f32.mrb[89].mxu1 }
 0x253   : > { %v9092_v28 = vadd.f32 %v4393_v54, %v4040_v5  ;;  %v4395_v30 = vpop.f32.mrb[89].mxu0  ;;  %v4044_v32 = vpop.f32.mrb[90].mxu1 }
 0x254   : > { %v9093_v17 = vadd.f32 %v4395_v30, %v4042_v58  ;;  %v4397_v18 = vpop.f32.mrb[90].mxu0  ;;  %v4046_v59 = vpop.f32.mrb[91].mxu1 }
 0x255   : > { %6874 = vst [vmem:[#allocation3 + $0x840] sm:$0xff] %v9092_v28  ;;  %v9094_v21 = vadd.f32 %v4397_v18, %v4044_v32  ;;  %v4399_v20 = vpop.f32.mrb[91].mxu0 }
 0x256   : > { %6875 = vst [vmem:[#allocation3 + $0x848] sm:$0xff] %v9093_v17  ;;  %v9095_v9 = vadd.f32 %v4399_v20, %v4046_v59  ;;  %4695 = vmatmul.mubr.bf16.gmra.mrb[196].mxu1 %v12021_v19 }
 0x257   : > { %6880 = vst [vmem:[#allocation3 + $0x870] sm:$0xff] %v9094_v21  ;;  %5754 = vmatmul.mubr.bf16.gmra.mrb[196].mxu0 %v12021_v19  ;;  %4704 = vmatprep.mubr.bf16.mxu1 %v12026_v39 }
 0x258   : > { %6881 = vst [vmem:[#allocation3 + $0x878] sm:$0xff] %v9095_v9  ;;  %5763 = vmatprep.mubr.bf16.mxu0 %v12026_v39 }
 0x259   : > { %v4050_v61 = vpop.f32.mrb[92].mxu1 }
 0x25a   : > { %v4403_v63 = vpop.f32.mrb[92].mxu0  ;;  %v4052_v8 = vpop.f32.mrb[93].mxu1  ;;  %v12061_v61 = vld [vmem:[%s10860_s28 + $0x150] ss:$8 sps:$4 sm:$0xff]  }
 0x25b   : > { %v4405_v0 = vpop.f32.mrb[93].mxu0  ;;  %v4054_v60 = vpop.f32.mrb[94].mxu1  ;;  %v12066_v63 = vld [vmem:[%s10860_s28 + $0x164] ss:$8 sps:$4 sm:$0xff]  }
 0x25c   : > { %v4407_v11 = vpop.f32.mrb[94].mxu0  ;;  %v4056_v52 = vpop.f32.mrb[95].mxu1 }
 0x25d   : > { %v4409_v53 = vpop.f32.mrb[95].mxu0 }
 0x25e   : > { %4705 = vmatmul.mubr.bf16.gmra.mrb[200].mxu1 %v12031_v35 }
 0x25f   : > { %5764 = vmatmul.mubr.bf16.gmra.mrb[200].mxu0 %v12031_v35  ;;  %4714 = vmatprep.mubr.bf16.mxu1 %v12036_v27 }
 0x260   : > { %5773 = vmatprep.mubr.bf16.mxu0 %v12036_v27 }
 0x261   : > { %v4060_v29 = vpop.f32.mrb[96].mxu1 }
 0x262   : > { %v4413_v57 = vpop.f32.mrb[96].mxu0  ;;  %v4062_v2 = vpop.f32.mrb[97].mxu1 }
 0x263   : > { %v9100_v13 = vadd.f32 %v4413_v57, %v4060_v29  ;;  %v4415_v44 = vpop.f32.mrb[97].mxu0  ;;  %v4064_v6 = vpop.f32.mrb[98].mxu1 }
 0x264   : > { %v9101_v46 = vadd.f32 %v4415_v44, %v4062_v2  ;;  %v4417_v7 = vpop.f32.mrb[98].mxu0  ;;  %v4066_v41 = vpop.f32.mrb[99].mxu1  ;;  %v12076_v2 = vld [vmem:[%s10860_s28 + $0x174] ss:$8 sps:$4 sm:$0xff]  }
 0x265   : > { %6898 = vst [vmem:[#allocation3 + $0x900] sm:$0xff] %v9100_v13  ;;  %v9102_v24 = vadd.f32 %v4417_v7, %v4064_v6  ;;  %v4419_v48 = vpop.f32.mrb[99].mxu0  ;;  %v12071_v13 = vld [vmem:[%s10860_s28 + $0x160] ss:$8 sps:$4 sm:$0xff]  }
 0x266   : > { %6899 = vst [vmem:[#allocation3 + $0x908] sm:$0xff] %v9101_v46  ;;  %v9103_v34 = vadd.f32 %v4419_v48, %v4066_v41  ;;  %4715 = vmatmul.mubr.bf16.gmra.mrb[204].mxu1 %v12041_v23 }
 0x267   : > { %6904 = vst [vmem:[#allocation3 + $0x930] sm:$0xff] %v9102_v24  ;;  %5774 = vmatmul.mubr.bf16.gmra.mrb[204].mxu0 %v12041_v23  ;;  %4724 = vmatprep.mubr.bf16.mxu1 %v12046_v22 }
 0x268   : > { %6905 = vst [vmem:[#allocation3 + $0x938] sm:$0xff] %v9103_v34  ;;  %5783 = vmatprep.mubr.bf16.mxu0 %v12046_v22 }
 0x269   : > { %v4070_v42 = vpop.f32.mrb[100].mxu1 }
 0x26a   : > { %v4423_v3 = vpop.f32.mrb[100].mxu0  ;;  %v4072_v36 = vpop.f32.mrb[101].mxu1 }
 0x26b   : > { %v4425_v25 = vpop.f32.mrb[101].mxu0  ;;  %v4074_v38 = vpop.f32.mrb[102].mxu1 }
 0x26c   : > { %v4427_v4 = vpop.f32.mrb[102].mxu0  ;;  %v4076_v16 = vpop.f32.mrb[103].mxu1  ;;  %v12081_v38 = vld [vmem:[%s10860_s28 + $0x170] ss:$8 sps:$4 sm:$0xff]  }
 0x26d   : > { %v4429_v51 = vpop.f32.mrb[103].mxu0  ;;  %v12086_v4 = vld [vmem:[%s10860_s28 + $0x184] ss:$8 sps:$4 sm:$0xff]  }
 0x26e   : > { %4725 = vmatmul.mubr.bf16.gmra.mrb[208].mxu1 %v12051_v40 }
 0x26f   : > { %5784 = vmatmul.mubr.bf16.gmra.mrb[208].mxu0 %v12051_v40  ;;  %4734 = vmatprep.mubr.bf16.mxu1 %v12056_v49 }
 0x270   : > { %5793 = vmatprep.mubr.bf16.mxu0 %v12056_v49 }
 0x271   : > { %v4080_v5 = vpop.f32.mrb[104].mxu1 }
 0x272   : > { %v4433_v54 = vpop.f32.mrb[104].mxu0  ;;  %v4082_v58 = vpop.f32.mrb[105].mxu1 }
 0x273   : > { %v9108_v28 = vadd.f32 %v4433_v54, %v4080_v5  ;;  %v4435_v30 = vpop.f32.mrb[105].mxu0  ;;  %v4084_v32 = vpop.f32.mrb[106].mxu1 }
 0x274   : > { %v9109_v17 = vadd.f32 %v4435_v30, %v4082_v58  ;;  %v4437_v18 = vpop.f32.mrb[106].mxu0  ;;  %v4086_v59 = vpop.f32.mrb[107].mxu1 }
 0x275   : > { %6922 = vst [vmem:[#allocation3 + $0x9c0] sm:$0xff] %v9108_v28  ;;  %v9110_v21 = vadd.f32 %v4437_v18, %v4084_v32  ;;  %v4439_v20 = vpop.f32.mrb[107].mxu0  ;;  %v12091_v32 = vld [vmem:[%s10860_s28 + $0x180] ss:$8 sps:$4 sm:$0xff]   ;;  %v12096_v18 = vld [vmem:[%s10860_s28 + $0x194] ss:$8 sps:$4 sm:$0xff]  }
 0x276   : > { %6923 = vst [vmem:[#allocation3 + $0x9c8] sm:$0xff] %v9109_v17  ;;  %v9111_v9 = vadd.f32 %v4439_v20, %v4086_v59  ;;  %4735 = vmatmul.mubr.bf16.gmra.mrb[212].mxu1 %v12061_v61 }
 0x277   : > { %6928 = vst [vmem:[#allocation3 + $0x9f0] sm:$0xff] %v9110_v21  ;;  %5794 = vmatmul.mubr.bf16.gmra.mrb[212].mxu0 %v12061_v61  ;;  %4744 = vmatprep.mubr.bf16.mxu1 %v12066_v63 }
 0x278   : > { %6929 = vst [vmem:[#allocation3 + $0x9f8] sm:$0xff] %v9111_v9  ;;  %5803 = vmatprep.mubr.bf16.mxu0 %v12066_v63 }
 0x279   : > { %v4090_v8 = vpop.f32.mrb[108].mxu1 }
 0x27a   : > { %v4443_v0 = vpop.f32.mrb[108].mxu0  ;;  %v4092_v60 = vpop.f32.mrb[109].mxu1 }
 0x27b   : > { %v4445_v11 = vpop.f32.mrb[109].mxu0  ;;  %v4094_v52 = vpop.f32.mrb[110].mxu1 }
 0x27c   : > { %v4447_v53 = vpop.f32.mrb[110].mxu0  ;;  %v4096_v29 = vpop.f32.mrb[111].mxu1 }
 0x27d   : > { %v4449_v57 = vpop.f32.mrb[111].mxu0 }
 0x27e   : > { %4745 = vmatmul.mubr.bf16.gmra.mrb[216].mxu1 %v12071_v13 }
 0x27f   : > { %5804 = vmatmul.mubr.bf16.gmra.mrb[216].mxu0 %v12071_v13  ;;  %4754 = vmatprep.mubr.bf16.mxu1 %v12076_v2 }
 0x280   : > { %5813 = vmatprep.mubr.bf16.mxu0 %v12076_v2 }
 0x281   : > { %v4100_v44 = vpop.f32.mrb[112].mxu1 }
 0x282   : > { %v4453_v46 = vpop.f32.mrb[112].mxu0  ;;  %v4102_v7 = vpop.f32.mrb[113].mxu1 }
 0x283   : > { %v9116_v6 = vadd.f32 %v4453_v46, %v4100_v44  ;;  %v4455_v24 = vpop.f32.mrb[113].mxu0  ;;  %v4104_v48 = vpop.f32.mrb[114].mxu1  ;;  %v12101_v44 = vld [vmem:[%s10860_s28 + $0x190] ss:$8 sps:$4 sm:$0xff]   ;;  %v12106_v46 = vld [vmem:[%s10860_s28 + $0x1a4] ss:$8 sps:$4 sm:$0xff]  }
 0x284   : > { %v9117_v41 = vadd.f32 %v4455_v24, %v4102_v7  ;;  %v4457_v34 = vpop.f32.mrb[114].mxu0  ;;  %v4106_v3 = vpop.f32.mrb[115].mxu1 }
 0x285   : > { %6946 = vst [vmem:[#allocation3 + $0xa80] sm:$0xff] %v9116_v6  ;;  %v9118_v42 = vadd.f32 %v4457_v34, %v4104_v48  ;;  %v4459_v36 = vpop.f32.mrb[115].mxu0 }
 0x286   : > { %6947 = vst [vmem:[#allocation3 + $0xa88] sm:$0xff] %v9117_v41  ;;  %v9119_v25 = vadd.f32 %v4459_v36, %v4106_v3  ;;  %4755 = vmatmul.mubr.bf16.gmra.mrb[220].mxu1 %v12081_v38  ;;  %v12111_v36 = vld [vmem:[%s10860_s28 + $0x1a0] ss:$8 sps:$4 sm:$0xff]  }
 0x287   : > { %6952 = vst [vmem:[#allocation3 + $0xab0] sm:$0xff] %v9118_v42  ;;  %5814 = vmatmul.mubr.bf16.gmra.mrb[220].mxu0 %v12081_v38  ;;  %4764 = vmatprep.mubr.bf16.mxu1 %v12086_v4 }
 0x288   : > { %6953 = vst [vmem:[#allocation3 + $0xab8] sm:$0xff] %v9119_v25  ;;  %5823 = vmatprep.mubr.bf16.mxu0 %v12086_v4  ;;  %v12116_v25 = vld [vmem:[%s10860_s28 + $0x1b4] ss:$8 sps:$4 sm:$0xff]  }
 0x289   : > { %v4110_v16 = vpop.f32.mrb[116].mxu1 }
 0x28a   : > { %v4463_v51 = vpop.f32.mrb[116].mxu0  ;;  %v4112_v5 = vpop.f32.mrb[117].mxu1  ;;  %v12121_v16 = vld [vmem:[%s10860_s28 + $0x1b0] ss:$8 sps:$4 sm:$0xff]  }
 0x28b   : > { %v4465_v54 = vpop.f32.mrb[117].mxu0  ;;  %v4114_v28 = vpop.f32.mrb[118].mxu1  ;;  %v12126_v51 = vld [vmem:[%s10860_s28 + $0x1c4] ss:$8 sps:$4 sm:$0xff]   ;;  %v12131_v5 = vld [vmem:[%s10860_s28 + $0x1c0] ss:$8 sps:$4 sm:$0xff]  }
 0x28c   : > { %v4467_v58 = vpop.f32.mrb[118].mxu0  ;;  %v4116_v30 = vpop.f32.mrb[119].mxu1  ;;  %v12136_v54 = vld [vmem:[%s10860_s28 + $0x1d4] ss:$8 sps:$4 sm:$0xff]   ;;  %v12141_v28 = vld [vmem:[%s10860_s28 + $0x1d0] ss:$8 sps:$4 sm:$0xff]  }
 0x28d   : > { %v4469_v17 = vpop.f32.mrb[119].mxu0  ;;  %v12146_v58 = vld [vmem:[%s10860_s28 + $0x1e4] ss:$8 sps:$4 sm:$0xff]   ;;  %v12151_v30 = vld [vmem:[%s10860_s28 + $0x1e0] ss:$8 sps:$4 sm:$0xff]  }
 0x28e   : > { %4765 = vmatmul.mubr.bf16.gmra.mrb[224].mxu1 %v12091_v32  ;;  %v12156_v17 = vld [vmem:[%s10860_s28 + $0x1f4] ss:$8 sps:$4 sm:$0xff]  }
 0x28f   : > { %5824 = vmatmul.mubr.bf16.gmra.mrb[224].mxu0 %v12091_v32  ;;  %4774 = vmatprep.mubr.bf16.mxu1 %v12096_v18 }
 0x290   : > { %5833 = vmatprep.mubr.bf16.mxu0 %v12096_v18 }
 0x291   : > { %v4120_v21 = vpop.f32.mrb[120].mxu1 }
 0x292   : > { %v4473_v59 = vpop.f32.mrb[120].mxu0  ;;  %v4122_v9 = vpop.f32.mrb[121].mxu1 }
 0x293   : > { %v9124_v20 = vadd.f32 %v4473_v59, %v4120_v21  ;;  %v4475_v8 = vpop.f32.mrb[121].mxu0  ;;  %v4124_v60 = vpop.f32.mrb[122].mxu1  ;;  %v12161_v21 = vld [vmem:[%s10860_s28 + $0x1f0] ss:$8 sps:$4 sm:$0xff]   ;;  %v10418_v59 = vld [vmem:[%s10860_s28 + $0x24] ss:$8 sps:$4 sm:$0xff]  }
 0x294   : > { %v9125_v0 = vadd.f32 %v4475_v8, %v4122_v9  ;;  %v4477_v11 = vpop.f32.mrb[122].mxu0  ;;  %v4126_v53 = vpop.f32.mrb[123].mxu1  ;;  %v10261_v9 = vld [vmem:[%s13230_s1 + $0x610] ss:$24 sps:$4 sm:$0xff]   ;;  %v10266_v8 = vld [vmem:[%s13230_s1 + $0x63c] ss:$24 sps:$4 sm:$0xff]  }
 0x295   : > { %6970 = vst [vmem:[#allocation3 + $0xb40] sm:$0xff] %v9124_v20  ;;  %v9126_v52 = vadd.f32 %v4477_v11, %v4124_v60  ;;  %v4479_v29 = vpop.f32.mrb[123].mxu0  ;;  %v10258_v20 = vld [vmem:[%s13230_s1 + $0x608] ss:$24 sps:$4 sm:$0xff]   ;;  %v10264_v11 = vld [vmem:[%s13230_s1 + $0x638] ss:$24 sps:$4 sm:$0xff]  }
 0x296   : > { %6971 = vst [vmem:[#allocation3 + $0xb48] sm:$0xff] %v9125_v0  ;;  %v9127_v57 = vadd.f32 %v4479_v29, %v4126_v53  ;;  %4775 = vmatmul.mubr.bf16.gmra.mrb[228].mxu1 %v12101_v44  ;;  %v10269_v0 = vld [vmem:[%s13230_s1 + $0x644] ss:$24 sps:$4 sm:$0xff]   ;;  %v10419_v60 = vld [vmem:[%s10860_s28 + $0x20] ss:$8 sps:$4 sm:$0xff]  }
 0x297   : > { %6976 = vst [vmem:[#allocation3 + $0xb70] sm:$0xff] %v9126_v52  ;;  %5834 = vmatmul.mubr.bf16.gmra.mrb[228].mxu0 %v12101_v44  ;;  %4784 = vmatprep.mubr.bf16.mxu1 %v12106_v46  ;;  %v10267_v52 = vld [vmem:[%s13230_s1 + $0x640] ss:$24 sps:$4 sm:$0xff]   ;;  %v10420_v53 = vld [vmem:[%s10860_s28 + $0x34] ss:$8 sps:$4 sm:$0xff]  }
 0x298   : > { %6977 = vst [vmem:[#allocation3 + $0xb78] sm:$0xff] %v9127_v57  ;;  %5843 = vmatprep.mubr.bf16.mxu0 %v12106_v46  ;;  %v10272_v29 = vld [vmem:[%s13230_s1 + $0x66c] ss:$24 sps:$4 sm:$0xff]  }
 0x299   : > { %v4130_v6 = vpop.f32.mrb[124].mxu1  ;;  %v10275_v57 = vld [vmem:[%s13230_s1 + $0x674] ss:$24 sps:$4 sm:$0xff]  }
 0x29a   : > { %v4483_v7 = vpop.f32.mrb[124].mxu0  ;;  %v4132_v24 = vpop.f32.mrb[125].mxu1  ;;  %v10270_v6 = vld [vmem:[%s13230_s1 + $0x668] ss:$24 sps:$4 sm:$0xff]  }
 0x29b   : > { %v4485_v41 = vpop.f32.mrb[125].mxu0  ;;  %v4134_v48 = vpop.f32.mrb[126].mxu1  ;;  %v10273_v7 = vld [vmem:[%s13230_s1 + $0x670] ss:$24 sps:$4 sm:$0xff]   ;;  %v10278_v24 = vld [vmem:[%s13230_s1 + $0x69c] ss:$24 sps:$4 sm:$0xff]  }
 0x29c   : > { %v4487_v34 = vpop.f32.mrb[126].mxu0  ;;  %v4136_v42 = vpop.f32.mrb[127].mxu1  ;;  %v10281_v41 = vld [vmem:[%s13230_s1 + $0x6a4] ss:$24 sps:$4 sm:$0xff]   ;;  %v10421_v48 = vld [vmem:[%s10860_s28 + $0x30] ss:$8 sps:$4 sm:$0xff]  }
 0x29d   : > { %v4489_v3 = vpop.f32.mrb[127].mxu0  ;;  %v12206_v34 = vld [vmem:[%s10860_s28 + $0x44] ss:$8 sps:$4 sm:$0xff]   ;;  %v10276_v42 = vld [vmem:[%s13230_s1 + $0x698] ss:$24 sps:$4 sm:$0xff]  }
 0x29e   : > { %4785 = vmatmul.mubr.bf16.gmra.mrb[232].mxu1 %v12111_v36  ;;  %v10279_v3 = vld [vmem:[%s13230_s1 + $0x6a0] ss:$24 sps:$4 sm:$0xff]  }
 0x29f   : > { %5844 = vmatmul.mubr.bf16.gmra.mrb[232].mxu0 %v12111_v36  ;;  %4794 = vmatprep.mubr.bf16.mxu1 %v12116_v25 }
 0x2a0   : > { %5853 = vmatprep.mubr.bf16.mxu0 %v12116_v25 }
 0x2a6   : > { %4795 = vmatmul.mubr.bf16.gmra.mrb[236].mxu1 %v12121_v16 }
 0x2a7   : > { %5854 = vmatmul.mubr.bf16.gmra.mrb[236].mxu0 %v12121_v16  ;;  %4804 = vmatprep.mubr.bf16.mxu1 %v12126_v51 }
 0x2a8   : > { %5863 = vmatprep.mubr.bf16.mxu0 %v12126_v51 }
 0x2ae   : > { %4805 = vmatmul.mubr.bf16.gmra.mrb[240].mxu1 %v12131_v5 }
 0x2af   : > { %5864 = vmatmul.mubr.bf16.gmra.mrb[240].mxu0 %v12131_v5  ;;  %4814 = vmatprep.mubr.bf16.mxu1 %v12136_v54 }
 0x2b0   : > { %5873 = vmatprep.mubr.bf16.mxu0 %v12136_v54 }
 0x2b6   : > { %4815 = vmatmul.mubr.bf16.gmra.mrb[244].mxu1 %v12141_v28 }
 0x2b7   : > { %5874 = vmatmul.mubr.bf16.gmra.mrb[244].mxu0 %v12141_v28  ;;  %4824 = vmatprep.mubr.bf16.mxu1 %v12146_v58 }
 0x2b8   : > { %5883 = vmatprep.mubr.bf16.mxu0 %v12146_v58 }
 0x2be   : > { %4825 = vmatmul.mubr.bf16.gmra.mrb[248].mxu1 %v12151_v30 }
 0x2bf   : > { %5884 = vmatmul.mubr.bf16.gmra.mrb[248].mxu0 %v12151_v30  ;;  %4834 = vmatprep.mubr.bf16.mxu1 %v12156_v17 }
 0x2c0   : > { %5893 = vmatprep.mubr.bf16.mxu0 %v12156_v17 }
 0x2c6   : > { %4835 = vmatmul.mubr.bf16.gmra.mrb[252].mxu1 %v12161_v21 }
 0x2c7   : > { %5894 = vmatmul.mubr.bf16.gmra.mrb[252].mxu0 %v12161_v21  ;;  %4877 = vmatprep.mubr.bf16.mxu1 %v10418_v59 }
 0x2c8   : > { %5936 = vmatprep.mubr.bf16.mxu0 %v10418_v59  ;;  %v10284_v59 = vld [vmem:[%s13230_s1 + $0x6cc] ss:$24 sps:$4 sm:$0xff]  }
 0x2ce   : > { %4878 = vmatmul.mubr.bf16.vlgmr.msra.gmra.mrb[128].mxu1 %v10419_v60 }
 0x2cf   : > { %5937 = vmatmul.mubr.bf16.vlgmr.msra.gmra.mrb[128].mxu0 %v10419_v60  ;;  %5199 = vmatpush1.bf16.msra.mxu1 %v10258_v20  ;;  %v10287_v20 = vld [vmem:[%s13230_s1 + $0x6d4] ss:$24 sps:$4 sm:$0xff]   ;;  %v10293_v60 = vld [vmem:[%s13230_s1 + $0x704] ss:$24 sps:$4 sm:$0xff]  }
 0x2d0   : > { %6258 = vmatpush1.bf16.msra.mxu0 %v10261_v9  ;;  %4887 = vmatprep.mubr.bf16.mxu1 %v10420_v53  ;;  %v10282_v9 = vld [vmem:[%s13230_s1 + $0x6c8] ss:$24 sps:$4 sm:$0xff]  }
 0x2d1   : > { %5946 = vmatprep.mubr.bf16.mxu0 %v10420_v53  ;;  %5200 = vmatprep.subr.bf16.mxu1 %v10266_v8  ;;  %v10285_v8 = vld [vmem:[%s13230_s1 + $0x6d0] ss:$24 sps:$4 sm:$0xff]  }
 0x2d2   : > { %6259 = vmatprep.subr.bf16.mxu0 %v10269_v0  ;;  %v10290_v0 = vld [vmem:[%s13230_s1 + $0x6fc] ss:$24 sps:$4 sm:$0xff]   ;;  %v10288_v53 = vld [vmem:[%s13230_s1 + $0x6f8] ss:$24 sps:$4 sm:$0xff]  }
 0x2d3   : > { %5201 = vmatpush1.bf16.msra.mxu1 %v10264_v11  ;;  %v12235_v11 = vld [vmem:[%s10860_s28 + $0x40] ss:$8 sps:$4 sm:$0xff]  }
 0x2d4   : > { %6260 = vmatpush1.bf16.msra.mxu0 %v10267_v52  ;;  %5202 = vmatprep.subr.bf16.mxu1 %v10272_v29  ;;  %v12240_v52 = vld [vmem:[%s10860_s28 + $0x54] ss:$8 sps:$4 sm:$0xff]   ;;  %v10291_v29 = vld [vmem:[%s13230_s1 + $0x700] ss:$24 sps:$4 sm:$0xff]  }
 0x2d5   : > { %6261 = vmatprep.subr.bf16.mxu0 %v10275_v57  ;;  %v10296_v57 = vld [vmem:[%s13230_s1 + $0x72c] ss:$24 sps:$4 sm:$0xff]  }
 0x2d6   : > { %4888 = vmatmul.mubr.bf16.gmra.mrb[132].mxu1 %v10421_v48 }
 0x2d7   : > { %5947 = vmatmul.mubr.bf16.gmra.mrb[132].mxu0 %v10421_v48  ;;  %4897 = vmatprep.mubr.bf16.mxu1 %v12206_v34  ;;  %v10305_v48 = vld [vmem:[%s13230_s1 + $0x764] ss:$24 sps:$4 sm:$0xff]  }
 0x2d8   : > { %5956 = vmatprep.mubr.bf16.mxu0 %v12206_v34  ;;  %5203 = vmatpush1.bf16.msra.mxu1 %v10270_v6  ;;  %v10299_v6 = vld [vmem:[%s13230_s1 + $0x734] ss:$24 sps:$4 sm:$0xff]  }
 0x2d9   : > { %6262 = vmatpush1.bf16.msra.mxu0 %v10273_v7  ;;  %5204 = vmatprep.subr.bf16.mxu1 %v10278_v24  ;;  %v10294_v7 = vld [vmem:[%s13230_s1 + $0x728] ss:$24 sps:$4 sm:$0xff]  }
 0x2da   : > { %6263 = vmatprep.subr.bf16.mxu0 %v10281_v41  ;;  %v10297_v24 = vld [vmem:[%s13230_s1 + $0x730] ss:$24 sps:$4 sm:$0xff]   ;;  %v10302_v41 = vld [vmem:[%s13230_s1 + $0x75c] ss:$24 sps:$4 sm:$0xff]  }
 0x2dc   : > { %5205 = vmatpush1.bf16.msra.mxu1 %v10276_v42  ;;  %v12269_v42 = vld [vmem:[%s10860_s28 + $0x50] ss:$8 sps:$4 sm:$0xff]  }
 0x2dd   : > { %6264 = vmatpush1.bf16.msra.mxu0 %v10279_v3  ;;  %5206 = vmatprep.subr.bf16.mxu1 %v10284_v59  ;;  %v12274_v3 = vld [vmem:[%s10860_s28 + $0x64] ss:$8 sps:$4 sm:$0xff]   ;;  %v10300_v59 = vld [vmem:[%s13230_s1 + $0x758] ss:$24 sps:$4 sm:$0xff]  }
 0x2de   : > { %6265 = vmatprep.subr.bf16.mxu0 %v10287_v20  ;;  %4898 = vmatmul.mubr.bf16.gmra.mrb[136].mxu1 %v12235_v11  ;;  %v10303_v20 = vld [vmem:[%s13230_s1 + $0x760] ss:$24 sps:$4 sm:$0xff]  }
 0x2df   : > { %5957 = vmatmul.mubr.bf16.gmra.mrb[136].mxu0 %v12235_v11  ;;  %4907 = vmatprep.mubr.bf16.mxu1 %v12240_v52 }
 0x2e0   : > { %5966 = vmatprep.mubr.bf16.mxu0 %v12240_v52  ;;  %5207 = vmatpush1.bf16.msra.mxu1 %v10282_v9  ;;  %v10308_v9 = vld [vmem:[%s13230_s1 + $0x78c] ss:$24 sps:$4 sm:$0xff]  }
 0x2e1   : > { %6266 = vmatpush1.bf16.msra.mxu0 %v10285_v8  ;;  %5208 = vmatprep.subr.bf16.mxu1 %v10290_v0  ;;  %v10311_v8 = vld [vmem:[%s13230_s1 + $0x794] ss:$24 sps:$4 sm:$0xff]   ;;  %v10306_v0 = vld [vmem:[%s13230_s1 + $0x788] ss:$24 sps:$4 sm:$0xff]  }
 0x2e2   : > { %6267 = vmatprep.subr.bf16.mxu0 %v10293_v60  ;;  %v10309_v60 = vld [vmem:[%s13230_s1 + $0x790] ss:$24 sps:$4 sm:$0xff]  }
 0x2e4   : > { %5209 = vmatpush1.bf16.msra.mxu1 %v10288_v53  ;;  %v10314_v53 = vld [vmem:[%s13230_s1 + $0x7bc] ss:$24 sps:$4 sm:$0xff]  }
 0x2e5   : > { %6268 = vmatpush1.bf16.msra.mxu0 %v10291_v29  ;;  %5210 = vmatprep.subr.bf16.mxu1 %v10296_v57  ;;  %v10317_v29 = vld [vmem:[%s13230_s1 + $0x7c4] ss:$24 sps:$4 sm:$0xff]   ;;  %v12303_v57 = vld [vmem:[%s10860_s28 + $0x60] ss:$8 sps:$4 sm:$0xff]  }
 0x2e6   : > { %6269 = vmatprep.subr.bf16.mxu0 %v10299_v6  ;;  %4908 = vmatmul.mubr.bf16.gmra.mrb[140].mxu1 %v12269_v42  ;;  %v12308_v6 = vld [vmem:[%s10860_s28 + $0x74] ss:$8 sps:$4 sm:$0xff]  }
 0x2e7   : > { %5967 = vmatmul.mubr.bf16.gmra.mrb[140].mxu0 %v12269_v42  ;;  %4917 = vmatprep.mubr.bf16.mxu1 %v12274_v3 }
 0x2e8   : > { %5976 = vmatprep.mubr.bf16.mxu0 %v12274_v3  ;;  %5211 = vmatpush1.bf16.msra.mxu1 %v10294_v7  ;;  %v10312_v7 = vld [vmem:[%s13230_s1 + $0x7b8] ss:$24 sps:$4 sm:$0xff]  }
 0x2e9   : > { %6270 = vmatpush1.bf16.msra.mxu0 %v10297_v24  ;;  %5212 = vmatprep.subr.bf16.mxu1 %v10302_v41  ;;  %v10315_v24 = vld [vmem:[%s13230_s1 + $0x7c0] ss:$24 sps:$4 sm:$0xff]   ;;  %v10320_v41 = vld [vmem:[%s13230_s1 + $0x7ec] ss:$24 sps:$4 sm:$0xff]  }
 0x2ea   : > { %6271 = vmatprep.subr.bf16.mxu0 %v10305_v48  ;;  %v10323_v48 = vld [vmem:[%s13230_s1 + $0x7f4] ss:$24 sps:$4 sm:$0xff]  }
 0x2ec   : > { %5213 = vmatpush1.bf16.msra.mxu1 %v10300_v59  ;;  %v10318_v59 = vld [vmem:[%s13230_s1 + $0x7e8] ss:$24 sps:$4 sm:$0xff]  }
 0x2ed   : > { %6272 = vmatpush1.bf16.msra.mxu0 %v10303_v20  ;;  %5214 = vmatprep.subr.bf16.mxu1 %v10308_v9  ;;  %v10321_v20 = vld [vmem:[%s13230_s1 + $0x7f0] ss:$24 sps:$4 sm:$0xff]  }
 0x2ee   : > { %6273 = vmatprep.subr.bf16.mxu0 %v10311_v8  ;;  %4918 = vmatmul.mubr.bf16.gmra.mrb[144].mxu1 %v12303_v57  ;;  %v12331_v9 = vld [vmem:[%s10860_s28 + $0x70] ss:$8 sps:$4 sm:$0xff]   ;;  %v12336_v8 = vld [vmem:[%s10860_s28 + $0x84] ss:$8 sps:$4 sm:$0xff]  }
 0x2ef   : > { %5977 = vmatmul.mubr.bf16.gmra.mrb[144].mxu0 %v12303_v57  ;;  %4927 = vmatprep.mubr.bf16.mxu1 %v12308_v6 }
 0x2f0   : > { %5986 = vmatprep.mubr.bf16.mxu0 %v12308_v6  ;;  %5215 = vmatpush1.bf16.msra.mxu1 %v10306_v0  ;;  %v12341_v0 = vld [vmem:[%s10860_s28 + $0x80] ss:$8 sps:$4 sm:$0xff]  }
 0x2f1   : > { %6274 = vmatpush1.bf16.msra.mxu0 %v10309_v60  ;;  %5216 = vmatprep.subr.bf16.mxu1 %v10314_v53  ;;  %v10324_v60 = vld [vmem:[%s13230_s1 + $0x818] ss:$24 sps:$4 sm:$0xff]   ;;  %v10326_v53 = vld [vmem:[%s13230_s1 + $0x81c] ss:$24 sps:$4 sm:$0xff]  }
 0x2f2   : > { %6275 = vmatprep.subr.bf16.mxu0 %v10317_v29  ;;  %v10327_v29 = vld [vmem:[%s13230_s1 + $0x820] ss:$24 sps:$4 sm:$0xff]  }
 0x2f4   : > { %5217 = vmatpush1.bf16.msra.mxu1 %v10312_v7  ;;  %v12355_v7 = vld [vmem:[%s10860_s28 + $0x94] ss:$8 sps:$4 sm:$0xff]  }
 0x2f5   : > { %6276 = vmatpush1.bf16.msra.mxu0 %v10315_v24  ;;  %5218 = vmatprep.subr.bf16.mxu1 %v10320_v41  ;;  %v10329_v24 = vld [vmem:[%s13230_s1 + $0x824] ss:$24 sps:$4 sm:$0xff]   ;;  %v10330_v41 = vld [vmem:[%s13230_s1 + $0x848] ss:$24 sps:$4 sm:$0xff]  }
 0x2f6   : > { %6277 = vmatprep.subr.bf16.mxu0 %v10323_v48  ;;  %4928 = vmatmul.mubr.bf16.gmra.mrb[148].mxu1 %v12331_v9  ;;  %v10332_v48 = vld [vmem:[%s13230_s1 + $0x84c] ss:$24 sps:$4 sm:$0xff]  }
 0x2f7   : > { %5987 = vmatmul.mubr.bf16.gmra.mrb[148].mxu0 %v12331_v9  ;;  %4937 = vmatprep.mubr.bf16.mxu1 %v12336_v8 }
 0x2f8   : > { %5996 = vmatprep.mubr.bf16.mxu0 %v12336_v8  ;;  %5219 = vmatpush1.bf16.msra.mxu1 %v10318_v59  ;;  %v12511_v59 = vld [vmem:[%s10860_s28 + $0x214] ss:$8 sps:$4 sm:$0xff]  }
 0x2f9   : > { %6278 = vmatpush1.bf16.msra.mxu0 %v10321_v20  ;;  %5220 = vmatprep.subr.bf16.mxu1 %v10326_v53  ;;  %v12516_v20 = vld [vmem:[%s10860_s28 + $0x210] ss:$8 sps:$4 sm:$0xff]   ;;  %v10448_v53 = vld [vmem:[%s10860_s28 + $0xf4] ss:$8 sps:$4 sm:$0xff]  }
 0x2fa   : > { %6279 = vmatprep.subr.bf16.mxu0 %v10329_v24  ;;  %v10451_v24 = vld [vmem:[%s10860_s28 + $0x100] ss:$8 sps:$4 sm:$0xff]  }
 0x2fc   : > { %5221 = vmatpush1.bf16.msra.mxu1 %v10324_v60  ;;  %v10447_v60 = vld [vmem:[%s10860_s28 + $0xe0] ss:$8 sps:$4 sm:$0xff]  }
 0x2fd   : > { %6280 = vmatpush1.bf16.msra.mxu0 %v10327_v29  ;;  %5222 = vmatprep.subr.bf16.mxu1 %v10332_v48  ;;  %v10449_v29 = vld [vmem:[%s10860_s28 + $0xf0] ss:$8 sps:$4 sm:$0xff]  }
 0x2fe   : > { %4938 = vmatmul.mubr.bf16.gmra.mrb[152].mxu1 %v12341_v0 }
 0x2ff   : > { %5997 = vmatmul.mubr.bf16.gmra.mrb[152].mxu0 %v12341_v0  ;;  %4947 = vmatprep.mubr.bf16.mxu1 %v12355_v7 }
 0x300   : > { %6006 = vmatprep.mubr.bf16.mxu0 %v12355_v7  ;;  %5223 = vmatpush1.bf16.msra.mxu1 %v10330_v41  ;;  %v10452_v41 = vld [vmem:[%s10860_s28 + $0x114] ss:$8 sps:$4 sm:$0xff]  }
 0x306   : > { %4948 = vmatmul.mubr.bf16.gmra.mrb[156].mxu1 %v11899_v55 }
 0x307   : > { %6007 = vmatmul.mubr.bf16.gmra.mrb[156].mxu0 %v11899_v55  ;;  %4957 = vmatprep.mubr.bf16.mxu1 %v11904_v45  ;;  %v10333_v55 = vld [vmem:[%s13230_s1 + $0x850] ss:$24 sps:$4 sm:$0xff]  }
 0x308   : > { %6016 = vmatprep.mubr.bf16.mxu0 %v11904_v45  ;;  %v10335_v45 = vld [vmem:[%s13230_s1 + $0x854] ss:$24 sps:$4 sm:$0xff]  }
 0x309   : > { %6281 = vmatprep.subr.bf16.mxu0 %v10335_v45  ;;  %v10454_v45 = vld [vmem:[#allocation3 + $0x8] sm:$0xff] }
 0x30a   : > { %6282 = vmatpush1.bf16.msra.mxu0 %v10333_v55 }
 0x30e   : > { %4958 = vmatmul.mubr.bf16.gmra.mrb[160].mxu1 %v11909_v1 }
 0x30f   : > { %6017 = vmatmul.mubr.bf16.gmra.mrb[160].mxu0 %v11909_v1  ;;  %4967 = vmatprep.mubr.bf16.mxu1 %v11914_v14  ;;  %v10336_v1 = vld [vmem:[%s13230_s1 + $0x878] ss:$24 sps:$4 sm:$0xff]  }
 0x310   : > { %6026 = vmatprep.mubr.bf16.mxu0 %v11914_v14  ;;  %v10338_v14 = vld [vmem:[%s13230_s1 + $0x87c] ss:$24 sps:$4 sm:$0xff]  }
 0x311   : > { %5224 = vmatprep.subr.bf16.mxu1 %v10338_v14 }
 0x312   : > { %5225 = vmatpush1.bf16.msra.mxu1 %v10336_v1 }
 0x316   : > { %4968 = vmatmul.mubr.bf16.gmra.mrb[164].mxu1 %v11931_v50 }
 0x317   : > { %6027 = vmatmul.mubr.bf16.gmra.mrb[164].mxu0 %v11931_v50  ;;  %4977 = vmatprep.mubr.bf16.mxu1 %v11936_v31  ;;  %v10339_v50 = vld [vmem:[%s13230_s1 + $0x880] ss:$24 sps:$4 sm:$0xff]  }
 0x318   : > { %6036 = vmatprep.mubr.bf16.mxu0 %v11936_v31  ;;  %v10341_v31 = vld [vmem:[%s13230_s1 + $0x884] ss:$24 sps:$4 sm:$0xff]  }
 0x319   : > { %6283 = vmatprep.subr.bf16.mxu0 %v10341_v31 }
 0x31a   : > { %6284 = vmatpush1.bf16.msra.mxu0 %v10339_v50 }
 0x31e   : > { %4978 = vmatmul.mubr.bf16.gmra.mrb[168].mxu1 %v11941_v43 }
 0x31f   : > { %6037 = vmatmul.mubr.bf16.gmra.mrb[168].mxu0 %v11941_v43  ;;  %4987 = vmatprep.mubr.bf16.mxu1 %v11955_v33  ;;  %v10342_v43 = vld [vmem:[%s13230_s1 + $0x8a8] ss:$24 sps:$4 sm:$0xff]  }
 0x320   : > { %6046 = vmatprep.mubr.bf16.mxu0 %v11955_v33  ;;  %v10344_v33 = vld [vmem:[%s13230_s1 + $0x8ac] ss:$24 sps:$4 sm:$0xff]  }
 0x321   : > { %5226 = vmatprep.subr.bf16.mxu1 %v10344_v33 }
 0x322   : > { %5227 = vmatpush1.bf16.msra.mxu1 %v10342_v43 }
 0x326   : > { %4988 = vmatmul.mubr.bf16.gmra.mrb[172].mxu1 %v11963_v26 }
 0x327   : > { %6047 = vmatmul.mubr.bf16.gmra.mrb[172].mxu0 %v11963_v26  ;;  %4997 = vmatprep.mubr.bf16.mxu1 %v11968_v56  ;;  %v10345_v26 = vld [vmem:[%s13230_s1 + $0x8b0] ss:$24 sps:$4 sm:$0xff]  }
 0x328   : > { %6056 = vmatprep.mubr.bf16.mxu0 %v11968_v56  ;;  %v10347_v56 = vld [vmem:[%s13230_s1 + $0x8b4] ss:$24 sps:$4 sm:$0xff]  }
 0x329   : > { %6285 = vmatprep.subr.bf16.mxu0 %v10347_v56 }
 0x32a   : > { %6286 = vmatpush1.bf16.msra.mxu0 %v10345_v26 }
 0x32e   : > { %4998 = vmatmul.mubr.bf16.gmra.mrb[176].mxu1 %v11973_v62 }
 0x32f   : > { %6057 = vmatmul.mubr.bf16.gmra.mrb[176].mxu0 %v11973_v62  ;;  %5007 = vmatprep.mubr.bf16.mxu1 %v11987_v37  ;;  %v10348_v62 = vld [vmem:[%s13230_s1 + $0x8d8] ss:$24 sps:$4 sm:$0xff]  }
 0x330   : > { %6066 = vmatprep.mubr.bf16.mxu0 %v11987_v37  ;;  %v10350_v37 = vld [vmem:[%s13230_s1 + $0x8dc] ss:$24 sps:$4 sm:$0xff]  }
 0x331   : > { %5228 = vmatprep.subr.bf16.mxu1 %v10350_v37 }
 0x332   : > { %5229 = vmatpush1.bf16.msra.mxu1 %v10348_v62 }
 0x336   : > { %5008 = vmatmul.mubr.bf16.gmra.mrb[180].mxu1 %v11995_v10 }
 0x337   : > { %6067 = vmatmul.mubr.bf16.gmra.mrb[180].mxu0 %v11995_v10  ;;  %5017 = vmatprep.mubr.bf16.mxu1 %v12000_v12  ;;  %v10351_v10 = vld [vmem:[%s13230_s1 + $0x8e0] ss:$24 sps:$4 sm:$0xff]  }
 0x338   : > { %6076 = vmatprep.mubr.bf16.mxu0 %v12000_v12  ;;  %v10353_v12 = vld [vmem:[%s13230_s1 + $0x8e4] ss:$24 sps:$4 sm:$0xff]  }
 0x339   : > { %6287 = vmatprep.subr.bf16.mxu0 %v10353_v12 }
 0x33a   : > { %6288 = vmatpush1.bf16.msra.mxu0 %v10351_v10 }
 0x33e   : > { %5018 = vmatmul.mubr.bf16.gmra.mrb[184].mxu1 %v12005_v15 }
 0x33f   : > { %6077 = vmatmul.mubr.bf16.gmra.mrb[184].mxu0 %v12005_v15  ;;  %5027 = vmatprep.mubr.bf16.mxu1 %v12013_v47  ;;  %v12501_v15 = vld [vmem:[%s10860_s28 + $0x204] ss:$8 sps:$4 sm:$0xff]  }
 0x340   : > { %6086 = vmatprep.mubr.bf16.mxu0 %v12013_v47  ;;  %v12506_v47 = vld [vmem:[%s10860_s28 + $0x200] ss:$8 sps:$4 sm:$0xff]  }
 0x346   : > { %5028 = vmatmul.mubr.bf16.gmra.mrb[188].mxu1 %v12021_v19 }
 0x347   : > { %6087 = vmatmul.mubr.bf16.gmra.mrb[188].mxu0 %v12021_v19  ;;  %5037 = vmatprep.mubr.bf16.mxu1 %v12026_v39 }
 0x348   : > { %6096 = vmatprep.mubr.bf16.mxu0 %v12026_v39 }
 0x34e   : > { %5038 = vmatmul.mubr.bf16.gmra.mrb[192].mxu1 %v12031_v35 }
 0x34f   : > { %6097 = vmatmul.mubr.bf16.gmra.mrb[192].mxu0 %v12031_v35  ;;  %5047 = vmatprep.mubr.bf16.mxu1 %v12036_v27 }
 0x350   : > { %6106 = vmatprep.mubr.bf16.mxu0 %v12036_v27 }
 0x356   : > { %5048 = vmatmul.mubr.bf16.gmra.mrb[196].mxu1 %v12041_v23 }
 0x357   : > { %6107 = vmatmul.mubr.bf16.gmra.mrb[196].mxu0 %v12041_v23  ;;  %5057 = vmatprep.mubr.bf16.mxu1 %v12046_v22 }
 0x358   : > { %6116 = vmatprep.mubr.bf16.mxu0 %v12046_v22 }
 0x35e   : > { %5058 = vmatmul.mubr.bf16.gmra.mrb[200].mxu1 %v12051_v40 }
 0x35f   : > { %6117 = vmatmul.mubr.bf16.gmra.mrb[200].mxu0 %v12051_v40  ;;  %5067 = vmatprep.mubr.bf16.mxu1 %v12056_v49 }
 0x360   : > { %6126 = vmatprep.mubr.bf16.mxu0 %v12056_v49 }
 0x366   : > { %5068 = vmatmul.mubr.bf16.gmra.mrb[204].mxu1 %v12061_v61 }
 0x367   : > { %6127 = vmatmul.mubr.bf16.gmra.mrb[204].mxu0 %v12061_v61  ;;  %5077 = vmatprep.mubr.bf16.mxu1 %v12066_v63 }
 0x368   : > { %6136 = vmatprep.mubr.bf16.mxu0 %v12066_v63 }
 0x36e   : > { %5078 = vmatmul.mubr.bf16.gmra.mrb[208].mxu1 %v12071_v13 }
 0x36f   : > { %6137 = vmatmul.mubr.bf16.gmra.mrb[208].mxu0 %v12071_v13  ;;  %5087 = vmatprep.mubr.bf16.mxu1 %v12076_v2 }
 0x370   : > { %6146 = vmatprep.mubr.bf16.mxu0 %v12076_v2 }
 0x376   : > { %5088 = vmatmul.mubr.bf16.gmra.mrb[212].mxu1 %v12081_v38 }
 0x377   : > { %6147 = vmatmul.mubr.bf16.gmra.mrb[212].mxu0 %v12081_v38  ;;  %5097 = vmatprep.mubr.bf16.mxu1 %v12086_v4 }
 0x378   : > { %6156 = vmatprep.mubr.bf16.mxu0 %v12086_v4 }
 0x37e   : > { %5098 = vmatmul.mubr.bf16.gmra.mrb[216].mxu1 %v12091_v32 }
 0x37f   : > { %6157 = vmatmul.mubr.bf16.gmra.mrb[216].mxu0 %v12091_v32  ;;  %5107 = vmatprep.mubr.bf16.mxu1 %v12096_v18 }
 0x380   : > { %6166 = vmatprep.mubr.bf16.mxu0 %v12096_v18 }
 0x386   : > { %5108 = vmatmul.mubr.bf16.gmra.mrb[220].mxu1 %v12101_v44 }
 0x387   : > { %6167 = vmatmul.mubr.bf16.gmra.mrb[220].mxu0 %v12101_v44  ;;  %5117 = vmatprep.mubr.bf16.mxu1 %v12106_v46 }
 0x388   : > { %6176 = vmatprep.mubr.bf16.mxu0 %v12106_v46 }
 0x38e   : > { %5118 = vmatmul.mubr.bf16.gmra.mrb[224].mxu1 %v12111_v36 }
 0x38f   : > { %6177 = vmatmul.mubr.bf16.gmra.mrb[224].mxu0 %v12111_v36  ;;  %5127 = vmatprep.mubr.bf16.mxu1 %v12116_v25 }
 0x390   : > { %6186 = vmatprep.mubr.bf16.mxu0 %v12116_v25 }
 0x396   : > { %5128 = vmatmul.mubr.bf16.gmra.mrb[228].mxu1 %v12121_v16 }
 0x397   : > { %6187 = vmatmul.mubr.bf16.gmra.mrb[228].mxu0 %v12121_v16  ;;  %5137 = vmatprep.mubr.bf16.mxu1 %v12126_v51 }
 0x398   : > { %6196 = vmatprep.mubr.bf16.mxu0 %v12126_v51 }
 0x39e   : > { %5138 = vmatmul.mubr.bf16.gmra.mrb[232].mxu1 %v12131_v5 }
 0x39f   : > { %6197 = vmatmul.mubr.bf16.gmra.mrb[232].mxu0 %v12131_v5  ;;  %5147 = vmatprep.mubr.bf16.mxu1 %v12136_v54 }
 0x3a0   : > { %6206 = vmatprep.mubr.bf16.mxu0 %v12136_v54 }
 0x3a6   : > { %5148 = vmatmul.mubr.bf16.gmra.mrb[236].mxu1 %v12141_v28 }
 0x3a7   : > { %6207 = vmatmul.mubr.bf16.gmra.mrb[236].mxu0 %v12141_v28  ;;  %5157 = vmatprep.mubr.bf16.mxu1 %v12146_v58 }
 0x3a8   : > { %6216 = vmatprep.mubr.bf16.mxu0 %v12146_v58 }
 0x3ae   : > { %5158 = vmatmul.mubr.bf16.gmra.mrb[240].mxu1 %v12151_v30 }
 0x3af   : > { %6217 = vmatmul.mubr.bf16.gmra.mrb[240].mxu0 %v12151_v30  ;;  %5167 = vmatprep.mubr.bf16.mxu1 %v12156_v17 }
 0x3b0   : > { %6226 = vmatprep.mubr.bf16.mxu0 %v12156_v17 }
 0x3b6   : > { %5168 = vmatmul.mubr.bf16.gmra.mrb[244].mxu1 %v12161_v21 }
 0x3b7   : > { %6227 = vmatmul.mubr.bf16.gmra.mrb[244].mxu0 %v12161_v21  ;;  %5177 = vmatprep.mubr.bf16.mxu1 %v12501_v15 }
 0x3b8   : > { %6236 = vmatprep.mubr.bf16.mxu0 %v12501_v15 }
 0x3be   : > { %5178 = vmatmul.mubr.bf16.gmra.mrb[248].mxu1 %v12506_v47 }
 0x3bf   : > { %6237 = vmatmul.mubr.bf16.gmra.mrb[248].mxu0 %v12506_v47  ;;  %5187 = vmatprep.mubr.bf16.mxu1 %v12511_v59 }
 0x3c0   : > { %6246 = vmatprep.mubr.bf16.mxu0 %v12511_v59 }
 0x3c6   : > { %5188 = vmatmul.mubr.bf16.gmra.mrb[252].mxu1 %v12516_v20 }
 0x3c7   : > { %6247 = vmatmul.mubr.bf16.gmra.mrb[252].mxu0 %v12516_v20  ;;  %5230 = vmatprep.mubr.bf16.mxu1 %v12206_v34 }
 0x3c8   : > { %6289 = vmatprep.mubr.bf16.mxu0 %v12206_v34  ;;  %v10437_v34 = vld [vmem:[%s10860_s28 + $0x90] ss:$8 sps:$4 sm:$0xff]  }
 0x3ce   : > { %5231 = vmatmul.mubr.bf16.vlgmr.msra.gmra.mrb[128].mxu1 %v12235_v11 }
 0x3cf   : > { %6290 = vmatmul.mubr.bf16.vlgmr.msra.gmra.mrb[128].mxu0 %v12235_v11  ;;  %5240 = vmatprep.mubr.bf16.mxu1 %v12240_v52  ;;  %v10438_v11 = vld [vmem:[%s10860_s28 + $0xa4] ss:$8 sps:$4 sm:$0xff]  }
 0x3d0   : > { %6299 = vmatprep.mubr.bf16.mxu0 %v12240_v52  ;;  %v10439_v52 = vld [vmem:[%s10860_s28 + $0xa0] ss:$8 sps:$4 sm:$0xff]  }
 0x3d6   : > { %5241 = vmatmul.mubr.bf16.gmra.mrb[132].mxu1 %v12269_v42 }
 0x3d7   : > { %6300 = vmatmul.mubr.bf16.gmra.mrb[132].mxu0 %v12269_v42  ;;  %5250 = vmatprep.mubr.bf16.mxu1 %v12274_v3  ;;  %v10440_v42 = vld [vmem:[%s10860_s28 + $0xb4] ss:$8 sps:$4 sm:$0xff]  }
 0x3d8   : > { %6309 = vmatprep.mubr.bf16.mxu0 %v12274_v3  ;;  %v10441_v3 = vld [vmem:[%s10860_s28 + $0xb0] ss:$8 sps:$4 sm:$0xff]  }
 0x3de   : > { %5251 = vmatmul.mubr.bf16.gmra.mrb[136].mxu1 %v12303_v57 }
 0x3df   : > { %6310 = vmatmul.mubr.bf16.gmra.mrb[136].mxu0 %v12303_v57  ;;  %5260 = vmatprep.mubr.bf16.mxu1 %v12308_v6  ;;  %v10442_v57 = vld [vmem:[%s10860_s28 + $0xc4] ss:$8 sps:$4 sm:$0xff]  }
 0x3e0   : > { %6319 = vmatprep.mubr.bf16.mxu0 %v12308_v6  ;;  %v10443_v6 = vld [vmem:[%s10860_s28 + $0xc0] ss:$8 sps:$4 sm:$0xff]  }
 0x3e6   : > { %5261 = vmatmul.mubr.bf16.gmra.mrb[140].mxu1 %v12331_v9 }
 0x3e7   : > { %6320 = vmatmul.mubr.bf16.gmra.mrb[140].mxu0 %v12331_v9  ;;  %5270 = vmatprep.mubr.bf16.mxu1 %v12336_v8  ;;  %v10444_v9 = vld [vmem:[%s10860_s28 + $0xd4] ss:$8 sps:$4 sm:$0xff]  }
 0x3e8   : > { %6329 = vmatprep.mubr.bf16.mxu0 %v12336_v8  ;;  %v10445_v8 = vld [vmem:[%s10860_s28 + $0xd0] ss:$8 sps:$4 sm:$0xff]  }
 0x3ee   : > { %5271 = vmatmul.mubr.bf16.gmra.mrb[144].mxu1 %v12341_v0 }
 0x3ef   : > { %6330 = vmatmul.mubr.bf16.gmra.mrb[144].mxu0 %v12341_v0  ;;  %5280 = vmatprep.mubr.bf16.mxu1 %v12355_v7  ;;  %v10446_v0 = vld [vmem:[%s10860_s28 + $0xe4] ss:$8 sps:$4 sm:$0xff]  }
 0x3f0   : > { %6339 = vmatprep.mubr.bf16.mxu0 %v12355_v7  ;;  %v10450_v7 = vld [vmem:[%s10860_s28 + $0x104] ss:$8 sps:$4 sm:$0xff]  }
 0x3f6   : > { %5281 = vmatmul.mubr.bf16.gmra.mrb[148].mxu1 %v10437_v34 }
 0x3f7   : > { %6340 = vmatmul.mubr.bf16.gmra.mrb[148].mxu0 %v10437_v34  ;;  %5290 = vmatprep.mubr.bf16.mxu1 %v10438_v11 }
 0x3f8   : > { %6349 = vmatprep.mubr.bf16.mxu0 %v10438_v11 }
 0x3fe   : > { %5291 = vmatmul.mubr.bf16.gmra.mrb[152].mxu1 %v10439_v52 }
 0x3ff   : > { %6350 = vmatmul.mubr.bf16.gmra.mrb[152].mxu0 %v10439_v52  ;;  %5300 = vmatprep.mubr.bf16.mxu1 %v10440_v42 }
 0x400   : > { %6359 = vmatprep.mubr.bf16.mxu0 %v10440_v42 }
 0x406   : > { %5301 = vmatmul.mubr.bf16.gmra.mrb[156].mxu1 %v10441_v3 }
 0x407   : > { %6360 = vmatmul.mubr.bf16.gmra.mrb[156].mxu0 %v10441_v3  ;;  %5310 = vmatprep.mubr.bf16.mxu1 %v10442_v57 }
 0x408   : > { %6369 = vmatprep.mubr.bf16.mxu0 %v10442_v57 }
 0x40e   : > { %5311 = vmatmul.mubr.bf16.gmra.mrb[160].mxu1 %v10443_v6 }
 0x40f   : > { %6370 = vmatmul.mubr.bf16.gmra.mrb[160].mxu0 %v10443_v6  ;;  %5320 = vmatprep.mubr.bf16.mxu1 %v10444_v9 }
 0x410   : > { %6379 = vmatprep.mubr.bf16.mxu0 %v10444_v9 }
 0x416   : > { %5321 = vmatmul.mubr.bf16.gmra.mrb[164].mxu1 %v10445_v8 }
 0x417   : > { %6380 = vmatmul.mubr.bf16.gmra.mrb[164].mxu0 %v10445_v8  ;;  %5330 = vmatprep.mubr.bf16.mxu1 %v10446_v0 }
 0x418   : > { %6389 = vmatprep.mubr.bf16.mxu0 %v10446_v0 }
 0x41e   : > { %5331 = vmatmul.mubr.bf16.gmra.mrb[168].mxu1 %v10447_v60 }
 0x41f   : > { %6390 = vmatmul.mubr.bf16.gmra.mrb[168].mxu0 %v10447_v60  ;;  %5340 = vmatprep.mubr.bf16.mxu1 %v10448_v53 }
 0x420   : > { %6399 = vmatprep.mubr.bf16.mxu0 %v10448_v53  ;;  %v10455_v53 = vld [vmem:[#allocation3 + $0x30] sm:$0xff] }
 0x426   : > { %5341 = vmatmul.mubr.bf16.gmra.mrb[172].mxu1 %v10449_v29 }
 0x427   : > { %6400 = vmatmul.mubr.bf16.gmra.mrb[172].mxu0 %v10449_v29  ;;  %5350 = vmatprep.mubr.bf16.mxu1 %v10450_v7 }
 0x428   : > { %6409 = vmatprep.mubr.bf16.mxu0 %v10450_v7 }
 0x42e   : > { %5351 = vmatmul.mubr.bf16.gmra.mrb[176].mxu1 %v10451_v24 }
 0x42f   : > { %6410 = vmatmul.mubr.bf16.gmra.mrb[176].mxu0 %v10451_v24  ;;  %5360 = vmatprep.mubr.bf16.mxu1 %v10452_v41 }
 0x430   : > { %6419 = vmatprep.mubr.bf16.mxu0 %v10452_v41  ;;  %v7084_v41 = vld [vmem:[%s13231_s2] sm:$0x3] }
 0x436   : > { %5361 = vmatmul.mubr.bf16.gmra.mrb[180].mxu1 %v12021_v19 }
 0x437   : > { %6420 = vmatmul.mubr.bf16.gmra.mrb[180].mxu0 %v12021_v19  ;;  %5370 = vmatprep.mubr.bf16.mxu1 %v12026_v39  ;;  %v7000_v19 = vlaneseq }
 0x438   : > { %6429 = vmatprep.mubr.bf16.mxu0 %v12026_v39 }
 0x439   : > { %v7001_v39 = vshrl.u32 %v7000_v19, 7 }
 0x43e   : > { %5371 = vmatmul.mubr.bf16.gmra.mrb[184].mxu1 %v12031_v35 }
 0x43f   : > { %6430 = vmatmul.mubr.bf16.gmra.mrb[184].mxu0 %v12031_v35  ;;  %5380 = vmatprep.mubr.bf16.mxu1 %v12036_v27 }
 0x440   : > { %6439 = vmatprep.mubr.bf16.mxu0 %v12036_v27 }
 0x446   : > { %5381 = vmatmul.mubr.bf16.gmra.mrb[188].mxu1 %v12041_v23 }
 0x447   : > { %6440 = vmatmul.mubr.bf16.gmra.mrb[188].mxu0 %v12041_v23  ;;  %5390 = vmatprep.mubr.bf16.mxu1 %v12046_v22  ;;  %v12614_v23 = vsub.s32 0, %v7001_v39 }
 0x448   : > { %6449 = vmatprep.mubr.bf16.mxu0 %v12046_v22 }
 0x44e   : > { %5391 = vmatmul.mubr.bf16.gmra.mrb[192].mxu1 %v12051_v40 }
 0x44f   : > { %6450 = vmatmul.mubr.bf16.gmra.mrb[192].mxu0 %v12051_v40  ;;  %5400 = vmatprep.mubr.bf16.mxu1 %v12056_v49 }
 0x450   : > { %6459 = vmatprep.mubr.bf16.mxu0 %v12056_v49  ;;  %v6994_v49 = vld [vmem:[%s13231_s2] sm:$0x3] }
 0x456   : > { %5401 = vmatmul.mubr.bf16.gmra.mrb[196].mxu1 %v12061_v61 }
 0x457   : > { %6460 = vmatmul.mubr.bf16.gmra.mrb[196].mxu0 %v12061_v61  ;;  %5410 = vmatprep.mubr.bf16.mxu1 %v12066_v63 }
 0x458   : > { %6469 = vmatprep.mubr.bf16.mxu0 %v12066_v63 }
 0x45e   : > { %5411 = vmatmul.mubr.bf16.gmra.mrb[200].mxu1 %v12071_v13 }
 0x45f   : > { %6470 = vmatmul.mubr.bf16.gmra.mrb[200].mxu0 %v12071_v13  ;;  %5420 = vmatprep.mubr.bf16.mxu1 %v12076_v2  ;;  %v12623_v13 = vsub.s32 1, %v7001_v39 }
 0x460   : > { %6479 = vmatprep.mubr.bf16.mxu0 %v12076_v2 }
 0x466   : > { %5421 = vmatmul.mubr.bf16.gmra.mrb[204].mxu1 %v12081_v38 }
 0x467   : > { %6480 = vmatmul.mubr.bf16.gmra.mrb[204].mxu0 %v12081_v38  ;;  %5430 = vmatprep.mubr.bf16.mxu1 %v12086_v4 }
 0x468   : > { %6489 = vmatprep.mubr.bf16.mxu0 %v12086_v4  ;;  %v7003_v4 = vrot.slane %v6994_v49, %v12614_v23 }
 0x46e   : > { %5431 = vmatmul.mubr.bf16.gmra.mrb[208].mxu1 %v12091_v32 }
 0x46f   : > { %6490 = vmatmul.mubr.bf16.gmra.mrb[208].mxu0 %v12091_v32  ;;  %5440 = vmatprep.mubr.bf16.mxu1 %v12096_v18  ;;  %v12635_v32 = vrot.slane %v6994_v49, %v12623_v13 }
 0x470   : > { %6499 = vmatprep.mubr.bf16.mxu0 %v12096_v18 }
 0x471   : > { %v7011_v1 = vadd.f32 %v10454_v45, %v12635_v32 }
 0x476   : > { %5441 = vmatmul.mubr.bf16.gmra.mrb[212].mxu1 %v12101_v44 }
 0x477   : > { %6500 = vmatmul.mubr.bf16.gmra.mrb[212].mxu0 %v12101_v44  ;;  %5450 = vmatprep.mubr.bf16.mxu1 %v12106_v46 }
 0x478   : > { %6509 = vmatprep.mubr.bf16.mxu0 %v12106_v46 }
 0x47e   : > { %5451 = vmatmul.mubr.bf16.gmra.mrb[216].mxu1 %v12111_v36 }
 0x47f   : > { %6510 = vmatmul.mubr.bf16.gmra.mrb[216].mxu0 %v12111_v36  ;;  %5460 = vmatprep.mubr.bf16.mxu1 %v12116_v25 }
 0x480   : > { %6519 = vmatprep.mubr.bf16.mxu0 %v12116_v25 }
 0x486   : > { %5461 = vmatmul.mubr.bf16.gmra.mrb[220].mxu1 %v12121_v16 }
 0x487   : > { %6520 = vmatmul.mubr.bf16.gmra.mrb[220].mxu0 %v12121_v16  ;;  %5470 = vmatprep.mubr.bf16.mxu1 %v12126_v51  ;;  %v10453_v16 = vld [vmem:[#allocation3] sm:$0xff] }
 0x488   : > { %6529 = vmatprep.mubr.bf16.mxu0 %v12126_v51  ;;  %v7010_v51 = vadd.f32 %v10453_v16, %v7003_v4 }
 0x48e   : > { %5471 = vmatmul.mubr.bf16.gmra.mrb[224].mxu1 %v12131_v5 }
 0x48f   : > { %6530 = vmatmul.mubr.bf16.gmra.mrb[224].mxu0 %v12131_v5  ;;  %5480 = vmatprep.mubr.bf16.mxu1 %v12136_v54 }
 0x490   : > { %6539 = vmatprep.mubr.bf16.mxu0 %v12136_v54 }
 0x496   : > { %5481 = vmatmul.mubr.bf16.gmra.mrb[228].mxu1 %v12141_v28 }
 0x497   : > { %6540 = vmatmul.mubr.bf16.gmra.mrb[228].mxu0 %v12141_v28  ;;  %5490 = vmatprep.mubr.bf16.mxu1 %v12146_v58 }
 0x498   : > { %6549 = vmatprep.mubr.bf16.mxu0 %v12146_v58 }
 0x49e   : > { %5491 = vmatmul.mubr.bf16.gmra.mrb[232].mxu1 %v12151_v30 }
 0x49f   : > { %6550 = vmatmul.mubr.bf16.gmra.mrb[232].mxu0 %v12151_v30  ;;  %5500 = vmatprep.mubr.bf16.mxu1 %v12156_v17 }
 0x4a0   : > { %6559 = vmatprep.mubr.bf16.mxu0 %v12156_v17 }
 0x4a1   : > { %v5232_v35 = vpop.f32.mrb[128].mxu1 }
 0x4a2   : > { %v6291_v27 = vpop.f32.mrb[128].mxu0  ;;  %6612 = vst [vmem:[#allocation3 + $0x10] sm:$0xff] %v5232_v35  ;;  %v5234_v22 = vpop.f32.mrb[129].mxu1 }
 0x4a3   : > { %6614 = vst [vmem:[#allocation3 + $0x20] sm:$0xff] %v6291_v27  ;;  %v6293_v40 = vpop.f32.mrb[129].mxu0  ;;  %6613 = vst [vmem:[#allocation3 + $0x18] sm:$0xff] %v5234_v22  ;;  %v12619_v61 = vpop.f32.mrb[130].mxu1 }
 0x4a4   : > { %6615 = vst [vmem:[#allocation3 + $0x28] sm:$0xff] %v6293_v40  ;;  %v12621_v63 = vpop.f32.mrb[130].mxu0  ;;  %v12625_v2 = vpop.f32.mrb[131].mxu1  ;;  %v7028_v18 = vrot.slane %v12619_v61, 1  ;;  %v10456_v40 = vld [vmem:[#allocation3 + $0x38] sm:$0xff] }
 0x4a5   : > { %v12627_v38 = vpop.f32.mrb[131].mxu0  ;;  %v7059_v50 = vrot.slane %v12621_v63, 2  ;;  %v7013_v49 = vadd.f32 %v10456_v40, %v12635_v32  ;;  %v12683_v32 = vrot.slane %v7084_v41, %v12623_v13 }
 0x4a6   : > { %5501 = vmatmul.mubr.bf16.gmra.mrb[236].mxu1 %v12161_v21  ;;  %v7062_v56 = vrot.slane %v12627_v38, 2 }
 0x4a7   : > { %6560 = vmatmul.mubr.bf16.gmra.mrb[236].mxu0 %v12161_v21  ;;  %5510 = vmatprep.mubr.bf16.mxu1 %v12501_v15  ;;  %v7031_v21 = vrot.slane %v12625_v2, 1 }
 0x4a8   : > { %6569 = vmatprep.mubr.bf16.mxu0 %v12501_v15 }
 0x4a9   : > { %v7014_v44 = vld [vmem:[#allocation3 + $0x10] sm:$0xfe]  ;;  %v5242_v36 = vpop.f32.mrb[132].mxu1 }
 0x4aa   : > { %v7045_v46 = vld [vmem:[#allocation3 + $0x20] sm:$0xfc]  ;;  %v6301_v25 = vpop.f32.mrb[132].mxu0  ;;  %v7027_v5 = vrot.slane %v7014_v44, 1  ;;  %v7015_v28 = vld [vmem:[#allocation3 + $0x18] sm:$0xfe] }
 0x4ab   : > { %v7058_v54 = vrot.slane %v7045_v46, 2  ;;  %v7046_v58 = vld [vmem:[#allocation3 + $0x28] sm:$0xfc]  ;;  %6624 = vst [vmem:[#allocation3 + $0x70] sm:$0xff] %v5242_v36  ;;  %6626 = vst [vmem:[#allocation3 + $0x80] sm:$0xff] %v6301_v25  ;;  %v7030_v30 = vrot.slane %v7015_v28, 1 }
 0x4ac   : > { %v7061_v17 = vrot.slane %v7046_v58, 2  ;;  %v5244_v48 = vpop.f32.mrb[133].mxu1  ;;  %v6303_v55 = vpop.f32.mrb[133].mxu0  ;;  %v7029_v14 = vsel %vm7026_vm0, %v7027_v5, %v7028_v18  ;;  %v10457_v46 = vld [vmem:[%s10860_s28 + $0x224] ss:$8 sps:$4 sm:$0xff]  }
 0x4ad   : > { %6625 = vst [vmem:[#allocation3 + $0x78] sm:$0xff] %v5244_v48  ;;  %6627 = vst [vmem:[#allocation3 + $0x88] sm:$0xff] %v6303_v55  ;;  %v5246_v31 = vpop.f32.mrb[134].mxu1  ;;  %v6305_v43 = vpop.f32.mrb[134].mxu0  ;;  %v7041_v33 = vadd.f32 %v7029_v14, %v7010_v51  ;;  %v7032_v26 = vsel %vm7026_vm0, %v7030_v30, %v7031_v21  ;;  %v7060_v10 = vsel %vm7057_vm1, %v7058_v54, %v7059_v50  ;;  %v10458_v48 = vld [vmem:[#allocation3 + $0xc0] sm:$0xff] }
 0x4ae   : > { %v5248_v62 = vpop.f32.mrb[135].mxu1  ;;  %v6307_v37 = vpop.f32.mrb[135].mxu0  ;;  %v7042_v12 = vadd.f32 %v7032_v26, %v7011_v1  ;;  %5511 = vmatmul.mubr.bf16.gmra.mrb[240].mxu1 %v12506_v47  ;;  %v7063_v34 = vsel %vm7057_vm1, %v7061_v17, %v7062_v56  ;;  %v10459_v43 = vld [vmem:[#allocation3 + $0xc8] sm:$0xff] }
 0x4af   : > { %6570 = vmatmul.mubr.bf16.gmra.mrb[240].mxu0 %v12506_v47  ;;  %v7072_v15 = vadd.f32 %v7060_v10, %v7041_v33  ;;  %5520 = vmatprep.mubr.bf16.mxu1 %v12511_v59  ;;  %v7012_v47 = vadd.f32 %v10455_v53, %v7003_v4  ;;  %v12679_v4 = vrot.slane %v7084_v41, %v12614_v23 }
 0x4b0   : > { %6579 = vmatprep.mubr.bf16.mxu0 %v12511_v59  ;;  %v7073_v11 = vadd.f32 %v7063_v34, %v7042_v12  ;;  %v7101_v33 = vadd.f32 %v10459_v43, %v12683_v32 }
 0x4b1   : > { %v7076_v52 = vmax.f32 %v7072_v15, 0.0  ;;  %v5252_v57 = vpop.f32.mrb[136].mxu1  ;;  %v7100_v55 = vadd.f32 %v10458_v48, %v12679_v4 }
 0x4b2   : > { %v7018_v42 = vld [vmem:[#allocation3 + $0x70] sm:$0x1]  ;;  %v7049_v3 = vld [vmem:[#allocation3 + $0x80] sm:$0x3]  ;;  %v7077_v6 = vmax.f32 %v7073_v11, 0.0  ;;  %6636 = vst [vmem:[#allocation3 + $0xd0] sm:$0xff] %v5252_v57 }
 0x4b3   : > { %v7033_v9 = vrot.slane %v7018_v42, 1  ;;  %v7064_v8 = vrot.slane %v7049_v3, 2  ;;  %v6311_v0 = vpop.f32.mrb[136].mxu0  ;;  %v5254_v60 = vpop.f32.mrb[137].mxu1  ;;  %7080 = vst [vmem:[%s12655_s25] sm:$0xff] %v7076_v52  ;;  %v10460_v57 = vld [vmem:[%s10860_s28 + $0x220] ss:$8 sps:$4 sm:$0xff]  }
 0x4b4   : > { %v7019_v29 = vld [vmem:[#allocation3 + $0x78] sm:$0x1]  ;;  %v7050_v59 = vld [vmem:[#allocation3 + $0x88] sm:$0x3]  ;;  %6638 = vst [vmem:[#allocation3 + $0xe0] sm:$0xff] %v6311_v0  ;;  %6637 = vst [vmem:[#allocation3 + $0xd8] sm:$0xff] %v5254_v60 }
 0x4b5   : > { %v6313_v7 = vpop.f32.mrb[137].mxu0  ;;  %v12658_v24 = vpop.f32.mrb[138].mxu1  ;;  %7081 = vst [vmem:[%s12655_s25 + $0x8] sm:$0xff] %v7077_v6  ;;  %v7034_v19 = vsel %vm7026_vm0, %v7028_v18, %v7033_v9  ;;  %v7035_v39 = vrot.slane %v7019_v29, 1  ;;  %v7066_v35 = vrot.slane %v7050_v59, 2  ;;  %v7065_v38 = vsel %vm7057_vm1, %v7059_v50, %v7064_v8 }
 0x4b6   : > { %6639 = vst [vmem:[#allocation3 + $0xe8] sm:$0xff] %v6313_v7  ;;  %v12667_v27 = vpop.f32.mrb[138].mxu0  ;;  %v12669_v22 = vpop.f32.mrb[139].mxu1  ;;  %v7043_v63 = vadd.f32 %v7034_v19, %v7012_v47  ;;  %5521 = vmatmul.mubr.bf16.gmra.mrb[244].mxu1 %v12516_v20  ;;  %v7117_v25 = vrot.slane %v12658_v24, 1  ;;  %v10461_v8 = vld [vmem:[%s10860_s28 + $0x234] ss:$8 sps:$4 sm:$0xff]  }
 0x4b7   : > { %v12672_v2 = vpop.f32.mrb[139].mxu0  ;;  %v7036_v61 = vsel %vm7026_vm0, %v7031_v21, %v7035_v39  ;;  %6580 = vmatmul.mubr.bf16.gmra.mrb[244].mxu0 %v12516_v20  ;;  %5530 = vmatprep.mubr.bf16.mxu1 %v10457_v46  ;;  %v7067_v36 = vsel %vm7057_vm1, %v7062_v56, %v7066_v35  ;;  %v7120_v20 = vrot.slane %v12669_v22, 1  ;;  %v7147_v62 = vrot.slane %v12667_v27, 2  ;;  %v10462_v35 = vld [vmem:[#allocation3 + $0xf0] sm:$0xff] }
 0x4b8   : > { %v7074_v18 = vadd.f32 %v7065_v38, %v7043_v63  ;;  %v7044_v44 = vadd.f32 %v7036_v61, %v7013_v49  ;;  %6589 = vmatprep.mubr.bf16.mxu0 %v10457_v46  ;;  %v7150_v34 = vrot.slane %v12672_v2, 2  ;;  %v7102_v27 = vadd.f32 %v10462_v35, %v12679_v4  ;;  %v10463_v38 = vld [vmem:[#allocation3 + $0xf8] sm:$0xff] }
 0x4b9   : > { %v7104_v5 = vld [vmem:[#allocation3 + $0xd0] sm:$0xfe]  ;;  %v5262_v54 = vpop.f32.mrb[140].mxu1  ;;  %v7103_v61 = vadd.f32 %v10463_v38, %v12683_v32 }
 0x4ba   : > { %v7078_v16 = vmax.f32 %v7074_v18, 0.0  ;;  %v7075_v51 = vadd.f32 %v7067_v36, %v7044_v44  ;;  %v6321_v28 = vpop.f32.mrb[140].mxu0  ;;  %v7116_v58 = vrot.slane %v7104_v5, 1  ;;  %6648 = vst [vmem:[#allocation3 + $0x130] sm:$0xff] %v5262_v54  ;;  %v5264_v21 = vpop.f32.mrb[141].mxu1 }
 0x4bb   : > { %v7134_v30 = vld [vmem:[#allocation3 + $0xe0] sm:$0xfc]  ;;  %v7105_v17 = vld [vmem:[#allocation3 + $0xd8] sm:$0xfe]  ;;  %6650 = vst [vmem:[#allocation3 + $0x140] sm:$0xff] %v6321_v28  ;;  %6649 = vst [vmem:[#allocation3 + $0x138] sm:$0xff] %v5264_v21 }
 0x4bc   : > { %7082 = vst [vmem:[%s12655_s25 + $0x10] sm:$0xff] %v7078_v16  ;;  %v7079_v45 = vmax.f32 %v7075_v51, 0.0  ;;  %v7146_v1 = vrot.slane %v7134_v30, 2  ;;  %v7119_v14 = vrot.slane %v7105_v17, 1  ;;  %v6323_v31 = vpop.f32.mrb[141].mxu0  ;;  %v7118_v56 = vsel %vm7026_vm0, %v7116_v58, %v7117_v25  ;;  %v5266_v37 = vpop.f32.mrb[142].mxu1 }
 0x4bd   : > { %v7135_v50 = vld [vmem:[#allocation3 + $0xe8] sm:$0xfc]  ;;  %6651 = vst [vmem:[#allocation3 + $0x148] sm:$0xff] %v6323_v31  ;;  %v6325_v10 = vpop.f32.mrb[142].mxu0  ;;  %v7130_v12 = vadd.f32 %v7118_v56, %v7100_v55  ;;  %v5268_v11 = vpop.f32.mrb[143].mxu1 }
 0x4be   : > { %v7149_v26 = vrot.slane %v7135_v50, 2  ;;  %7083 = vst [vmem:[%s12655_s25 + $0x18] sm:$0xff] %v7079_v45  ;;  %v7121_v15 = vsel %vm7026_vm0, %v7119_v14, %v7120_v20  ;;  %v6327_v52 = vpop.f32.mrb[143].mxu0  ;;  %v7148_v42 = vsel %vm7057_vm1, %v7146_v1, %v7147_v62  ;;  %5531 = vmatmul.mubr.bf16.gmra.mrb[248].mxu1 %v10460_v57  ;;  %v7172_v18 = vld [vmem:[%s13231_s2] sm:$0x3] }
 0x4bf   : > { %v7131_v3 = vadd.f32 %v7121_v15, %v7101_v33  ;;  %6590 = vmatmul.mubr.bf16.gmra.mrb[248].mxu0 %v10460_v57  ;;  %v7160_v6 = vadd.f32 %v7148_v42, %v7130_v12  ;;  %5540 = vmatprep.mubr.bf16.mxu1 %v10461_v8  ;;  %v7181_v28 = vrot.slane %v7172_v18, %v12614_v23  ;;  %v10466_v57 = vld [vmem:[#allocation3 + $0x188] sm:$0xff] }
 0x4c0   : > { %v7151_v9 = vsel %vm7057_vm1, %v7149_v26, %v7150_v34  ;;  %6599 = vmatprep.mubr.bf16.mxu0 %v10461_v8  ;;  %v10465_v26 = vld [vmem:[#allocation3 + $0x180] sm:$0xff] }
 0x4c1   : > { %v7161_v0 = vadd.f32 %v7151_v9, %v7131_v3  ;;  %v7164_v60 = vmax.f32 %v7160_v6, 0.0  ;;  %v7108_v53 = vld [vmem:[#allocation3 + $0x130] sm:$0x1]  ;;  %v5272_v29 = vpop.f32.mrb[144].mxu1  ;;  %v7188_v56 = vadd.f32 %v10465_v26, %v7181_v28 }
 0x4c2   : > { %v7138_v47 = vld [vmem:[#allocation3 + $0x140] sm:$0x3]  ;;  %v7122_v7 = vrot.slane %v7108_v53, 1  ;;  %v7109_v19 = vld [vmem:[#allocation3 + $0x138] sm:$0x1]  ;;  %6660 = vst [vmem:[#allocation3 + $0x190] sm:$0xff] %v5272_v29 }
 0x4c3   : > { %v7165_v59 = vmax.f32 %v7161_v0, 0.0  ;;  %v7152_v41 = vrot.slane %v7138_v47, 2  ;;  %v6331_v39 = vpop.f32.mrb[144].mxu0  ;;  %7168 = vst [vmem:[%s12655_s25 + $0x20] sm:$0xff] %v7164_v60  ;;  %v7124_v40 = vrot.slane %v7109_v19, 1  ;;  %v5274_v63 = vpop.f32.mrb[145].mxu1 }
 0x4c4   : > { %v7139_v49 = vld [vmem:[#allocation3 + $0x148] sm:$0x3]  ;;  %6662 = vst [vmem:[#allocation3 + $0x1a0] sm:$0xff] %v6331_v39  ;;  %v6333_v2 = vpop.f32.mrb[145].mxu0  ;;  %v7123_v44 = vsel %vm7026_vm0, %v7117_v25, %v7122_v7  ;;  %6661 = vst [vmem:[#allocation3 + $0x198] sm:$0xff] %v5274_v63  ;;  %v12714_v46 = vpop.f32.mrb[146].mxu1 }
 0x4c5   : > { %7169 = vst [vmem:[%s12655_s25 + $0x28] sm:$0xff] %v7165_v59  ;;  %v7154_v4 = vrot.slane %v7139_v49, 2  ;;  %6663 = vst [vmem:[#allocation3 + $0x1a8] sm:$0xff] %v6333_v2  ;;  %v12716_v36 = vpop.f32.mrb[146].mxu0  ;;  %v7132_v16 = vadd.f32 %v7123_v44, %v7102_v27  ;;  %v7125_v32 = vsel %vm7026_vm0, %v7120_v20, %v7124_v40  ;;  %v12721_v51 = vpop.f32.mrb[147].mxu1  ;;  %v7153_v24 = vsel %vm7057_vm1, %v7147_v62, %v7152_v41  ;;  %v10467_v2 = vld [vmem:[#allocation3 + $0x1b0] sm:$0xff] }
 0x4c6   : > { %v12723_v5 = vpop.f32.mrb[147].mxu0  ;;  %v7133_v54 = vadd.f32 %v7125_v32, %v7103_v61  ;;  %v10464_v25 = vld [vmem:[%s10860_s28 + $0x230] ss:$8 sps:$4 sm:$0xff]   ;;  %v7205_v22 = vrot.slane %v12714_v46, 1  ;;  %v7185_v20 = vrot.slane %v7172_v18, %v12623_v13  ;;  %v7235_v55 = vrot.slane %v12716_v36, 2  ;;  %s10585_s28 = smov [#allocation4]  }
 0x4c7   : > { %5541 = vmatmul.mubr.bf16.gmra.mrb[252].mxu1 %v10464_v25  ;;  %6600 = vmatmul.mubr.bf16.gmra.mrb[252].mxu0 %v10464_v25  ;;  %v7162_v58 = vadd.f32 %v7153_v24, %v7132_v16  ;;  %v7155_v30 = vsel %vm7057_vm1, %v7150_v34, %v7154_v4  ;;  %v7208_v52 = vrot.slane %v12721_v51, 1  ;;  %v7238_v53 = vrot.slane %v12723_v5, 2  ;;  %v10468_v16 = vld [vmem:[#allocation3 + $0x1b8] sm:$0xff]  ;;  %v7260_v51 = vld [vmem:[%s13231_s2] sm:$0x3]  ;;  %s10525_s4 = sshll.u32 %s10585_s28, 4  ;;  %s10526_s4 = int_to_ptr.vmem [resolvable:$false] %s10525_s4 }
 0x4c8   : > { %v7163_v17 = vadd.f32 %v7155_v30, %v7133_v54  ;;  %v7189_v6 = vadd.f32 %v10466_v57, %v7185_v20  ;;  %v7190_v38 = vadd.f32 %v10467_v2, %v7181_v28  ;;  %v7191_v32 = vadd.f32 %v10468_v16, %v7185_v20  ;;  %s10527_s5 = scalar_lea.vmem %s10526_s4, 16384  ;;  %p10528_p0 = scmp.lt.s32.totalorder %s13182_s24, %s10526_s4 }
 0x4c9   : > { %v7166_v21 = vmax.f32 %v7162_v58, 0.0  ;;  %v7192_v48 = vld [vmem:[#allocation3 + $0x190] sm:$0xfe]  ;;  %v5282_v45 = vpop.f32.mrb[148].mxu1  ;;  %p10529_p1 = scmp.lt.s32.totalorder %s10527_s5, %s10521_s30 }
 0x4ca   : > { %v6341_v1 = vpop.f32.mrb[148].mxu0  ;;  %v7167_v14 = vmax.f32 %v7163_v17, 0.0  ;;  %v7204_v50 = vrot.slane %v7192_v48, 1  ;;  %6672 = vst [vmem:[#allocation3 + $0x1f0] sm:$0xff] %v5282_v45  ;;  %v5284_v43 = vpop.f32.mrb[149].mxu1 }
 0x4cb   : > { %v7222_v31 = vld [vmem:[#allocation3 + $0x1a0] sm:$0xfc]  ;;  %6674 = vst [vmem:[#allocation3 + $0x200] sm:$0xff] %v6341_v1  ;;  %v6343_v33 = vpop.f32.mrb[149].mxu0  ;;  %7170 = vst [vmem:[%s12655_s25 + $0x30] sm:$0xff] %v7166_v21  ;;  %v5286_v12 = vpop.f32.mrb[150].mxu1  ;;  %v7269_v21 = vrot.slane %v7260_v51, %v12614_v23  ;;  %p10530_p2 = por %p10529_p1, %p10528_p0 }
 0x4cc   : > { %v7234_v62 = vrot.slane %v7222_v31, 2  ;;  %v7193_v37 = vld [vmem:[#allocation3 + $0x198] sm:$0xfe]  ;;  %v7223_v10 = vld [vmem:[#allocation3 + $0x1a8] sm:$0xfc]  ;;  %6673 = vst [vmem:[#allocation3 + $0x1f8] sm:$0xff] %v5284_v43  ;;  %v7206_v11 = vsel %vm7026_vm0, %v7204_v50, %v7205_v22 }
 0x4cd   : > { %6675 = vst [vmem:[#allocation3 + $0x208] sm:$0xff] %v6343_v33  ;;  %7171 = vst [vmem:[%s12655_s25 + $0x38] sm:$0xff] %v7167_v14  ;;  %v7207_v15 = vrot.slane %v7193_v37, 1  ;;  %v7237_v34 = vrot.slane %v7223_v10, 2  ;;  %v6345_v42 = vpop.f32.mrb[150].mxu0  ;;  %v5288_v3 = vpop.f32.mrb[151].mxu1  ;;  %v7218_v9 = vadd.f32 %v7206_v11, %v7188_v56  ;;  %v7273_v14 = vrot.slane %v7260_v51, %v12623_v13  ;;  %p10531_p3 = pnand %p10530_p2, %p10524_p13 }
 0x4ce   : > { %v6347_v8 = vpop.f32.mrb[151].mxu0  ;;  %v7236_v0 = vsel %vm7057_vm1, %v7234_v62, %v7235_v55  ;;  %v10469_v12 = vld [vmem:[#allocation3 + $0x240] sm:$0xff] }
 0x4cf   : > { %v7209_v60 = vsel %vm7026_vm0, %v7207_v15, %v7208_v52  ;;  %v7248_v47 = vadd.f32 %v7236_v0, %v7218_v9  ;;  %v7239_v59 = vsel %vm7057_vm1, %v7237_v34, %v7238_v53  ;;  %v7276_v15 = vadd.f32 %v10469_v12, %v7269_v21 }
 0x4d0   : > { %v7219_v29 = vadd.f32 %v7209_v60, %v7189_v6  ;;  %v10470_v60 = vld [vmem:[#allocation3 + $0x248] sm:$0xff] }
 0x4d1   : > { %v7252_v7 = vmax.f32 %v7248_v47, 0.0  ;;  %v7196_v19 = vld [vmem:[#allocation3 + $0x1f0] sm:$0x1]  ;;  %v5292_v35 = vpop.f32.mrb[152].mxu1 }
 0x4d2   : > { %v7249_v41 = vadd.f32 %v7239_v59, %v7219_v29  ;;  %v7226_v39 = vld [vmem:[#allocation3 + $0x200] sm:$0x3]  ;;  %v7210_v27 = vrot.slane %v7196_v19, 1  ;;  %6684 = vst [vmem:[#allocation3 + $0x250] sm:$0xff] %v5292_v35  ;;  %v6351_v4 = vpop.f32.mrb[152].mxu0  ;;  %v5294_v46 = vpop.f32.mrb[153].mxu1 }
 0x4d3   : > { %v7240_v40 = vrot.slane %v7226_v39, 2  ;;  %v7197_v49 = vld [vmem:[#allocation3 + $0x1f8] sm:$0x1]  ;;  %7256 = vst [vmem:[%s12655_s25 + $0x40] sm:$0xff] %v7252_v7  ;;  %6686 = vst [vmem:[#allocation3 + $0x260] sm:$0xff] %v6351_v4  ;;  %v6353_v24 = vpop.f32.mrb[153].mxu0 }
 0x4d4   : > { %v7227_v63 = vld [vmem:[#allocation3 + $0x208] sm:$0x3]  ;;  %v7253_v61 = vmax.f32 %v7249_v41, 0.0  ;;  %v7212_v18 = vrot.slane %v7197_v49, 1  ;;  %v7211_v5 = vsel %vm7026_vm0, %v7205_v22, %v7210_v27  ;;  %6685 = vst [vmem:[#allocation3 + $0x258] sm:$0xff] %v5294_v46  ;;  %v12747_v54 = vpop.f32.mrb[154].mxu1 }
 0x4d5   : > { %v7242_v44 = vrot.slane %v7227_v63, 2  ;;  %v7220_v25 = vadd.f32 %v7211_v5, %v7190_v38  ;;  %6687 = vst [vmem:[#allocation3 + $0x268] sm:$0xff] %v6353_v24  ;;  %v12751_v58 = vpop.f32.mrb[154].mxu0  ;;  %v12753_v30 = vpop.f32.mrb[155].mxu1  ;;  %v7241_v17 = vsel %vm7057_vm1, %v7235_v55, %v7240_v40  ;;  %v7293_v43 = vrot.slane %v12747_v54, 1  ;;  %v10471_v4 = vld [vmem:[#allocation3 + $0x270] sm:$0xff] }
 0x4d6   : > { %7257 = vst [vmem:[%s12655_s25 + $0x48] sm:$0xff] %v7253_v61  ;;  %v7213_v28 = vsel %vm7026_vm0, %v7208_v52, %v7212_v18  ;;  %v12758_v22 = vpop.f32.mrb[155].mxu0  ;;  %v7323_v56 = vrot.slane %v12751_v58, 2  ;;  %v7296_v62 = vrot.slane %v12753_v30, 1  ;;  %v7278_v46 = vadd.f32 %v10471_v4, %v7269_v21  ;;  %v10472_v54 = vld [vmem:[#allocation3 + $0x278] sm:$0xff] }
 0x4d7   : > { %v7221_v20 = vadd.f32 %v7213_v28, %v7191_v32  ;;  %v7250_v48 = vadd.f32 %v7241_v17, %v7220_v25  ;;  %v7243_v45 = vsel %vm7057_vm1, %v7238_v53, %v7242_v44  ;;  %v7277_v53 = vadd.f32 %v10470_v60, %v7273_v14  ;;  %v7348_v28 = vld [vmem:[%s13231_s2] sm:$0x3] }
 0x4d8   : > { %v7326_v41 = vrot.slane %v12758_v22, 2  ;;  %v7279_v25 = vadd.f32 %v10472_v54, %v7273_v14 }
 0x4d9   : > { %v7251_v1 = vadd.f32 %v7243_v45, %v7221_v20  ;;  %v7254_v50 = vmax.f32 %v7250_v48, 0.0  ;;  %v7280_v31 = vld [vmem:[#allocation3 + $0x250] sm:$0xfe]  ;;  %v5302_v33 = vpop.f32.mrb[156].mxu1 }
 0x4da   : > { %v6361_v36 = vpop.f32.mrb[156].mxu0  ;;  %v7292_v55 = vrot.slane %v7280_v31, 1  ;;  %6696 = vst [vmem:[#allocation3 + $0x2b0] sm:$0xff] %v5302_v33  ;;  %v5304_v37 = vpop.f32.mrb[157].mxu1  ;;  %v7310_v34 = vld [vmem:[#allocation3 + $0x260] sm:$0xfc]  ;;  %v7357_v31 = vrot.slane %v7348_v28, %v12614_v23 }
 0x4db   : > { %v7255_v26 = vmax.f32 %v7251_v1, 0.0  ;;  %6698 = vst [vmem:[#allocation3 + $0x2c0] sm:$0xff] %v6361_v36  ;;  %v6363_v10 = vpop.f32.mrb[157].mxu0  ;;  %7258 = vst [vmem:[%s12655_s25 + $0x50] sm:$0xff] %v7254_v50  ;;  %v7281_v11 = vld [vmem:[#allocation3 + $0x258] sm:$0xfe] }
 0x4dc   : > { %6697 = vst [vmem:[#allocation3 + $0x2b8] sm:$0xff] %v5304_v37  ;;  %6699 = vst [vmem:[#allocation3 + $0x2c8] sm:$0xff] %v6363_v10  ;;  %v5306_v52 = vpop.f32.mrb[158].mxu1  ;;  %v6365_v42 = vpop.f32.mrb[158].mxu0  ;;  %v7322_v3 = vrot.slane %v7310_v34, 2  ;;  %v7295_v57 = vrot.slane %v7281_v11, 1  ;;  %v7294_v9 = vsel %vm7026_vm0, %v7292_v55, %v7293_v43 }
 0x4dd   : > { %7259 = vst [vmem:[%s12655_s25 + $0x58] sm:$0xff] %v7255_v26  ;;  %v7311_v6 = vld [vmem:[#allocation3 + $0x268] sm:$0xfc]  ;;  %v5308_v8 = vpop.f32.mrb[159].mxu1  ;;  %v6367_v0 = vpop.f32.mrb[159].mxu0  ;;  %v7306_v29 = vadd.f32 %v7294_v9, %v7276_v15  ;;  %v7361_v26 = vrot.slane %v7348_v28, %v12623_v13  ;;  %v10473_v42 = vld [vmem:[#allocation3 + $0x300] sm:$0xff] }
 0x4de   : > { %v7325_v47 = vrot.slane %v7311_v6, 2  ;;  %v7324_v59 = vsel %vm7057_vm1, %v7322_v3, %v7323_v56  ;;  %v7297_v7 = vsel %vm7026_vm0, %v7295_v57, %v7296_v62  ;;  %v7364_v3 = vadd.f32 %v10473_v42, %v7357_v31 }
 0x4df   : > { %v7336_v19 = vadd.f32 %v7324_v59, %v7306_v29  ;;  %v7307_v39 = vadd.f32 %v7297_v7, %v7277_v53  ;;  %v10474_v7 = vld [vmem:[#allocation3 + $0x308] sm:$0xff] }
 0x4e0   : > { %v7327_v35 = vsel %vm7057_vm1, %v7325_v47, %v7326_v41 }
 0x4e1   : > { %v7340_v27 = vmax.f32 %v7336_v19, 0.0  ;;  %v7337_v40 = vadd.f32 %v7327_v35, %v7307_v39  ;;  %v7284_v49 = vld [vmem:[#allocation3 + $0x2b0] sm:$0x1]  ;;  %v5312_v2 = vpop.f32.mrb[160].mxu1 }
 0x4e2   : > { %v7314_v63 = vld [vmem:[#allocation3 + $0x2c0] sm:$0x3]  ;;  %v7298_v38 = vrot.slane %v7284_v49, 1  ;;  %6708 = vst [vmem:[#allocation3 + $0x310] sm:$0xff] %v5312_v2  ;;  %v6371_v5 = vpop.f32.mrb[160].mxu0  ;;  %v5314_v24 = vpop.f32.mrb[161].mxu1 }
 0x4e3   : > { %v7328_v61 = vrot.slane %v7314_v63, 2  ;;  %v7285_v18 = vld [vmem:[#allocation3 + $0x2b8] sm:$0x1]  ;;  %v7315_v44 = vld [vmem:[#allocation3 + $0x2c8] sm:$0x3]  ;;  %7344 = vst [vmem:[%s12655_s25 + $0x60] sm:$0xff] %v7340_v27 }
 0x4e4   : > { %v7341_v16 = vmax.f32 %v7337_v40, 0.0  ;;  %v7300_v32 = vrot.slane %v7285_v18, 1  ;;  %v7330_v51 = vrot.slane %v7315_v44, 2  ;;  %v7299_v30 = vsel %vm7026_vm0, %v7293_v43, %v7298_v38  ;;  %6710 = vst [vmem:[#allocation3 + $0x320] sm:$0xff] %v6371_v5  ;;  %6709 = vst [vmem:[#allocation3 + $0x318] sm:$0xff] %v5314_v24  ;;  %v6373_v17 = vpop.f32.mrb[161].mxu0 }
 0x4e5   : > { %v12780_v20 = vpop.f32.mrb[162].mxu1  ;;  %v7308_v22 = vadd.f32 %v7299_v30, %v7278_v46  ;;  %6711 = vst [vmem:[#allocation3 + $0x328] sm:$0xff] %v6373_v17  ;;  %v12784_v48 = vpop.f32.mrb[162].mxu0  ;;  %v7329_v1 = vsel %vm7057_vm1, %v7323_v56, %v7328_v61  ;;  %v10475_v5 = vld [vmem:[#allocation3 + $0x330] sm:$0xff] }
 0x4e6   : > { %7345 = vst [vmem:[%s12655_s25 + $0x68] sm:$0xff] %v7341_v16  ;;  %v7301_v21 = vsel %vm7026_vm0, %v7296_v62, %v7300_v32  ;;  %v12786_v45 = vpop.f32.mrb[163].mxu1  ;;  %v12791_v50 = vpop.f32.mrb[163].mxu0  ;;  %v7331_v33 = vsel %vm7057_vm1, %v7326_v41, %v7330_v51  ;;  %v7381_v37 = vrot.slane %v12780_v20, 1  ;;  %v7411_v15 = vrot.slane %v12784_v48, 2  ;;  %v10476_v20 = vld [vmem:[#allocation3 + $0x338] sm:$0xff] }
 0x4e7   : > { %v7309_v14 = vadd.f32 %v7301_v21, %v7279_v25  ;;  %v7338_v43 = vadd.f32 %v7329_v1, %v7308_v22  ;;  %v7384_v34 = vrot.slane %v12786_v45, 1  ;;  %v7365_v41 = vadd.f32 %v10474_v7, %v7361_v26  ;;  %v7436_v21 = vld [vmem:[%s13231_s2] sm:$0x3] }
 0x4e8   : > { %v7414_v40 = vrot.slane %v12791_v50, 2  ;;  %v7366_v24 = vadd.f32 %v10475_v5, %v7357_v31  ;;  %v7367_v22 = vadd.f32 %v10476_v20, %v7361_v26 }
 0x4e9   : > { %v7339_v36 = vadd.f32 %v7331_v33, %v7309_v14  ;;  %v7342_v55 = vmax.f32 %v7338_v43, 0.0  ;;  %v7368_v62 = vld [vmem:[#allocation3 + $0x310] sm:$0xfe]  ;;  %v5322_v10 = vpop.f32.mrb[164].mxu1 }
 0x4ea   : > { %v6381_v58 = vpop.f32.mrb[164].mxu0  ;;  %v7380_v56 = vrot.slane %v7368_v62, 1  ;;  %6720 = vst [vmem:[#allocation3 + $0x370] sm:$0xff] %v5322_v10  ;;  %v5324_v11 = vpop.f32.mrb[165].mxu1  ;;  %v7445_v62 = vrot.slane %v7436_v21, %v12614_v23 }
 0x4eb   : > { %v7343_v12 = vmax.f32 %v7339_v36, 0.0  ;;  %6722 = vst [vmem:[#allocation3 + $0x380] sm:$0xff] %v6381_v58  ;;  %v6383_v52 = vpop.f32.mrb[165].mxu0  ;;  %7346 = vst [vmem:[%s12655_s25 + $0x70] sm:$0xff] %v7342_v55  ;;  %v7398_v57 = vld [vmem:[#allocation3 + $0x320] sm:$0xfc] }
 0x4ec   : > { %v7369_v6 = vld [vmem:[#allocation3 + $0x318] sm:$0xfe]  ;;  %6721 = vst [vmem:[#allocation3 + $0x378] sm:$0xff] %v5324_v11  ;;  %6723 = vst [vmem:[#allocation3 + $0x388] sm:$0xff] %v6383_v52  ;;  %v5326_v9 = vpop.f32.mrb[166].mxu1  ;;  %v6385_v8 = vpop.f32.mrb[166].mxu0  ;;  %v7382_v47 = vsel %vm7026_vm0, %v7380_v56, %v7381_v37 }
 0x4ed   : > { %7347 = vst [vmem:[%s12655_s25 + $0x78] sm:$0xff] %v7343_v12  ;;  %v7410_v0 = vrot.slane %v7398_v57, 2  ;;  %v7383_v60 = vrot.slane %v7369_v6, 1  ;;  %v7399_v53 = vld [vmem:[#allocation3 + $0x328] sm:$0xfc]  ;;  %v5328_v29 = vpop.f32.mrb[167].mxu1  ;;  %v7394_v39 = vadd.f32 %v7382_v47, %v7364_v3  ;;  %v7449_v12 = vrot.slane %v7436_v21, %v12623_v13 }
 0x4ee   : > { %v6387_v59 = vpop.f32.mrb[167].mxu0  ;;  %v7413_v19 = vrot.slane %v7399_v53, 2  ;;  %v10477_v8 = vld [vmem:[#allocation3 + $0x3c0] sm:$0xff] }
 0x4ef   : > { %v7412_v35 = vsel %vm7057_vm1, %v7410_v0, %v7411_v15  ;;  %v7385_v27 = vsel %vm7026_vm0, %v7383_v60, %v7384_v34  ;;  %v7452_v0 = vadd.f32 %v10477_v8, %v7445_v62 }
 0x4f0   : > { %v7424_v49 = vadd.f32 %v7412_v35, %v7394_v39  ;;  %v7395_v63 = vadd.f32 %v7385_v27, %v7365_v41  ;;  %v7415_v2 = vsel %vm7057_vm1, %v7413_v19, %v7414_v40  ;;  %v10478_v27 = vld [vmem:[#allocation3 + $0x3c8] sm:$0xff] }
 0x4f1   : > { %v7372_v18 = vld [vmem:[#allocation3 + $0x370] sm:$0x1]  ;;  %v5332_v4 = vpop.f32.mrb[168].mxu1 }
 0x4f2   : > { %v7428_v38 = vmax.f32 %v7424_v49, 0.0  ;;  %v7425_v61 = vadd.f32 %v7415_v2, %v7395_v63  ;;  %v7402_v44 = vld [vmem:[#allocation3 + $0x380] sm:$0x3]  ;;  %v7386_v46 = vrot.slane %v7372_v18, 1  ;;  %6732 = vst [vmem:[#allocation3 + $0x3d0] sm:$0xff] %v5332_v4  ;;  %v6391_v30 = vpop.f32.mrb[168].mxu0 }
 0x4f3   : > { %v7416_v16 = vrot.slane %v7402_v44, 2  ;;  %v7373_v32 = vld [vmem:[#allocation3 + $0x378] sm:$0x1]  ;;  %v7403_v51 = vld [vmem:[#allocation3 + $0x388] sm:$0x3]  ;;  %v5334_v17 = vpop.f32.mrb[169].mxu1 }
 0x4f4   : > { %7432 = vst [vmem:[%s12655_s25 + $0x80] sm:$0xff] %v7428_v38  ;;  %v7429_v54 = vmax.f32 %v7425_v61, 0.0  ;;  %v7388_v25 = vrot.slane %v7373_v32, 1  ;;  %v7418_v28 = vrot.slane %v7403_v51, 2  ;;  %v7387_v45 = vsel %vm7026_vm0, %v7381_v37, %v7386_v46  ;;  %6734 = vst [vmem:[#allocation3 + $0x3e0] sm:$0xff] %v6391_v30  ;;  %v6393_v1 = vpop.f32.mrb[169].mxu0 }
 0x4f5   : > { %6733 = vst [vmem:[#allocation3 + $0x3d8] sm:$0xff] %v5334_v17  ;;  %v12813_v14 = vpop.f32.mrb[170].mxu1  ;;  %v7396_v50 = vadd.f32 %v7387_v45, %v7366_v24  ;;  %6735 = vst [vmem:[#allocation3 + $0x3e8] sm:$0xff] %v6393_v1  ;;  %v12817_v43 = vpop.f32.mrb[170].mxu0  ;;  %v7417_v36 = vsel %vm7057_vm1, %v7411_v15, %v7416_v16  ;;  %v10479_v30 = vld [vmem:[#allocation3 + $0x3f0] sm:$0xff] }
 0x4f6   : > { %7433 = vst [vmem:[%s12655_s25 + $0x88] sm:$0xff] %v7429_v54  ;;  %v7389_v31 = vsel %vm7026_vm0, %v7384_v34, %v7388_v25  ;;  %v12819_v33 = vpop.f32.mrb[171].mxu1  ;;  %v12824_v55 = vpop.f32.mrb[171].mxu0  ;;  %v7419_v10 = vsel %vm7057_vm1, %v7414_v40, %v7418_v28  ;;  %v7469_v11 = vrot.slane %v12813_v14, 1  ;;  %v7499_v3 = vrot.slane %v12817_v43, 2  ;;  %v10480_v14 = vld [vmem:[#allocation3 + $0x3f8] sm:$0xff] }
 0x4f7   : > { %v7397_v26 = vadd.f32 %v7389_v31, %v7367_v22  ;;  %v7426_v37 = vadd.f32 %v7417_v36, %v7396_v50  ;;  %v7472_v57 = vrot.slane %v12819_v33, 1  ;;  %v7453_v40 = vadd.f32 %v10478_v27, %v7449_v12  ;;  %v7524_v31 = vld [vmem:[%s13231_s2] sm:$0x3] }
 0x4f8   : > { %v7502_v61 = vrot.slane %v12824_v55, 2  ;;  %v7454_v17 = vadd.f32 %v10479_v30, %v7445_v62  ;;  %v7455_v50 = vadd.f32 %v10480_v14, %v7449_v12 }
 0x4f9   : > { %v7427_v58 = vadd.f32 %v7419_v10, %v7397_v26  ;;  %v7430_v56 = vmax.f32 %v7426_v37, 0.0  ;;  %v7456_v34 = vld [vmem:[#allocation3 + $0x3d0] sm:$0xfe]  ;;  %v5342_v52 = vpop.f32.mrb[172].mxu1 }
 0x4fa   : > { %v6401_v48 = vpop.f32.mrb[172].mxu0  ;;  %v7468_v15 = vrot.slane %v7456_v34, 1  ;;  %6744 = vst [vmem:[#allocation3 + $0x430] sm:$0xff] %v5342_v52  ;;  %v5344_v6 = vpop.f32.mrb[173].mxu1  ;;  %v7533_v34 = vrot.slane %v7524_v31, %v12614_v23 }
 0x4fb   : > { %v7431_v42 = vmax.f32 %v7427_v58, 0.0  ;;  %6746 = vst [vmem:[#allocation3 + $0x440] sm:$0xff] %v6401_v48  ;;  %v6403_v9 = vpop.f32.mrb[173].mxu0  ;;  %7434 = vst [vmem:[%s12655_s25 + $0x90] sm:$0xff] %v7430_v56  ;;  %v7486_v60 = vld [vmem:[#allocation3 + $0x3e0] sm:$0xfc] }
 0x4fc   : > { %v7457_v53 = vld [vmem:[#allocation3 + $0x3d8] sm:$0xfe]  ;;  %6745 = vst [vmem:[#allocation3 + $0x438] sm:$0xff] %v5344_v6  ;;  %6747 = vst [vmem:[#allocation3 + $0x448] sm:$0xff] %v6403_v9  ;;  %v5346_v47 = vpop.f32.mrb[174].mxu1  ;;  %v6405_v29 = vpop.f32.mrb[174].mxu0  ;;  %v7470_v19 = vsel %vm7026_vm0, %v7468_v15, %v7469_v11 }
 0x4fd   : > { %7435 = vst [vmem:[%s12655_s25 + $0x98] sm:$0xff] %v7431_v42  ;;  %v7498_v59 = vrot.slane %v7486_v60, 2  ;;  %v7471_v7 = vrot.slane %v7457_v53, 1  ;;  %v7487_v41 = vld [vmem:[#allocation3 + $0x3e8] sm:$0xfc]  ;;  %v5348_v39 = vpop.f32.mrb[175].mxu1  ;;  %v7482_v63 = vadd.f32 %v7470_v19, %v7452_v0  ;;  %v7537_v42 = vrot.slane %v7524_v31, %v12623_v13 }
 0x4fe   : > { %v6407_v35 = vpop.f32.mrb[175].mxu0  ;;  %v7501_v49 = vrot.slane %v7487_v41, 2  ;;  %v10481_v29 = vld [vmem:[#allocation3 + $0x480] sm:$0xff] }
 0x4ff   : > { %v7500_v2 = vsel %vm7057_vm1, %v7498_v59, %v7499_v3  ;;  %v7473_v38 = vsel %vm7026_vm0, %v7471_v7, %v7472_v57  ;;  %v7540_v59 = vadd.f32 %v10481_v29, %v7533_v34 }
 0x500   : > { %v7512_v18 = vadd.f32 %v7500_v2, %v7482_v63  ;;  %v7483_v44 = vadd.f32 %v7473_v38, %v7453_v40  ;;  %v7503_v4 = vsel %vm7057_vm1, %v7501_v49, %v7502_v61  ;;  %v10482_v38 = vld [vmem:[#allocation3 + $0x488] sm:$0xff] }
 0x501   : > { %v7460_v32 = vld [vmem:[#allocation3 + $0x430] sm:$0x1]  ;;  %v5352_v5 = vpop.f32.mrb[176].mxu1 }
 0x502   : > { %v7516_v46 = vmax.f32 %v7512_v18, 0.0  ;;  %v7513_v16 = vadd.f32 %v7503_v4, %v7483_v44  ;;  %v7490_v51 = vld [vmem:[#allocation3 + $0x440] sm:$0x3]  ;;  %v7474_v24 = vrot.slane %v7460_v32, 1  ;;  %6756 = vst [vmem:[#allocation3 + $0x490] sm:$0xff] %v5352_v5  ;;  %v6411_v45 = vpop.f32.mrb[176].mxu0 }
 0x503   : > { %v7504_v54 = vrot.slane %v7490_v51, 2  ;;  %v7461_v25 = vld [vmem:[#allocation3 + $0x438] sm:$0x1]  ;;  %v7491_v28 = vld [vmem:[#allocation3 + $0x448] sm:$0x3]  ;;  %v5354_v1 = vpop.f32.mrb[177].mxu1 }
 0x504   : > { %7520 = vst [vmem:[%s12655_s25 + $0xa0] sm:$0xff] %v7516_v46  ;;  %v7517_v20 = vmax.f32 %v7513_v16, 0.0  ;;  %v7476_v22 = vrot.slane %v7461_v25, 1  ;;  %v7506_v21 = vrot.slane %v7491_v28, 2  ;;  %v7475_v33 = vsel %vm7026_vm0, %v7469_v11, %v7474_v24  ;;  %6758 = vst [vmem:[#allocation3 + $0x4a0] sm:$0xff] %v6411_v45  ;;  %v6413_v36 = vpop.f32.mrb[177].mxu0 }
 0x505   : > { %6757 = vst [vmem:[#allocation3 + $0x498] sm:$0xff] %v5354_v1  ;;  %v12846_v26 = vpop.f32.mrb[178].mxu1  ;;  %v7484_v55 = vadd.f32 %v7475_v33, %v7454_v17  ;;  %6759 = vst [vmem:[#allocation3 + $0x4a8] sm:$0xff] %v6413_v36  ;;  %v12850_v37 = vpop.f32.mrb[178].mxu0  ;;  %v7505_v58 = vsel %vm7057_vm1, %v7499_v3, %v7504_v54  ;;  %v10483_v45 = vld [vmem:[#allocation3 + $0x4b0] sm:$0xff] }
 0x506   : > { %7521 = vst [vmem:[%s12655_s25 + $0xa8] sm:$0xff] %v7517_v20  ;;  %v7477_v62 = vsel %vm7026_vm0, %v7472_v57, %v7476_v22  ;;  %v12852_v10 = vpop.f32.mrb[179].mxu1  ;;  %v12857_v56 = vpop.f32.mrb[179].mxu0  ;;  %v7507_v52 = vsel %vm7057_vm1, %v7502_v61, %v7506_v21  ;;  %v7557_v6 = vrot.slane %v12846_v26, 1  ;;  %v7587_v0 = vrot.slane %v12850_v37, 2  ;;  %v10484_v26 = vld [vmem:[#allocation3 + $0x4b8] sm:$0xff] }
 0x507   : > { %v7485_v12 = vadd.f32 %v7477_v62, %v7455_v50  ;;  %v7514_v11 = vadd.f32 %v7505_v58, %v7484_v55  ;;  %v7560_v60 = vrot.slane %v12852_v10, 1  ;;  %v7541_v61 = vadd.f32 %v10482_v38, %v7537_v42  ;;  %v7612_v62 = vld [vmem:[%s13231_s2] sm:$0x3] }
 0x508   : > { %v7590_v16 = vrot.slane %v12857_v56, 2  ;;  %v7542_v1 = vadd.f32 %v10483_v45, %v7533_v34  ;;  %v7543_v55 = vadd.f32 %v10484_v26, %v7537_v42 }
 0x509   : > { %v7515_v48 = vadd.f32 %v7507_v52, %v7485_v12  ;;  %v7518_v15 = vmax.f32 %v7514_v11, 0.0  ;;  %v7544_v57 = vld [vmem:[#allocation3 + $0x490] sm:$0xfe]  ;;  %v5362_v9 = vpop.f32.mrb[180].mxu1 }
 0x50a   : > { %v6421_v43 = vpop.f32.mrb[180].mxu0  ;;  %v7556_v3 = vrot.slane %v7544_v57, 1  ;;  %6768 = vst [vmem:[#allocation3 + $0x4f0] sm:$0xff] %v5362_v9  ;;  %v5364_v53 = vpop.f32.mrb[181].mxu1  ;;  %v7621_v57 = vrot.slane %v7612_v62, %v12614_v23 }
 0x50b   : > { %v7519_v8 = vmax.f32 %v7515_v48, 0.0  ;;  %6770 = vst [vmem:[#allocation3 + $0x500] sm:$0xff] %v6421_v43  ;;  %v6423_v47 = vpop.f32.mrb[181].mxu0  ;;  %7522 = vst [vmem:[%s12655_s25 + $0xb0] sm:$0xff] %v7518_v15  ;;  %v7574_v7 = vld [vmem:[#allocation3 + $0x4a0] sm:$0xfc] }
 0x50c   : > { %v7545_v41 = vld [vmem:[#allocation3 + $0x498] sm:$0xfe]  ;;  %6769 = vst [vmem:[#allocation3 + $0x4f8] sm:$0xff] %v5364_v53  ;;  %6771 = vst [vmem:[#allocation3 + $0x508] sm:$0xff] %v6423_v47  ;;  %v5366_v19 = vpop.f32.mrb[182].mxu1  ;;  %v6425_v39 = vpop.f32.mrb[182].mxu0  ;;  %v7558_v49 = vsel %vm7026_vm0, %v7556_v3, %v7557_v6 }
 0x50d   : > { %7523 = vst [vmem:[%s12655_s25 + $0xb8] sm:$0xff] %v7519_v8  ;;  %v7586_v35 = vrot.slane %v7574_v7, 2  ;;  %v7559_v27 = vrot.slane %v7545_v41, 1  ;;  %v7575_v40 = vld [vmem:[#allocation3 + $0x4a8] sm:$0xfc]  ;;  %v5368_v63 = vpop.f32.mrb[183].mxu1  ;;  %v7570_v44 = vadd.f32 %v7558_v49, %v7540_v59  ;;  %v7625_v8 = vrot.slane %v7612_v62, %v12623_v13 }
 0x50e   : > { %v6427_v2 = vpop.f32.mrb[183].mxu0  ;;  %v7589_v18 = vrot.slane %v7575_v40, 2  ;;  %v10485_v39 = vld [vmem:[#allocation3 + $0x540] sm:$0xff] }
 0x50f   : > { %v7588_v4 = vsel %vm7057_vm1, %v7586_v35, %v7587_v0  ;;  %v7561_v46 = vsel %vm7026_vm0, %v7559_v27, %v7560_v60  ;;  %v7628_v35 = vadd.f32 %v10485_v39, %v7621_v57 }
 0x510   : > { %v7600_v32 = vadd.f32 %v7588_v4, %v7570_v44  ;;  %v7571_v51 = vadd.f32 %v7561_v46, %v7541_v61  ;;  %v7591_v5 = vsel %vm7057_vm1, %v7589_v18, %v7590_v16  ;;  %v10486_v46 = vld [vmem:[#allocation3 + $0x548] sm:$0xff] }
 0x511   : > { %v7548_v25 = vld [vmem:[#allocation3 + $0x4f0] sm:$0x1]  ;;  %v5372_v30 = vpop.f32.mrb[184].mxu1 }
 0x512   : > { %v7604_v24 = vmax.f32 %v7600_v32, 0.0  ;;  %v7601_v54 = vadd.f32 %v7591_v5, %v7571_v51  ;;  %v7578_v28 = vld [vmem:[#allocation3 + $0x500] sm:$0x3]  ;;  %v7562_v17 = vrot.slane %v7548_v25, 1  ;;  %6780 = vst [vmem:[#allocation3 + $0x550] sm:$0xff] %v5372_v30  ;;  %v6431_v33 = vpop.f32.mrb[184].mxu0 }
 0x513   : > { %v7592_v20 = vrot.slane %v7578_v28, 2  ;;  %v7549_v22 = vld [vmem:[#allocation3 + $0x4f8] sm:$0x1]  ;;  %v7579_v21 = vld [vmem:[#allocation3 + $0x508] sm:$0x3]  ;;  %v5374_v36 = vpop.f32.mrb[185].mxu1 }
 0x514   : > { %7608 = vst [vmem:[%s12655_s25 + $0xc0] sm:$0xff] %v7604_v24  ;;  %v7605_v14 = vmax.f32 %v7601_v54, 0.0  ;;  %v7564_v50 = vrot.slane %v7549_v22, 1  ;;  %v7594_v31 = vrot.slane %v7579_v21, 2  ;;  %v7563_v10 = vsel %vm7026_vm0, %v7557_v6, %v7562_v17  ;;  %6782 = vst [vmem:[#allocation3 + $0x560] sm:$0xff] %v6431_v33  ;;  %v6433_v58 = vpop.f32.mrb[185].mxu0 }
 0x515   : > { %6781 = vst [vmem:[#allocation3 + $0x558] sm:$0xff] %v5374_v36  ;;  %v12879_v12 = vpop.f32.mrb[186].mxu1  ;;  %v7572_v56 = vadd.f32 %v7563_v10, %v7542_v1  ;;  %6783 = vst [vmem:[#allocation3 + $0x568] sm:$0xff] %v6433_v58  ;;  %v12883_v11 = vpop.f32.mrb[186].mxu0  ;;  %v7593_v48 = vsel %vm7057_vm1, %v7587_v0, %v7592_v20  ;;  %v10487_v33 = vld [vmem:[#allocation3 + $0x570] sm:$0xff] }
 0x516   : > { %7609 = vst [vmem:[%s12655_s25 + $0xc8] sm:$0xff] %v7605_v14  ;;  %v7565_v34 = vsel %vm7026_vm0, %v7560_v60, %v7564_v50  ;;  %v12885_v52 = vpop.f32.mrb[187].mxu1  ;;  %v12890_v15 = vpop.f32.mrb[187].mxu0  ;;  %v7595_v9 = vsel %vm7057_vm1, %v7590_v16, %v7594_v31  ;;  %v7645_v53 = vrot.slane %v12879_v12, 1  ;;  %v7675_v59 = vrot.slane %v12883_v11, 2  ;;  %v10488_v12 = vld [vmem:[#allocation3 + $0x578] sm:$0xff] }
 0x517   : > { %v7573_v42 = vadd.f32 %v7565_v34, %v7543_v55  ;;  %v7602_v6 = vadd.f32 %v7593_v48, %v7572_v56  ;;  %v7648_v7 = vrot.slane %v12885_v52, 1  ;;  %v7629_v16 = vadd.f32 %v10486_v46, %v7625_v8  ;;  %v7700_v34 = vld [vmem:[%s13231_s2] sm:$0x3] }
 0x518   : > { %v7678_v54 = vrot.slane %v12890_v15, 2  ;;  %v7630_v36 = vadd.f32 %v10487_v33, %v7621_v57  ;;  %v7631_v56 = vadd.f32 %v10488_v12, %v7625_v8 }
 0x519   : > { %v7603_v43 = vadd.f32 %v7595_v9, %v7573_v42  ;;  %v7606_v3 = vmax.f32 %v7602_v6, 0.0  ;;  %v7632_v60 = vld [vmem:[#allocation3 + $0x550] sm:$0xfe]  ;;  %v5382_v47 = vpop.f32.mrb[188].mxu1 }
 0x51a   : > { %v6441_v37 = vpop.f32.mrb[188].mxu0  ;;  %v7644_v0 = vrot.slane %v7632_v60, 1  ;;  %6792 = vst [vmem:[#allocation3 + $0x5b0] sm:$0xff] %v5382_v47  ;;  %v5384_v41 = vpop.f32.mrb[189].mxu1  ;;  %v7709_v60 = vrot.slane %v7700_v34, %v12614_v23 }
 0x51b   : > { %v7607_v29 = vmax.f32 %v7603_v43, 0.0  ;;  %6794 = vst [vmem:[#allocation3 + $0x5c0] sm:$0xff] %v6441_v37  ;;  %v6443_v19 = vpop.f32.mrb[189].mxu0  ;;  %7610 = vst [vmem:[%s12655_s25 + $0xd0] sm:$0xff] %v7606_v3  ;;  %v7662_v27 = vld [vmem:[#allocation3 + $0x560] sm:$0xfc] }
 0x51c   : > { %v7633_v40 = vld [vmem:[#allocation3 + $0x558] sm:$0xfe]  ;;  %6793 = vst [vmem:[#allocation3 + $0x5b8] sm:$0xff] %v5384_v41  ;;  %6795 = vst [vmem:[#allocation3 + $0x5c8] sm:$0xff] %v6443_v19  ;;  %v5386_v49 = vpop.f32.mrb[190].mxu1  ;;  %v6445_v63 = vpop.f32.mrb[190].mxu0  ;;  %v7646_v18 = vsel %vm7026_vm0, %v7644_v0, %v7645_v53 }
 0x51d   : > { %7611 = vst [vmem:[%s12655_s25 + $0xd8] sm:$0xff] %v7607_v29  ;;  %v7674_v2 = vrot.slane %v7662_v27, 2  ;;  %v7647_v38 = vrot.slane %v7633_v40, 1  ;;  %v7663_v61 = vld [vmem:[#allocation3 + $0x568] sm:$0xfc]  ;;  %v5388_v44 = vpop.f32.mrb[191].mxu1  ;;  %v7658_v51 = vadd.f32 %v7646_v18, %v7628_v35  ;;  %v7713_v29 = vrot.slane %v7700_v34, %v12623_v13 }
 0x51e   : > { %v6447_v4 = vpop.f32.mrb[191].mxu0  ;;  %v7677_v32 = vrot.slane %v7663_v61, 2  ;;  %v10489_v63 = vld [vmem:[#allocation3 + $0x600] sm:$0xff] }
 0x51f   : > { %v7676_v5 = vsel %vm7057_vm1, %v7674_v2, %v7675_v59  ;;  %v7649_v24 = vsel %vm7026_vm0, %v7647_v38, %v7648_v7  ;;  %v7716_v2 = vadd.f32 %v10489_v63, %v7709_v60 }
 0x520   : > { %v7688_v25 = vadd.f32 %v7676_v5, %v7658_v51  ;;  %v7659_v28 = vadd.f32 %v7649_v24, %v7629_v16  ;;  %v7679_v30 = vsel %vm7057_vm1, %v7677_v32, %v7678_v54  ;;  %v10490_v24 = vld [vmem:[#allocation3 + $0x608] sm:$0xff] }
 0x521   : > { %v7636_v22 = vld [vmem:[#allocation3 + $0x5b0] sm:$0x1]  ;;  %v5392_v45 = vpop.f32.mrb[192].mxu1 }
 0x522   : > { %v7692_v17 = vmax.f32 %v7688_v25, 0.0  ;;  %v7689_v20 = vadd.f32 %v7679_v30, %v7659_v28  ;;  %v7666_v21 = vld [vmem:[#allocation3 + $0x5c0] sm:$0x3]  ;;  %v7650_v1 = vrot.slane %v7636_v22, 1  ;;  %6804 = vst [vmem:[#allocation3 + $0x610] sm:$0xff] %v5392_v45  ;;  %v6451_v10 = vpop.f32.mrb[192].mxu0 }
 0x523   : > { %v7680_v14 = vrot.slane %v7666_v21, 2  ;;  %v7637_v50 = vld [vmem:[#allocation3 + $0x5b8] sm:$0x1]  ;;  %v7667_v31 = vld [vmem:[#allocation3 + $0x5c8] sm:$0x3]  ;;  %v5394_v58 = vpop.f32.mrb[193].mxu1 }
 0x524   : > { %7696 = vst [vmem:[%s12655_s25 + $0xe0] sm:$0xff] %v7692_v17  ;;  %v7693_v26 = vmax.f32 %v7689_v20, 0.0  ;;  %v7652_v55 = vrot.slane %v7637_v50, 1  ;;  %v7682_v62 = vrot.slane %v7667_v31, 2  ;;  %v7651_v52 = vsel %vm7026_vm0, %v7645_v53, %v7650_v1  ;;  %6806 = vst [vmem:[#allocation3 + $0x620] sm:$0xff] %v6451_v10  ;;  %v6453_v48 = vpop.f32.mrb[193].mxu0 }
 0x525   : > { %6805 = vst [vmem:[#allocation3 + $0x618] sm:$0xff] %v5394_v58  ;;  %v12912_v42 = vpop.f32.mrb[194].mxu1  ;;  %v7660_v15 = vadd.f32 %v7651_v52, %v7630_v36  ;;  %6807 = vst [vmem:[#allocation3 + $0x628] sm:$0xff] %v6453_v48  ;;  %v12916_v6 = vpop.f32.mrb[194].mxu0  ;;  %v7681_v43 = vsel %vm7057_vm1, %v7675_v59, %v7680_v14  ;;  %v10491_v10 = vld [vmem:[#allocation3 + $0x630] sm:$0xff] }
 0x526   : > { %7697 = vst [vmem:[%s12655_s25 + $0xe8] sm:$0xff] %v7693_v26  ;;  %v7653_v57 = vsel %vm7026_vm0, %v7648_v7, %v7652_v55  ;;  %v12918_v9 = vpop.f32.mrb[195].mxu1  ;;  %v12923_v3 = vpop.f32.mrb[195].mxu0  ;;  %v7683_v47 = vsel %vm7057_vm1, %v7678_v54, %v7682_v62  ;;  %v7733_v41 = vrot.slane %v12912_v42, 1  ;;  %v7763_v35 = vrot.slane %v12916_v6, 2  ;;  %v10492_v42 = vld [vmem:[#allocation3 + $0x638] sm:$0xff] }
 0x527   : > { %v7661_v8 = vadd.f32 %v7653_v57, %v7631_v56  ;;  %v7690_v53 = vadd.f32 %v7681_v43, %v7660_v15  ;;  %v7736_v27 = vrot.slane %v12918_v9, 1  ;;  %v7717_v54 = vadd.f32 %v10490_v24, %v7713_v29  ;;  %v7788_v57 = vld [vmem:[%s13231_s2] sm:$0x3] }
 0x528   : > { %v7766_v20 = vrot.slane %v12923_v3, 2  ;;  %v7718_v58 = vadd.f32 %v10491_v10, %v7709_v60  ;;  %v7719_v15 = vadd.f32 %v10492_v42, %v7713_v29 }
 0x529   : > { %v7691_v37 = vadd.f32 %v7683_v47, %v7661_v8  ;;  %v7694_v0 = vmax.f32 %v7690_v53, 0.0  ;;  %v7720_v7 = vld [vmem:[#allocation3 + $0x610] sm:$0xfe]  ;;  %v5402_v19 = vpop.f32.mrb[196].mxu1 }
 0x52a   : > { %v6461_v11 = vpop.f32.mrb[196].mxu0  ;;  %v7732_v59 = vrot.slane %v7720_v7, 1  ;;  %6816 = vst [vmem:[#allocation3 + $0x670] sm:$0xff] %v5402_v19  ;;  %v5404_v40 = vpop.f32.mrb[197].mxu1  ;;  %v7797_v7 = vrot.slane %v7788_v57, %v12614_v23 }
 0x52b   : > { %v7695_v39 = vmax.f32 %v7691_v37, 0.0  ;;  %6818 = vst [vmem:[#allocation3 + $0x680] sm:$0xff] %v6461_v11  ;;  %v6463_v49 = vpop.f32.mrb[197].mxu0  ;;  %7698 = vst [vmem:[%s12655_s25 + $0xf0] sm:$0xff] %v7694_v0  ;;  %v7750_v38 = vld [vmem:[#allocation3 + $0x620] sm:$0xfc] }
 0x52c   : > { %v7721_v61 = vld [vmem:[#allocation3 + $0x618] sm:$0xfe]  ;;  %6817 = vst [vmem:[#allocation3 + $0x678] sm:$0xff] %v5404_v40  ;;  %6819 = vst [vmem:[#allocation3 + $0x688] sm:$0xff] %v6463_v49  ;;  %v5406_v18 = vpop.f32.mrb[198].mxu1  ;;  %v6465_v44 = vpop.f32.mrb[198].mxu0  ;;  %v7734_v32 = vsel %vm7026_vm0, %v7732_v59, %v7733_v41 }
 0x52d   : > { %7699 = vst [vmem:[%s12655_s25 + $0xf8] sm:$0xff] %v7695_v39  ;;  %v7762_v4 = vrot.slane %v7750_v38, 2  ;;  %v7735_v46 = vrot.slane %v7721_v61, 1  ;;  %v7751_v16 = vld [vmem:[#allocation3 + $0x628] sm:$0xfc]  ;;  %v5408_v51 = vpop.f32.mrb[199].mxu1  ;;  %v7746_v28 = vadd.f32 %v7734_v32, %v7716_v2  ;;  %v7801_v39 = vrot.slane %v7788_v57, %v12623_v13 }
 0x52e   : > { %v6467_v5 = vpop.f32.mrb[199].mxu0  ;;  %v7765_v25 = vrot.slane %v7751_v16, 2  ;;  %v10493_v44 = vld [vmem:[#allocation3 + $0x6c0] sm:$0xff] }
 0x52f   : > { %v7764_v30 = vsel %vm7057_vm1, %v7762_v4, %v7763_v35  ;;  %v7737_v17 = vsel %vm7026_vm0, %v7735_v46, %v7736_v27  ;;  %v7804_v4 = vadd.f32 %v10493_v44, %v7797_v7 }
 0x530   : > { %v7776_v22 = vadd.f32 %v7764_v30, %v7746_v28  ;;  %v7747_v21 = vadd.f32 %v7737_v17, %v7717_v54  ;;  %v7767_v45 = vsel %vm7057_vm1, %v7765_v25, %v7766_v20  ;;  %v10494_v17 = vld [vmem:[#allocation3 + $0x6c8] sm:$0xff] }
 0x531   : > { %v7724_v50 = vld [vmem:[#allocation3 + $0x670] sm:$0x1]  ;;  %v5412_v33 = vpop.f32.mrb[200].mxu1 }
 0x532   : > { %v7780_v1 = vmax.f32 %v7776_v22, 0.0  ;;  %v7777_v14 = vadd.f32 %v7767_v45, %v7747_v21  ;;  %v7754_v31 = vld [vmem:[#allocation3 + $0x680] sm:$0x3]  ;;  %v7738_v36 = vrot.slane %v7724_v50, 1  ;;  %6828 = vst [vmem:[#allocation3 + $0x6d0] sm:$0xff] %v5412_v33  ;;  %v6471_v52 = vpop.f32.mrb[200].mxu0 }
 0x533   : > { %v7768_v26 = vrot.slane %v7754_v31, 2  ;;  %v7725_v55 = vld [vmem:[#allocation3 + $0x678] sm:$0x1]  ;;  %v7755_v62 = vld [vmem:[#allocation3 + $0x688] sm:$0x3]  ;;  %v5414_v48 = vpop.f32.mrb[201].mxu1 }
 0x534   : > { %7784 = vst [vmem:[%s12655_s25 + $0x100] sm:$0xff] %v7780_v1  ;;  %v7781_v12 = vmax.f32 %v7777_v14, 0.0  ;;  %v7740_v56 = vrot.slane %v7725_v55, 1  ;;  %v7770_v34 = vrot.slane %v7755_v62, 2  ;;  %v7739_v9 = vsel %vm7026_vm0, %v7733_v41, %v7738_v36  ;;  %6830 = vst [vmem:[#allocation3 + $0x6e0] sm:$0xff] %v6471_v52  ;;  %v6473_v43 = vpop.f32.mrb[201].mxu0 }
 0x535   : > { %6829 = vst [vmem:[#allocation3 + $0x6d8] sm:$0xff] %v5414_v48  ;;  %v12945_v8 = vpop.f32.mrb[202].mxu1  ;;  %v7748_v3 = vadd.f32 %v7739_v9, %v7718_v58  ;;  %6831 = vst [vmem:[#allocation3 + $0x6e8] sm:$0xff] %v6473_v43  ;;  %v12949_v53 = vpop.f32.mrb[202].mxu0  ;;  %v7769_v37 = vsel %vm7057_vm1, %v7763_v35, %v7768_v26  ;;  %v10495_v52 = vld [vmem:[#allocation3 + $0x6f0] sm:$0xff] }
 0x536   : > { %7785 = vst [vmem:[%s12655_s25 + $0x108] sm:$0xff] %v7781_v12  ;;  %v7741_v60 = vsel %vm7026_vm0, %v7736_v27, %v7740_v56  ;;  %v12951_v47 = vpop.f32.mrb[203].mxu1  ;;  %v12956_v0 = vpop.f32.mrb[203].mxu0  ;;  %v7771_v19 = vsel %vm7057_vm1, %v7766_v20, %v7770_v34  ;;  %v7821_v40 = vrot.slane %v12945_v8, 1  ;;  %v7851_v2 = vrot.slane %v12949_v53, 2  ;;  %v10496_v8 = vld [vmem:[#allocation3 + $0x6f8] sm:$0xff] }
 0x537   : > { %v7749_v29 = vadd.f32 %v7741_v60, %v7719_v15  ;;  %v7778_v41 = vadd.f32 %v7769_v37, %v7748_v3  ;;  %v7824_v38 = vrot.slane %v12951_v47, 1  ;;  %v7805_v20 = vadd.f32 %v10494_v17, %v7801_v39  ;;  %v7876_v60 = vld [vmem:[%s13231_s2] sm:$0x3] }
 0x538   : > { %v7854_v14 = vrot.slane %v12956_v0, 2  ;;  %v7806_v48 = vadd.f32 %v10495_v52, %v7797_v7  ;;  %v7807_v3 = vadd.f32 %v10496_v8, %v7801_v39 }
 0x539   : > { %v7779_v11 = vadd.f32 %v7771_v19, %v7749_v29  ;;  %v7782_v59 = vmax.f32 %v7778_v41, 0.0  ;;  %v7808_v27 = vld [vmem:[#allocation3 + $0x6d0] sm:$0xfe]  ;;  %v5422_v49 = vpop.f32.mrb[204].mxu1 }
 0x53a   : > { %v6481_v6 = vpop.f32.mrb[204].mxu0  ;;  %v7820_v35 = vrot.slane %v7808_v27, 1  ;;  %6840 = vst [vmem:[#allocation3 + $0x730] sm:$0xff] %v5422_v49  ;;  %v5424_v61 = vpop.f32.mrb[205].mxu1  ;;  %v7885_v27 = vrot.slane %v7876_v60, %v12614_v23 }
 0x53b   : > { %v7783_v63 = vmax.f32 %v7779_v11, 0.0  ;;  %6842 = vst [vmem:[#allocation3 + $0x740] sm:$0xff] %v6481_v6  ;;  %v6483_v18 = vpop.f32.mrb[205].mxu0  ;;  %7786 = vst [vmem:[%s12655_s25 + $0x110] sm:$0xff] %v7782_v59  ;;  %v7838_v46 = vld [vmem:[#allocation3 + $0x6e0] sm:$0xfc] }
 0x53c   : > { %v7809_v16 = vld [vmem:[#allocation3 + $0x6d8] sm:$0xfe]  ;;  %6841 = vst [vmem:[#allocation3 + $0x738] sm:$0xff] %v5424_v61  ;;  %6843 = vst [vmem:[#allocation3 + $0x748] sm:$0xff] %v6483_v18  ;;  %v5426_v32 = vpop.f32.mrb[206].mxu1  ;;  %v6485_v51 = vpop.f32.mrb[206].mxu0  ;;  %v7822_v25 = vsel %vm7026_vm0, %v7820_v35, %v7821_v40 }
 0x53d   : > { %7787 = vst [vmem:[%s12655_s25 + $0x118] sm:$0xff] %v7783_v63  ;;  %v7850_v5 = vrot.slane %v7838_v46, 2  ;;  %v7823_v24 = vrot.slane %v7809_v16, 1  ;;  %v7839_v54 = vld [vmem:[#allocation3 + $0x6e8] sm:$0xfc]  ;;  %v5428_v28 = vpop.f32.mrb[207].mxu1  ;;  %v7834_v21 = vadd.f32 %v7822_v25, %v7804_v4  ;;  %v7889_v63 = vrot.slane %v7876_v60, %v12623_v13 }
 0x53e   : > { %v6487_v30 = vpop.f32.mrb[207].mxu0  ;;  %v7853_v22 = vrot.slane %v7839_v54, 2  ;;  %v10497_v51 = vld [vmem:[#allocation3 + $0x780] sm:$0xff] }
 0x53f   : > { %v7852_v45 = vsel %vm7057_vm1, %v7850_v5, %v7851_v2  ;;  %v7825_v1 = vsel %vm7026_vm0, %v7823_v24, %v7824_v38  ;;  %v7892_v5 = vadd.f32 %v10497_v51, %v7885_v27 }
 0x540   : > { %v7864_v50 = vadd.f32 %v7852_v45, %v7834_v21  ;;  %v7835_v31 = vadd.f32 %v7825_v1, %v7805_v20  ;;  %v7855_v33 = vsel %vm7057_vm1, %v7853_v22, %v7854_v14  ;;  %v10498_v1 = vld [vmem:[#allocation3 + $0x788] sm:$0xff] }
 0x541   : > { %v7812_v55 = vld [vmem:[#allocation3 + $0x730] sm:$0x1]  ;;  %v5432_v10 = vpop.f32.mrb[208].mxu1 }
 0x542   : > { %v7868_v36 = vmax.f32 %v7864_v50, 0.0  ;;  %v7865_v26 = vadd.f32 %v7855_v33, %v7835_v31  ;;  %v7842_v62 = vld [vmem:[#allocation3 + $0x740] sm:$0x3]  ;;  %v7826_v58 = vrot.slane %v7812_v55, 1  ;;  %6852 = vst [vmem:[#allocation3 + $0x790] sm:$0xff] %v5432_v10  ;;  %v6491_v9 = vpop.f32.mrb[208].mxu0 }
 0x543   : > { %v7856_v12 = vrot.slane %v7842_v62, 2  ;;  %v7813_v56 = vld [vmem:[#allocation3 + $0x738] sm:$0x1]  ;;  %v7843_v34 = vld [vmem:[#allocation3 + $0x748] sm:$0x3]  ;;  %v5434_v43 = vpop.f32.mrb[209].mxu1 }
 0x544   : > { %7872 = vst [vmem:[%s12655_s25 + $0x120] sm:$0xff] %v7868_v36  ;;  %v7869_v42 = vmax.f32 %v7865_v26, 0.0  ;;  %v7828_v15 = vrot.slane %v7813_v56, 1  ;;  %v7858_v57 = vrot.slane %v7843_v34, 2  ;;  %v7827_v47 = vsel %vm7026_vm0, %v7821_v40, %v7826_v58  ;;  %6854 = vst [vmem:[#allocation3 + $0x7a0] sm:$0xff] %v6491_v9  ;;  %v6493_v37 = vpop.f32.mrb[209].mxu0 }
 0x545   : > { %6853 = vst [vmem:[#allocation3 + $0x798] sm:$0xff] %v5434_v43  ;;  %v12978_v29 = vpop.f32.mrb[210].mxu1  ;;  %v7836_v0 = vadd.f32 %v7827_v47, %v7806_v48  ;;  %6855 = vst [vmem:[#allocation3 + $0x7a8] sm:$0xff] %v6493_v37  ;;  %v12982_v41 = vpop.f32.mrb[210].mxu0  ;;  %v7857_v11 = vsel %vm7057_vm1, %v7851_v2, %v7856_v12  ;;  %v10499_v9 = vld [vmem:[#allocation3 + $0x7b0] sm:$0xff] }
 0x546   : > { %7873 = vst [vmem:[%s12655_s25 + $0x128] sm:$0xff] %v7869_v42  ;;  %v7829_v7 = vsel %vm7026_vm0, %v7824_v38, %v7828_v15  ;;  %v12984_v19 = vpop.f32.mrb[211].mxu1  ;;  %v12989_v59 = vpop.f32.mrb[211].mxu0  ;;  %v7859_v49 = vsel %vm7057_vm1, %v7854_v14, %v7858_v57  ;;  %v7909_v61 = vrot.slane %v12978_v29, 1  ;;  %v7939_v4 = vrot.slane %v12982_v41, 2  ;;  %v10500_v29 = vld [vmem:[#allocation3 + $0x7b8] sm:$0xff] }
 0x547   : > { %v7837_v39 = vadd.f32 %v7829_v7, %v7807_v3  ;;  %v7866_v40 = vadd.f32 %v7857_v11, %v7836_v0  ;;  %v7912_v46 = vrot.slane %v12984_v19, 1  ;;  %v7893_v14 = vadd.f32 %v10498_v1, %v7889_v63  ;;  %v7964_v7 = vld [vmem:[%s13231_s2] sm:$0x3] }
 0x548   : > { %v7942_v26 = vrot.slane %v12989_v59, 2  ;;  %v7894_v43 = vadd.f32 %v10499_v9, %v7885_v27  ;;  %v7895_v0 = vadd.f32 %v10500_v29, %v7889_v63 }
 0x549   : > { %v7867_v6 = vadd.f32 %v7859_v49, %v7837_v39  ;;  %v7870_v35 = vmax.f32 %v7866_v40, 0.0  ;;  %v7896_v38 = vld [vmem:[#allocation3 + $0x790] sm:$0xfe]  ;;  %v5442_v18 = vpop.f32.mrb[212].mxu1 }
 0x54a   : > { %v6501_v53 = vpop.f32.mrb[212].mxu0  ;;  %v7908_v2 = vrot.slane %v7896_v38, 1  ;;  %6864 = vst [vmem:[#allocation3 + $0x7f0] sm:$0xff] %v5442_v18  ;;  %v5444_v16 = vpop.f32.mrb[213].mxu1  ;;  %v7973_v38 = vrot.slane %v7964_v7, %v12614_v23 }
 0x54b   : > { %v7871_v44 = vmax.f32 %v7867_v6, 0.0  ;;  %6866 = vst [vmem:[#allocation3 + $0x800] sm:$0xff] %v6501_v53  ;;  %v6503_v32 = vpop.f32.mrb[213].mxu0  ;;  %7874 = vst [vmem:[%s12655_s25 + $0x130] sm:$0xff] %v7870_v35  ;;  %v7926_v24 = vld [vmem:[#allocation3 + $0x7a0] sm:$0xfc] }
 0x54c   : > { %v7897_v54 = vld [vmem:[#allocation3 + $0x798] sm:$0xfe]  ;;  %6865 = vst [vmem:[#allocation3 + $0x7f8] sm:$0xff] %v5444_v16  ;;  %6867 = vst [vmem:[#allocation3 + $0x808] sm:$0xff] %v6503_v32  ;;  %v5446_v25 = vpop.f32.mrb[214].mxu1  ;;  %v6505_v28 = vpop.f32.mrb[214].mxu0  ;;  %v7910_v22 = vsel %vm7026_vm0, %v7908_v2, %v7909_v61 }
 0x54d   : > { %7875 = vst [vmem:[%s12655_s25 + $0x138] sm:$0xff] %v7871_v44  ;;  %v7938_v30 = vrot.slane %v7926_v24, 2  ;;  %v7911_v17 = vrot.slane %v7897_v54, 1  ;;  %v7927_v20 = vld [vmem:[#allocation3 + $0x7a8] sm:$0xfc]  ;;  %v5448_v21 = vpop.f32.mrb[215].mxu1  ;;  %v7922_v31 = vadd.f32 %v7910_v22, %v7892_v5  ;;  %v7977_v44 = vrot.slane %v7964_v7, %v12623_v13 }
 0x54e   : > { %v6507_v45 = vpop.f32.mrb[215].mxu0  ;;  %v7941_v50 = vrot.slane %v7927_v20, 2  ;;  %v10501_v28 = vld [vmem:[#allocation3 + $0x840] sm:$0xff] }
 0x54f   : > { %v7940_v33 = vsel %vm7057_vm1, %v7938_v30, %v7939_v4  ;;  %v7913_v36 = vsel %vm7026_vm0, %v7911_v17, %v7912_v46  ;;  %v7980_v30 = vadd.f32 %v10501_v28, %v7973_v38 }
 0x550   : > { %v7952_v55 = vadd.f32 %v7940_v33, %v7922_v31  ;;  %v7923_v62 = vadd.f32 %v7913_v36, %v7893_v14  ;;  %v7943_v10 = vsel %vm7057_vm1, %v7941_v50, %v7942_v26  ;;  %v10502_v36 = vld [vmem:[#allocation3 + $0x848] sm:$0xff] }
 0x551   : > { %v7900_v56 = vld [vmem:[#allocation3 + $0x7f0] sm:$0x1]  ;;  %v5452_v52 = vpop.f32.mrb[216].mxu1 }
 0x552   : > { %v7956_v58 = vmax.f32 %v7952_v55, 0.0  ;;  %v7953_v12 = vadd.f32 %v7943_v10, %v7923_v62  ;;  %v7930_v34 = vld [vmem:[#allocation3 + $0x800] sm:$0x3]  ;;  %v7914_v48 = vrot.slane %v7900_v56, 1  ;;  %6876 = vst [vmem:[#allocation3 + $0x850] sm:$0xff] %v5452_v52  ;;  %v6511_v47 = vpop.f32.mrb[216].mxu0 }
 0x553   : > { %v7944_v42 = vrot.slane %v7930_v34, 2  ;;  %v7901_v15 = vld [vmem:[#allocation3 + $0x7f8] sm:$0x1]  ;;  %v7931_v57 = vld [vmem:[#allocation3 + $0x808] sm:$0x3]  ;;  %v5454_v37 = vpop.f32.mrb[217].mxu1 }
 0x554   : > { %7960 = vst [vmem:[%s12655_s25 + $0x140] sm:$0xff] %v7956_v58  ;;  %v7957_v8 = vmax.f32 %v7953_v12, 0.0  ;;  %v7916_v3 = vrot.slane %v7901_v15, 1  ;;  %v7946_v60 = vrot.slane %v7931_v57, 2  ;;  %v7915_v19 = vsel %vm7026_vm0, %v7909_v61, %v7914_v48  ;;  %6878 = vst [vmem:[#allocation3 + $0x860] sm:$0xff] %v6511_v47  ;;  %v6513_v11 = vpop.f32.mrb[217].mxu0 }
 0x555   : > { %6877 = vst [vmem:[#allocation3 + $0x858] sm:$0xff] %v5454_v37  ;;  %v13011_v39 = vpop.f32.mrb[218].mxu1  ;;  %v7924_v59 = vadd.f32 %v7915_v19, %v7894_v43  ;;  %6879 = vst [vmem:[#allocation3 + $0x868] sm:$0xff] %v6513_v11  ;;  %v13015_v40 = vpop.f32.mrb[218].mxu0  ;;  %v7945_v6 = vsel %vm7057_vm1, %v7939_v4, %v7944_v42  ;;  %v10503_v47 = vld [vmem:[#allocation3 + $0x870] sm:$0xff] }
 0x556   : > { %7961 = vst [vmem:[%s12655_s25 + $0x148] sm:$0xff] %v7957_v8  ;;  %v7917_v27 = vsel %vm7026_vm0, %v7912_v46, %v7916_v3  ;;  %v13017_v49 = vpop.f32.mrb[219].mxu1  ;;  %v13022_v35 = vpop.f32.mrb[219].mxu0  ;;  %v7947_v18 = vsel %vm7057_vm1, %v7942_v26, %v7946_v60  ;;  %v7997_v16 = vrot.slane %v13011_v39, 1  ;;  %v8027_v5 = vrot.slane %v13015_v40, 2  ;;  %v10504_v39 = vld [vmem:[#allocation3 + $0x878] sm:$0xff] }
 0x557   : > { %v7925_v63 = vadd.f32 %v7917_v27, %v7895_v0  ;;  %v7954_v61 = vadd.f32 %v7945_v6, %v7924_v59  ;;  %v8000_v24 = vrot.slane %v13017_v49, 1  ;;  %v7981_v26 = vadd.f32 %v10502_v36, %v7977_v44  ;;  %v8052_v27 = vld [vmem:[%s13231_s2] sm:$0x3] }
 0x558   : > { %v8030_v12 = vrot.slane %v13022_v35, 2  ;;  %v7982_v37 = vadd.f32 %v10503_v47, %v7973_v38  ;;  %v7983_v59 = vadd.f32 %v10504_v39, %v7977_v44 }
 0x559   : > { %v7955_v53 = vadd.f32 %v7947_v18, %v7925_v63  ;;  %v7958_v2 = vmax.f32 %v7954_v61, 0.0  ;;  %v7984_v46 = vld [vmem:[#allocation3 + $0x850] sm:$0xfe]  ;;  %v5462_v32 = vpop.f32.mrb[220].mxu1 }
 0x55a   : > { %v6521_v41 = vpop.f32.mrb[220].mxu0  ;;  %v7996_v4 = vrot.slane %v7984_v46, 1  ;;  %6888 = vst [vmem:[#allocation3 + $0x8b0] sm:$0xff] %v5462_v32  ;;  %v5464_v54 = vpop.f32.mrb[221].mxu1  ;;  %v8061_v46 = vrot.slane %v8052_v27, %v12614_v23 }
 0x55b   : > { %v7959_v51 = vmax.f32 %v7955_v53, 0.0  ;;  %6890 = vst [vmem:[#allocation3 + $0x8c0] sm:$0xff] %v6521_v41  ;;  %v6523_v25 = vpop.f32.mrb[221].mxu0  ;;  %7962 = vst [vmem:[%s12655_s25 + $0x150] sm:$0xff] %v7958_v2  ;;  %v8014_v17 = vld [vmem:[#allocation3 + $0x860] sm:$0xfc] }
 0x55c   : > { %v7985_v20 = vld [vmem:[#allocation3 + $0x858] sm:$0xfe]  ;;  %6889 = vst [vmem:[#allocation3 + $0x8b8] sm:$0xff] %v5464_v54  ;;  %6891 = vst [vmem:[#allocation3 + $0x8c8] sm:$0xff] %v6523_v25  ;;  %v5466_v22 = vpop.f32.mrb[222].mxu1  ;;  %v6525_v21 = vpop.f32.mrb[222].mxu0  ;;  %v7998_v50 = vsel %vm7026_vm0, %v7996_v4, %v7997_v16 }
 0x55d   : > { %7963 = vst [vmem:[%s12655_s25 + $0x158] sm:$0xff] %v7959_v51  ;;  %v8026_v45 = vrot.slane %v8014_v17, 2  ;;  %v7999_v1 = vrot.slane %v7985_v20, 1  ;;  %v8015_v14 = vld [vmem:[#allocation3 + $0x868] sm:$0xfc]  ;;  %v5468_v31 = vpop.f32.mrb[223].mxu1  ;;  %v8010_v62 = vadd.f32 %v7998_v50, %v7980_v30  ;;  %v8065_v51 = vrot.slane %v8052_v27, %v12623_v13 }
 0x55e   : > { %v6527_v33 = vpop.f32.mrb[223].mxu0  ;;  %v8029_v55 = vrot.slane %v8015_v14, 2  ;;  %v10505_v21 = vld [vmem:[#allocation3 + $0x900] sm:$0xff] }
 0x55f   : > { %v8028_v10 = vsel %vm7057_vm1, %v8026_v45, %v8027_v5  ;;  %v8001_v58 = vsel %vm7026_vm0, %v7999_v1, %v8000_v24  ;;  %v8068_v45 = vadd.f32 %v10505_v21, %v8061_v46 }
 0x560   : > { %v8040_v56 = vadd.f32 %v8028_v10, %v8010_v62  ;;  %v8011_v34 = vadd.f32 %v8001_v58, %v7981_v26  ;;  %v8031_v52 = vsel %vm7057_vm1, %v8029_v55, %v8030_v12  ;;  %v10506_v58 = vld [vmem:[#allocation3 + $0x908] sm:$0xff] }
 0x561   : > { %v7988_v15 = vld [vmem:[#allocation3 + $0x8b0] sm:$0x1]  ;;  %v5472_v9 = vpop.f32.mrb[224].mxu1 }
 0x562   : > { %v8044_v48 = vmax.f32 %v8040_v56, 0.0  ;;  %v8041_v42 = vadd.f32 %v8031_v52, %v8011_v34  ;;  %v8018_v57 = vld [vmem:[#allocation3 + $0x8c0] sm:$0x3]  ;;  %v8002_v43 = vrot.slane %v7988_v15, 1  ;;  %6900 = vst [vmem:[#allocation3 + $0x910] sm:$0xff] %v5472_v9  ;;  %v6531_v19 = vpop.f32.mrb[224].mxu0 }
 0x563   : > { %v8032_v8 = vrot.slane %v8018_v57, 2  ;;  %v7989_v3 = vld [vmem:[#allocation3 + $0x8b8] sm:$0x1]  ;;  %v8019_v60 = vld [vmem:[#allocation3 + $0x8c8] sm:$0x3]  ;;  %v5474_v11 = vpop.f32.mrb[225].mxu1 }
 0x564   : > { %8048 = vst [vmem:[%s12655_s25 + $0x160] sm:$0xff] %v8044_v48  ;;  %v8045_v29 = vmax.f32 %v8041_v42, 0.0  ;;  %v8004_v0 = vrot.slane %v7989_v3, 1  ;;  %v8034_v7 = vrot.slane %v8019_v60, 2  ;;  %v8003_v49 = vsel %vm7026_vm0, %v7997_v16, %v8002_v43  ;;  %6902 = vst [vmem:[#allocation3 + $0x920] sm:$0xff] %v6531_v19  ;;  %v6533_v6 = vpop.f32.mrb[225].mxu0 }
 0x565   : > { %6901 = vst [vmem:[#allocation3 + $0x918] sm:$0xff] %v5474_v11  ;;  %v13044_v63 = vpop.f32.mrb[226].mxu1  ;;  %v8012_v35 = vadd.f32 %v8003_v49, %v7982_v37  ;;  %6903 = vst [vmem:[#allocation3 + $0x928] sm:$0xff] %v6533_v6  ;;  %v13048_v61 = vpop.f32.mrb[226].mxu0  ;;  %v8033_v53 = vsel %vm7057_vm1, %v8027_v5, %v8032_v8  ;;  %v10507_v19 = vld [vmem:[#allocation3 + $0x930] sm:$0xff] }
 0x566   : > { %8049 = vst [vmem:[%s12655_s25 + $0x168] sm:$0xff] %v8045_v29  ;;  %v8005_v38 = vsel %vm7026_vm0, %v8000_v24, %v8004_v0  ;;  %v13050_v18 = vpop.f32.mrb[227].mxu1  ;;  %v13055_v2 = vpop.f32.mrb[227].mxu0  ;;  %v8035_v32 = vsel %vm7057_vm1, %v8030_v12, %v8034_v7  ;;  %v8085_v54 = vrot.slane %v13044_v63, 1  ;;  %v8115_v30 = vrot.slane %v13048_v61, 2  ;;  %v10508_v63 = vld [vmem:[#allocation3 + $0x938] sm:$0xff] }
 0x567   : > { %v8013_v44 = vadd.f32 %v8005_v38, %v7983_v59  ;;  %v8042_v16 = vadd.f32 %v8033_v53, %v8012_v35  ;;  %v8088_v17 = vrot.slane %v13050_v18, 1  ;;  %v8069_v12 = vadd.f32 %v10506_v58, %v8065_v51  ;;  %v8140_v38 = vld [vmem:[%s13231_s2] sm:$0x3] }
 0x568   : > { %v8118_v42 = vrot.slane %v13055_v2, 2  ;;  %v8070_v11 = vadd.f32 %v10507_v19, %v8061_v46  ;;  %v8071_v35 = vadd.f32 %v10508_v63, %v8065_v51 }
 0x569   : > { %v8043_v41 = vadd.f32 %v8035_v32, %v8013_v44  ;;  %v8046_v4 = vmax.f32 %v8042_v16, 0.0  ;;  %v8072_v24 = vld [vmem:[#allocation3 + $0x910] sm:$0xfe]  ;;  %v5482_v25 = vpop.f32.mrb[228].mxu1 }
 0x56a   : > { %v6541_v40 = vpop.f32.mrb[228].mxu0  ;;  %v8084_v5 = vrot.slane %v8072_v24, 1  ;;  %6912 = vst [vmem:[#allocation3 + $0x970] sm:$0xff] %v5482_v25  ;;  %v5484_v20 = vpop.f32.mrb[229].mxu1  ;;  %v8149_v24 = vrot.slane %v8140_v38, %v12614_v23 }
 0x56b   : > { %v8047_v28 = vmax.f32 %v8043_v41, 0.0  ;;  %6914 = vst [vmem:[#allocation3 + $0x980] sm:$0xff] %v6541_v40  ;;  %v6543_v22 = vpop.f32.mrb[229].mxu0  ;;  %8050 = vst [vmem:[%s12655_s25 + $0x170] sm:$0xff] %v8046_v4  ;;  %v8102_v1 = vld [vmem:[#allocation3 + $0x920] sm:$0xfc] }
 0x56c   : > { %v8073_v14 = vld [vmem:[#allocation3 + $0x918] sm:$0xfe]  ;;  %6913 = vst [vmem:[#allocation3 + $0x978] sm:$0xff] %v5484_v20  ;;  %6915 = vst [vmem:[#allocation3 + $0x988] sm:$0xff] %v6543_v22  ;;  %v5486_v50 = vpop.f32.mrb[230].mxu1  ;;  %v6545_v31 = vpop.f32.mrb[230].mxu0  ;;  %v8086_v55 = vsel %vm7026_vm0, %v8084_v5, %v8085_v54 }
 0x56d   : > { %8051 = vst [vmem:[%s12655_s25 + $0x178] sm:$0xff] %v8047_v28  ;;  %v8114_v33 = vrot.slane %v8102_v1, 2  ;;  %v8087_v36 = vrot.slane %v8073_v14, 1  ;;  %v8103_v26 = vld [vmem:[#allocation3 + $0x928] sm:$0xfc]  ;;  %v5488_v62 = vpop.f32.mrb[231].mxu1  ;;  %v8098_v34 = vadd.f32 %v8086_v55, %v8068_v45  ;;  %v8153_v28 = vrot.slane %v8140_v38, %v12623_v13 }
 0x56e   : > { %v6547_v10 = vpop.f32.mrb[231].mxu0  ;;  %v8117_v56 = vrot.slane %v8103_v26, 2  ;;  %v10509_v31 = vld [vmem:[#allocation3 + $0x9c0] sm:$0xff] }
 0x56f   : > { %v8116_v52 = vsel %vm7057_vm1, %v8114_v33, %v8115_v30  ;;  %v8089_v48 = vsel %vm7026_vm0, %v8087_v36, %v8088_v17  ;;  %v8156_v33 = vadd.f32 %v10509_v31, %v8149_v24 }
 0x570   : > { %v8128_v15 = vadd.f32 %v8116_v52, %v8098_v34  ;;  %v8099_v57 = vadd.f32 %v8089_v48, %v8069_v12  ;;  %v8119_v9 = vsel %vm7057_vm1, %v8117_v56, %v8118_v42  ;;  %v10510_v48 = vld [vmem:[#allocation3 + $0x9c8] sm:$0xff] }
 0x571   : > { %v8076_v3 = vld [vmem:[#allocation3 + $0x970] sm:$0x1]  ;;  %v5492_v47 = vpop.f32.mrb[232].mxu1 }
 0x572   : > { %v8132_v43 = vmax.f32 %v8128_v15, 0.0  ;;  %v8129_v8 = vadd.f32 %v8119_v9, %v8099_v57  ;;  %v8106_v60 = vld [vmem:[#allocation3 + $0x980] sm:$0x3]  ;;  %v8090_v37 = vrot.slane %v8076_v3, 1  ;;  %6924 = vst [vmem:[#allocation3 + $0x9d0] sm:$0xff] %v5492_v47  ;;  %v6551_v49 = vpop.f32.mrb[232].mxu0 }
 0x573   : > { %v8120_v29 = vrot.slane %v8106_v60, 2  ;;  %v8077_v0 = vld [vmem:[#allocation3 + $0x978] sm:$0x1]  ;;  %v8107_v7 = vld [vmem:[#allocation3 + $0x988] sm:$0x3]  ;;  %v5494_v6 = vpop.f32.mrb[233].mxu1 }
 0x574   : > { %8136 = vst [vmem:[%s12655_s25 + $0x180] sm:$0xff] %v8132_v43  ;;  %v8133_v39 = vmax.f32 %v8129_v8, 0.0  ;;  %v8092_v59 = vrot.slane %v8077_v0, 1  ;;  %v8122_v27 = vrot.slane %v8107_v7, 2  ;;  %v8091_v18 = vsel %vm7026_vm0, %v8085_v54, %v8090_v37  ;;  %6926 = vst [vmem:[#allocation3 + $0x9e0] sm:$0xff] %v6551_v49  ;;  %v6553_v53 = vpop.f32.mrb[233].mxu0 }
 0x575   : > { %6925 = vst [vmem:[#allocation3 + $0x9d8] sm:$0xff] %v5494_v6  ;;  %v13077_v44 = vpop.f32.mrb[234].mxu1  ;;  %v8100_v2 = vadd.f32 %v8091_v18, %v8070_v11  ;;  %6927 = vst [vmem:[#allocation3 + $0x9e8] sm:$0xff] %v6553_v53  ;;  %v13081_v16 = vpop.f32.mrb[234].mxu0  ;;  %v8121_v41 = vsel %vm7057_vm1, %v8115_v30, %v8120_v29  ;;  %v10511_v49 = vld [vmem:[#allocation3 + $0x9f0] sm:$0xff] }
 0x576   : > { %8137 = vst [vmem:[%s12655_s25 + $0x188] sm:$0xff] %v8133_v39  ;;  %v8093_v46 = vsel %vm7026_vm0, %v8088_v17, %v8092_v59  ;;  %v13083_v32 = vpop.f32.mrb[235].mxu1  ;;  %v13088_v4 = vpop.f32.mrb[235].mxu0  ;;  %v8123_v25 = vsel %vm7057_vm1, %v8118_v42, %v8122_v27  ;;  %v8173_v20 = vrot.slane %v13077_v44, 1  ;;  %v8203_v45 = vrot.slane %v13081_v16, 2  ;;  %v10512_v44 = vld [vmem:[#allocation3 + $0x9f8] sm:$0xff] }
 0x577   : > { %v8101_v51 = vadd.f32 %v8093_v46, %v8071_v35  ;;  %v8130_v54 = vadd.f32 %v8121_v41, %v8100_v2  ;;  %v8176_v1 = vrot.slane %v13083_v32, 1  ;;  %v8157_v42 = vadd.f32 %v10510_v48, %v8153_v28  ;;  %v8228_v46 = vld [vmem:[%s13231_s2] sm:$0x3] }
 0x578   : > { %v8206_v8 = vrot.slane %v13088_v4, 2  ;;  %v8158_v6 = vadd.f32 %v10511_v49, %v8149_v24  ;;  %v8159_v2 = vadd.f32 %v10512_v44, %v8153_v28 }
 0x579   : > { %v8131_v40 = vadd.f32 %v8123_v25, %v8101_v51  ;;  %v8134_v5 = vmax.f32 %v8130_v54, 0.0  ;;  %v8160_v17 = vld [vmem:[#allocation3 + $0x9d0] sm:$0xfe]  ;;  %v5502_v22 = vpop.f32.mrb[236].mxu1 }
 0x57a   : > { %v6561_v61 = vpop.f32.mrb[236].mxu0  ;;  %v8172_v30 = vrot.slane %v8160_v17, 1  ;;  %6936 = vst [vmem:[#allocation3 + $0xa30] sm:$0xff] %v5502_v22  ;;  %v5504_v14 = vpop.f32.mrb[237].mxu1  ;;  %v8237_v17 = vrot.slane %v8228_v46, %v12614_v23 }
 0x57b   : > { %v8135_v21 = vmax.f32 %v8131_v40, 0.0  ;;  %6938 = vst [vmem:[#allocation3 + $0xa40] sm:$0xff] %v6561_v61  ;;  %v6563_v50 = vpop.f32.mrb[237].mxu0  ;;  %8138 = vst [vmem:[%s12655_s25 + $0x190] sm:$0xff] %v8134_v5  ;;  %v8190_v36 = vld [vmem:[#allocation3 + $0x9e0] sm:$0xfc] }
 0x57c   : > { %v8161_v26 = vld [vmem:[#allocation3 + $0x9d8] sm:$0xfe]  ;;  %6937 = vst [vmem:[#allocation3 + $0xa38] sm:$0xff] %v5504_v14  ;;  %6939 = vst [vmem:[#allocation3 + $0xa48] sm:$0xff] %v6563_v50  ;;  %v5506_v55 = vpop.f32.mrb[238].mxu1  ;;  %v6565_v62 = vpop.f32.mrb[238].mxu0  ;;  %v8174_v56 = vsel %vm7026_vm0, %v8172_v30, %v8173_v20 }
 0x57d   : > { %8139 = vst [vmem:[%s12655_s25 + $0x198] sm:$0xff] %v8135_v21  ;;  %v8202_v10 = vrot.slane %v8190_v36, 2  ;;  %v8175_v58 = vrot.slane %v8161_v26, 1  ;;  %v8191_v12 = vld [vmem:[#allocation3 + $0x9e8] sm:$0xfc]  ;;  %v5508_v34 = vpop.f32.mrb[239].mxu1  ;;  %v8186_v57 = vadd.f32 %v8174_v56, %v8156_v33  ;;  %v8241_v21 = vrot.slane %v8228_v46, %v12623_v13 }
 0x57e   : > { %v6567_v52 = vpop.f32.mrb[239].mxu0  ;;  %v8205_v15 = vrot.slane %v8191_v12, 2  ;;  %v10513_v62 = vld [vmem:[#allocation3 + $0xa80] sm:$0xff] }
 0x57f   : > { %v8204_v9 = vsel %vm7057_vm1, %v8202_v10, %v8203_v45  ;;  %v8177_v43 = vsel %vm7026_vm0, %v8175_v58, %v8176_v1  ;;  %v8244_v10 = vadd.f32 %v10513_v62, %v8237_v17 }
 0x580   : > { %v8216_v3 = vadd.f32 %v8204_v9, %v8186_v57  ;;  %v8187_v60 = vadd.f32 %v8177_v43, %v8157_v42  ;;  %v8207_v47 = vsel %vm7057_vm1, %v8205_v15, %v8206_v8  ;;  %v10514_v43 = vld [vmem:[#allocation3 + $0xa88] sm:$0xff] }
 0x581   : > { %v8164_v0 = vld [vmem:[#allocation3 + $0xa30] sm:$0x1]  ;;  %v5512_v19 = vpop.f32.mrb[240].mxu1 }
 0x582   : > { %v8220_v37 = vmax.f32 %v8216_v3, 0.0  ;;  %v8217_v29 = vadd.f32 %v8207_v47, %v8187_v60  ;;  %v8194_v7 = vld [vmem:[#allocation3 + $0xa40] sm:$0x3]  ;;  %v8178_v11 = vrot.slane %v8164_v0, 1  ;;  %6948 = vst [vmem:[#allocation3 + $0xa90] sm:$0xff] %v5512_v19  ;;  %v6571_v18 = vpop.f32.mrb[240].mxu0 }
 0x583   : > { %v8208_v39 = vrot.slane %v8194_v7, 2  ;;  %v8165_v59 = vld [vmem:[#allocation3 + $0xa38] sm:$0x1]  ;;  %v8195_v27 = vld [vmem:[#allocation3 + $0xa48] sm:$0x3]  ;;  %v5514_v53 = vpop.f32.mrb[241].mxu1 }
 0x584   : > { %8224 = vst [vmem:[%s12655_s25 + $0x1a0] sm:$0xff] %v8220_v37  ;;  %v8221_v63 = vmax.f32 %v8217_v29, 0.0  ;;  %v8180_v35 = vrot.slane %v8165_v59, 1  ;;  %v8210_v38 = vrot.slane %v8195_v27, 2  ;;  %v8179_v32 = vsel %vm7026_vm0, %v8173_v20, %v8178_v11  ;;  %6950 = vst [vmem:[#allocation3 + $0xaa0] sm:$0xff] %v6571_v18  ;;  %v6573_v41 = vpop.f32.mrb[241].mxu0 }
 0x585   : > { %6949 = vst [vmem:[#allocation3 + $0xa98] sm:$0xff] %v5514_v53  ;;  %v13110_v51 = vpop.f32.mrb[242].mxu1  ;;  %v8188_v4 = vadd.f32 %v8179_v32, %v8158_v6  ;;  %6951 = vst [vmem:[#allocation3 + $0xaa8] sm:$0xff] %v6573_v41  ;;  %v13114_v54 = vpop.f32.mrb[242].mxu0  ;;  %v8209_v40 = vsel %vm7057_vm1, %v8203_v45, %v8208_v39  ;;  %v10515_v18 = vld [vmem:[#allocation3 + $0xab0] sm:$0xff] }
 0x586   : > { %8225 = vst [vmem:[%s12655_s25 + $0x1a8] sm:$0xff] %v8221_v63  ;;  %v8181_v24 = vsel %vm7026_vm0, %v8176_v1, %v8180_v35  ;;  %v13116_v25 = vpop.f32.mrb[243].mxu1  ;;  %v13121_v5 = vpop.f32.mrb[243].mxu0  ;;  %v8211_v22 = vsel %vm7057_vm1, %v8206_v8, %v8210_v38  ;;  %v8261_v14 = vrot.slane %v13110_v51, 1  ;;  %v8291_v33 = vrot.slane %v13114_v54, 2  ;;  %v10516_v51 = vld [vmem:[#allocation3 + $0xab8] sm:$0xff] }
 0x587   : > { %v8189_v28 = vadd.f32 %v8181_v24, %v8159_v2  ;;  %v8218_v20 = vadd.f32 %v8209_v40, %v8188_v4  ;;  %v8264_v36 = vrot.slane %v13116_v25, 1  ;;  %v8245_v8 = vadd.f32 %v10514_v43, %v8241_v21  ;;  %v8316_v24 = vld [vmem:[%s13231_s2] sm:$0x3] }
 0x588   : > { %v8294_v29 = vrot.slane %v13121_v5, 2  ;;  %v8246_v53 = vadd.f32 %v10515_v18, %v8237_v17  ;;  %v8247_v4 = vadd.f32 %v10516_v51, %v8241_v21  ;;  %v10520_v51 = vld [vmem:[#allocation3 + $0xb78] sm:$0xff] }
 0x589   : > { %v8219_v61 = vadd.f32 %v8211_v22, %v8189_v28  ;;  %v8222_v30 = vmax.f32 %v8218_v20, 0.0  ;;  %v8248_v1 = vld [vmem:[#allocation3 + $0xa90] sm:$0xfe]  ;;  %v5522_v50 = vpop.f32.mrb[244].mxu1 }
 0x58a   : > { %v6581_v16 = vpop.f32.mrb[244].mxu0  ;;  %v8260_v45 = vrot.slane %v8248_v1, 1  ;;  %6960 = vst [vmem:[#allocation3 + $0xaf0] sm:$0xff] %v5522_v50  ;;  %v5524_v26 = vpop.f32.mrb[245].mxu1  ;;  %v8325_v1 = vrot.slane %v8316_v24, %v12614_v23 }
 0x58b   : > { %v8223_v31 = vmax.f32 %v8219_v61, 0.0  ;;  %6962 = vst [vmem:[#allocation3 + $0xb00] sm:$0xff] %v6581_v16  ;;  %v6583_v55 = vpop.f32.mrb[245].mxu0  ;;  %8226 = vst [vmem:[%s12655_s25 + $0x1b0] sm:$0xff] %v8222_v30  ;;  %v8278_v58 = vld [vmem:[#allocation3 + $0xaa0] sm:$0xfc] }
 0x58c   : > { %v8249_v12 = vld [vmem:[#allocation3 + $0xa98] sm:$0xfe]  ;;  %6961 = vst [vmem:[#allocation3 + $0xaf8] sm:$0xff] %v5524_v26  ;;  %6963 = vst [vmem:[#allocation3 + $0xb08] sm:$0xff] %v6583_v55  ;;  %v5526_v56 = vpop.f32.mrb[246].mxu1  ;;  %v6585_v34 = vpop.f32.mrb[246].mxu0  ;;  %v8262_v15 = vsel %vm7026_vm0, %v8260_v45, %v8261_v14 }
 0x58d   : > { %8227 = vst [vmem:[%s12655_s25 + $0x1b8] sm:$0xff] %v8223_v31  ;;  %v8290_v52 = vrot.slane %v8278_v58, 2  ;;  %v8263_v48 = vrot.slane %v8249_v12, 1  ;;  %v8279_v42 = vld [vmem:[#allocation3 + $0xaa8] sm:$0xfc]  ;;  %v5528_v57 = vpop.f32.mrb[247].mxu1  ;;  %v8274_v60 = vadd.f32 %v8262_v15, %v8244_v10  ;;  %v8329_v31 = vrot.slane %v8316_v24, %v12623_v13 }
 0x58e   : > { %v6587_v9 = vpop.f32.mrb[247].mxu0  ;;  %v8293_v3 = vrot.slane %v8279_v42, 2  ;;  %v10517_v56 = vld [vmem:[#allocation3 + $0xb40] sm:$0xff] }
 0x58f   : > { %v8292_v47 = vsel %vm7057_vm1, %v8290_v52, %v8291_v33  ;;  %v8265_v37 = vsel %vm7026_vm0, %v8263_v48, %v8264_v36  ;;  %v8332_v13 = vadd.f32 %v10517_v56, %v8325_v1 }
 0x590   : > { %v8304_v0 = vadd.f32 %v8292_v47, %v8274_v60  ;;  %v8275_v7 = vadd.f32 %v8265_v37, %v8245_v8  ;;  %v8295_v19 = vsel %vm7057_vm1, %v8293_v3, %v8294_v29  ;;  %v10518_v60 = vld [vmem:[#allocation3 + $0xb48] sm:$0xff] }
 0x591   : > { %v8252_v59 = vld [vmem:[#allocation3 + $0xaf0] sm:$0x1]  ;;  %v5532_v49 = vpop.f32.mrb[248].mxu1  ;;  %v8333_v47 = vadd.f32 %v10518_v60, %v8329_v31 }
 0x592   : > { %v8308_v11 = vmax.f32 %v8304_v0, 0.0  ;;  %v8305_v39 = vadd.f32 %v8295_v19, %v8275_v7  ;;  %v8282_v27 = vld [vmem:[#allocation3 + $0xb00] sm:$0x3]  ;;  %v8266_v6 = vrot.slane %v8252_v59, 1  ;;  %6972 = vst [vmem:[#allocation3 + $0xb50] sm:$0xff] %v5532_v49  ;;  %v6591_v32 = vpop.f32.mrb[248].mxu0 }
 0x593   : > { %v8296_v63 = vrot.slane %v8282_v27, 2  ;;  %v8253_v35 = vld [vmem:[#allocation3 + $0xaf8] sm:$0x1]  ;;  %v8283_v38 = vld [vmem:[#allocation3 + $0xb08] sm:$0x3]  ;;  %v5534_v41 = vpop.f32.mrb[249].mxu1 }
 0x594   : > { %8312 = vst [vmem:[%s12655_s25 + $0x1c0] sm:$0xff] %v8308_v11  ;;  %v8309_v44 = vmax.f32 %v8305_v39, 0.0  ;;  %v8268_v2 = vrot.slane %v8253_v35, 1  ;;  %v8298_v46 = vrot.slane %v8283_v38, 2  ;;  %v8267_v25 = vsel %vm7026_vm0, %v8261_v14, %v8266_v6  ;;  %6974 = vst [vmem:[#allocation3 + $0xb60] sm:$0xff] %v6591_v32  ;;  %v6593_v40 = vpop.f32.mrb[249].mxu0 }
 0x595   : > { %6973 = vst [vmem:[#allocation3 + $0xb58] sm:$0xff] %v5534_v41  ;;  %v13143_v28 = vpop.f32.mrb[250].mxu1  ;;  %v8276_v5 = vadd.f32 %v8267_v25, %v8246_v53  ;;  %6975 = vst [vmem:[#allocation3 + $0xb68] sm:$0xff] %v6593_v40  ;;  %v13147_v20 = vpop.f32.mrb[250].mxu0  ;;  %v8297_v61 = vsel %vm7057_vm1, %v8291_v33, %v8296_v63 }
 0x596   : > { %8313 = vst [vmem:[%s12655_s25 + $0x1c8] sm:$0xff] %v8309_v44  ;;  %v8269_v17 = vsel %vm7026_vm0, %v8264_v36, %v8268_v2  ;;  %v13149_v22 = vpop.f32.mrb[251].mxu1  ;;  %v13154_v30 = vpop.f32.mrb[251].mxu0  ;;  %v8299_v50 = vsel %vm7057_vm1, %v8294_v29, %v8298_v46  ;;  %v8349_v26 = vrot.slane %v13143_v28, 1  ;;  %v8379_v10 = vrot.slane %v13147_v20, 2  ;;  %v10519_v44 = vld [vmem:[#allocation3 + $0xb70] sm:$0xff] }
 0x597   : > { %v8277_v21 = vadd.f32 %v8269_v17, %v8247_v4  ;;  %v8306_v14 = vadd.f32 %v8297_v61, %v8276_v5  ;;  %v8352_v23 = vrot.slane %v13149_v22, 1  ;;  %v8382_v19 = vrot.slane %v13154_v30, 2 }
 0x598   : > { %v8334_v2 = vadd.f32 %v10519_v44, %v8325_v1  ;;  %v8335_v4 = vadd.f32 %v10520_v51, %v8329_v31 }
 0x599   : > { %v8307_v16 = vadd.f32 %v8299_v50, %v8277_v21  ;;  %v8310_v45 = vmax.f32 %v8306_v14, 0.0  ;;  %v8336_v36 = vld [vmem:[#allocation3 + $0xb50] sm:$0xfe] }
 0x59a   : > { %v5542_v55 = vpop.f32.mrb[252].mxu1  ;;  %v6601_v54 = vpop.f32.mrb[252].mxu0  ;;  %v8348_v33 = vrot.slane %v8336_v36, 1 }
 0x59b   : > { %v8311_v62 = vmax.f32 %v8307_v16, 0.0  ;;  %6984 = vst [vmem:[#allocation3 + $0xbb0] sm:$0xff] %v5542_v55  ;;  %6986 = vst [vmem:[#allocation3 + $0xbc0] sm:$0xff] %v6601_v54  ;;  %v5544_v58 = vpop.f32.mrb[253].mxu1  ;;  %v6603_v12 = vpop.f32.mrb[253].mxu0 }
 0x59c   : > { %8314 = vst [vmem:[%s12655_s25 + $0x1d0] sm:$0xff] %v8310_v45  ;;  %v8366_v34 = vld [vmem:[#allocation3 + $0xb60] sm:$0xfc]  ;;  %v8337_v52 = vld [vmem:[#allocation3 + $0xb58] sm:$0xfe]  ;;  %6985 = vst [vmem:[#allocation3 + $0xbb8] sm:$0xff] %v5544_v58  ;;  %v8350_v43 = vsel %vm7026_vm0, %v8348_v33, %v8349_v26 }
 0x59d   : > { %6987 = vst [vmem:[#allocation3 + $0xbc8] sm:$0xff] %v6603_v12  ;;  %v5546_v48 = vpop.f32.mrb[254].mxu1  ;;  %v6605_v42 = vpop.f32.mrb[254].mxu0  ;;  %8315 = vst [vmem:[%s12655_s25 + $0x1d8] sm:$0xff] %v8311_v62  ;;  %v8378_v15 = vrot.slane %v8366_v34, 2  ;;  %v8351_v57 = vrot.slane %v8337_v52, 1  ;;  %v8362_v29 = vadd.f32 %v8350_v43, %v8332_v13 }
 0x59e   : > { %v8367_v9 = vld [vmem:[#allocation3 + $0xb68] sm:$0xfc]  ;;  %v5548_v8 = vpop.f32.mrb[255].mxu1  ;;  %v6607_v3 = vpop.f32.mrb[255].mxu0 }
 0x59f   : > { %v8381_v37 = vrot.slane %v8367_v9, 2  ;;  %v8380_v0 = vsel %vm7057_vm1, %v8378_v15, %v8379_v10  ;;  %v8353_v7 = vsel %vm7026_vm0, %v8351_v57, %v8352_v23 }
 0x5a0   : > { %v8392_v11 = vadd.f32 %v8380_v0, %v8362_v29  ;;  %v8363_v39 = vadd.f32 %v8353_v7, %v8333_v47 }
 0x5a1   : > { %v8383_v59 = vsel %vm7057_vm1, %v8381_v37, %v8382_v19 }
 0x5a2   : > { %v8396_v27 = vmax.f32 %v8392_v11, 0.0  ;;  %v8393_v49 = vadd.f32 %v8383_v59, %v8363_v39  ;;  %v8340_v6 = vld [vmem:[#allocation3 + $0xbb0] sm:$0x1]  ;;  %v8370_v63 = vld [vmem:[#allocation3 + $0xbc0] sm:$0x3] }
 0x5a3   : > { %v8354_v35 = vrot.slane %v8340_v6, 1  ;;  %v8384_v38 = vrot.slane %v8370_v63, 2  ;;  %v8341_v18 = vld [vmem:[#allocation3 + $0xbb8] sm:$0x1] }
 0x5a4   : > { %v8371_v53 = vld [vmem:[#allocation3 + $0xbc8] sm:$0x3]  ;;  %8400 = vst [vmem:[%s12655_s25 + $0x1e0] sm:$0xff] %v8396_v27  ;;  %v8397_v46 = vmax.f32 %v8393_v49, 0.0  ;;  %v8356_v32 = vrot.slane %v8341_v18, 1 }
 0x5a5   : > { %v8386_v41 = vrot.slane %v8371_v53, 2  ;;  %v8355_v24 = vsel %vm7026_vm0, %v8349_v26, %v8354_v35  ;;  %v8385_v28 = vsel %vm7057_vm1, %v8379_v10, %v8384_v38 }
 0x5a6   : > { %8401 = vst [vmem:[%s12655_s25 + $0x1e8] sm:$0xff] %v8397_v46  ;;  %v8364_v25 = vadd.f32 %v8355_v24, %v8334_v2  ;;  %v8357_v40 = vsel %vm7026_vm0, %v8352_v23, %v8356_v32 }
 0x5a7   : > { %v8365_v5 = vadd.f32 %v8357_v40, %v8335_v4  ;;  %v8387_v20 = vsel %vm7057_vm1, %v8382_v19, %v8386_v41 }
 0x5a8   : > { %v8394_v17 = vadd.f32 %v8385_v28, %v8364_v25 }
 0x5a9   : > { %v8395_v22 = vadd.f32 %v8387_v20, %v8365_v5 }
 0x5aa   : > { %v8398_v61 = vmax.f32 %v8394_v17, 0.0 }
 0x5ab   : > { %v8399_v21 = vmax.f32 %v8395_v22, 0.0 }
 0x5ac   : > { %8402 = vst [vmem:[%s12655_s25 + $0x1f0] sm:$0xff] %v8398_v61 }
 0x5ad   : > { %8403 = vst [vmem:[%s12655_s25 + $0x1f8] sm:$0xff] %v8399_v21 }
 0x5ae   : > { %10534 = shalt.err (!%p10531_p3)
}
 0x5af   : > { %s10535_s20 = scalar_lea.hbm %s13180_s29, 8192  ;;  %s10539_s7 = scalar_lea.hbm %s13232_s3, 16384 }
 0x5b0   : > { %p10536_p4 = scmp.ne.s32.totalorder %s13180_s29, %s10535_s20  ;;  %p10540_p9 = scmp.lt.u32.totalorder %s13180_s29, %s13232_s3 }
 0x5b1   : > { %p10541_p10 = scmp.lt.u32.totalorder %s10539_s7, %s10535_s20  ;;  %p10543_p12 = scmp.lt.u32.totalorder %s10535_s20, %s13180_s29 }
 0x5b2   : > { %p10537_p7 = pnand %p10536_p4, %p10646_p5 }
 0x5b3   : > { %p10542_p11 = por %p10541_p10, %p10540_p9 }
 0x5b4   : > { %p10538_p8 = pneg %p10537_p7 }
 0x5b5   : > { %p10544_p13 = por %p10543_p12, %p10542_p11 }
 0x5b7   : > { %p10545_p0 = pnand %p10544_p13, %p10538_p8 }
 0x5b9   : > { %10548 = shalt.err (!%p10545_p0)
}
 0x5ba   : > { %s10586_s10 = smov 256   ;;  %s10587_s11 = smov 16  }
 0x5bb   : > { %9773 = dma.vmem_to_hbm [thread:$0]  (%p10646_p5), %s13182_s24, 8192, %s13180_s29, %s13188_s16, %s10586_s10, %s10586_s10, %s10587_s11  }
 0x5bc PF: > { %p9779_p1 = scmp.ge.s32.totalorder %s10583_s15, 2  ;;  %s8433_s17 = sand.u32 1, %s10571_s12  }
 0x5bd   : > { %s8434_s19 = scalar_lea.sflag [#allocation5], %s8433_s17 }
 0x5be   : > { %p9776_p2 = pnand %p9779_p1, %p10650_p6 }
 0x5c0   : > { %10566 = dma.done.wait (!%p9776_p2), %s8434_s19, 8192  }
 0x5c1   : > { %10568 = vsyncadd (!%p9776_p2), %s8434_s19, 4294959104  ;;  %p13_p3 = scmp.ge.s32.totalorder %s10633_s18, 4   ;;  %s13235_s12 = smov %s10575_s13 }
 0x5c2   : > { %s13236_s13 = smov %s10579_s14  ;;  %s13237_s14 = smov %s10644_s21 }
 0x5c3   : > { %s13238_s15 = smov %s10633_s18  ;;  %15 = sbr.rel (!%p13_p3) target bundleno = 3 (0x3), region = 67 }
 0x5ca   :  { %8439 = vsyncpa [#allocation5], 1 }
 0x5cb   :  { %8441 = vsyncpa [#allocation5 + $0x1], 1 }

</bundles_post_ra>
